<compile_context>
chip_gen: v7x
topology: tpu7x:2x2x1
jax: 0.10.0
libtpu: 0.0.40
codegen_flags: <defaults>
</compile_context>

<pallas_src>
import functools
import math

import jax
import jax.numpy as jnp
from jax import lax
from jax.experimental import pallas as pl
from jax.experimental.pallas import tpu as pltpu

_NEG_INF = -1e30                      # large finite negative (robust vs fully-masked rows)
_VMEM_LIMIT = 32 * 1024 * 1024        # explicit scoped-VMEM budget, safe on v5e/v6e/v7x


def _pick_tile(dim, candidates):
    for c in candidates:
        if c <= dim and dim % c == 0:
            return c
    return dim


# ---------------- tiled, pipelined linear: y = x @ w.T (w in (N, K) torch layout) ----

def _linear_kernel(x_ref, w_ref, o_ref, acc_ref):
    @pl.when(pl.program_id(2) == 0)
    def _init():
        acc_ref[...] = jnp.zeros_like(acc_ref)

    # Contract the K axis of both operands directly (no in-kernel transpose);
    # operands stay in the input dtype, accumulation in f32 on the MXU.
    acc_ref[...] += lax.dot_general(
        x_ref[...], w_ref[...],
        dimension_numbers=(((1,), (1,)), ((), ())),
        preferred_element_type=jnp.float32,
    )

    @pl.when(pl.program_id(2) == pl.num_programs(2) - 1)
    def _done():
        o_ref[...] = acc_ref[...].astype(o_ref.dtype)


def _linear(x2d, w_nk):
    """x2d: (M, K) @ w_nk: (N, K) (PyTorch layout) -> (M, N)."""
    M, K = x2d.shape
    N = w_nk.shape[0]
    tm = _pick_tile(M, (256, 128, 64, 32, 16, 8))
    tn = _pick_tile(N, (256, 128, 64, 32, 16, 8))
    tk = _pick_tile(K, (512, 256, 128, 64, 32, 16, 8))
    grid = (M // tm, N // tn, K // tk)
    itemsize = jnp.dtype(x2d.dtype).itemsize
    cost = pl.CostEstimate(
        flops=2 * M * N * K,
        transcendentals=0,
        bytes_accessed=(M * K + N * K + M * N) * itemsize,
    )
    return pl.pallas_call(
        _linear_kernel,
        out_shape=jax.ShapeDtypeStruct((M, N), x2d.dtype),
        grid_spec=pltpu.PrefetchScalarGridSpec(
            num_scalar_prefetch=0,
            grid=grid,
            in_specs=[
                pl.BlockSpec((tm, tk), lambda i, j, k: (i, k)),
                pl.BlockSpec((tn, tk), lambda i, j, k: (j, k)),
            ],
            out_specs=pl.BlockSpec((tm, tn), lambda i, j, k: (i, j)),
            scratch_shapes=[pltpu.VMEM((tm, tn), jnp.float32)],
        ),
        compiler_params=pltpu.CompilerParams(
            dimension_semantics=("parallel", "parallel", "arbitrary"),
            vmem_limit_bytes=_VMEM_LIMIT,
        ),
        cost_estimate=cost,
    )(x2d, w_nk)


# ---------------- flash-style causal attention over packed qkv -----------------------

def _flash_kernel(q_ref, k_ref, v_ref, o_ref, m_sc, l_sc, acc_sc, *, scale, tq, tk):
    qi = pl.program_id(2)
    ki = pl.program_id(3)

    @pl.when(ki == 0)
    def _init():
        m_sc[...] = jnp.full_like(m_sc, _NEG_INF)
        l_sc[...] = jnp.zeros_like(l_sc)
        acc_sc[...] = jnp.zeros_like(acc_sc)

    # Causal block skipping: only blocks on/below the diagonal do any work.
    @pl.when(ki <= qi)
    def _compute():
        # q/k stay in the input dtype; contraction on the last dim of both
        # (no explicit k.T relayout), f32 accumulation on the MXU.
        s = lax.dot_general(
            q_ref[...], k_ref[...],
            dimension_numbers=(((1,), (1,)), ((), ())),
            preferred_element_type=jnp.float32,
        ) * scale
        row = qi * tq + lax.broadcasted_iota(jnp.int32, (tq, tk), 0)
        col = ki * tk + lax.broadcasted_iota(jnp.int32, (tq, tk), 1)
        s = jnp.where(col <= row, s, _NEG_INF)

        m_prev = m_sc[...]
        m_new = jnp.maximum(m_prev, jnp.max(s, axis=-1, keepdims=True))
        alpha = jnp.exp(m_prev - m_new)
        p = jnp.exp(s - m_new)
        l_sc[...] = alpha * l_sc[...] + jnp.sum(p, axis=-1, keepdims=True)
        acc_sc[...] = alpha * acc_sc[...] + jnp.dot(
            p.astype(v_ref.dtype), v_ref[...], preferred_element_type=jnp.float32)
        m_sc[...] = m_new

    @pl.when(ki == pl.num_programs(3) - 1)
    def _finalize():
        inv_l = pl.reciprocal(l_sc[...], approx=True)   # EUP slot; normalize once per row
        o_ref[...] = (acc_sc[...] * inv_l).astype(o_ref.dtype)


def _flash_attention(qkv, n_head):
    """qkv: (B, T, 3C) packed [q | k | v] along last dim -> (B, T, C).

    The per-head split and the (B,T,C)->(B,H,T,hd) transposes are folded into
    the BlockSpec index maps (column block offsets h, H+h, 2H+h on the 3C axis),
    so no extra HBM passes happen outside the kernel and the output stays (B,T,C).
    """
    B, T, C3 = qkv.shape
    C = C3 // 3
    H = n_head
    hd = C // H
    scale = 1.0 / math.sqrt(hd)
    # TODO(synk): for hd < 128, process a group of 128//hd heads per grid step to keep
    # the last block dim lane-dense (demo uses hd = 128 so blocks are already lane-dense).

    tq = _pick_tile(T, (128, 64, 32, 16, 8))
    tk = tq                               # causal block-skip assumes tq == tk
    nq = T // tq
    nk = T // tk

    def q_map(b, h, qi, ki):
        return (b, qi, h)

    def k_map(b, h, qi, ki):
        # Clamp above-diagonal blocks to the diagonal so skipped steps keep the
        # same block index (no re-DMA for work that is pl.when-skipped).
        return (b, jnp.minimum(ki, qi), H + h)

    def v_map(b, h, qi, ki):
        return (b, jnp.minimum(ki, qi), 2 * H + h)

    def o_map(b, h, qi, ki):
        return (b, qi, h)

    itemsize = jnp.dtype(qkv.dtype).itemsize
    cost = pl.CostEstimate(
        flops=2 * B * H * T * T * hd,            # causal ~halves the 4*B*H*T*T*hd
        transcendentals=B * H * T * T // 2,
        bytes_accessed=(3 * B * T * C + B * T * C) * itemsize,
    )

    kernel = functools.partial(_flash_kernel, scale=scale, tq=tq, tk=tk)
    return pl.pallas_call(
        kernel,
        out_shape=jax.ShapeDtypeStruct((B, T, C), qkv.dtype),
        grid_spec=pltpu.PrefetchScalarGridSpec(
            num_scalar_prefetch=0,
            grid=(B, H, nq, nk),
            in_specs=[
                pl.BlockSpec((None, tq, hd), q_map),
                pl.BlockSpec((None, tk, hd), k_map),
                pl.BlockSpec((None, tk, hd), v_map),
            ],
            out_specs=pl.BlockSpec((None, tq, hd), o_map),
            scratch_shapes=[
                pltpu.VMEM((tq, 1), jnp.float32),    # running max
                pltpu.VMEM((tq, 1), jnp.float32),    # running denominator
                pltpu.VMEM((tq, hd), jnp.float32),   # output accumulator
            ],
        ),
        compiler_params=pltpu.CompilerParams(
            dimension_semantics=("parallel", "parallel", "parallel", "arbitrary"),
            vmem_limit_bytes=_VMEM_LIMIT,
        ),
        cost_estimate=cost,
    )(qkv, qkv, qkv)


# ---------------- module forward ------------------------------------------------------

def causal_self_attention(x, w_attn, w_proj, n_head):
    """
    x:      (B, T, C)
    w_attn: (3C, C)  — PyTorch nn.Linear weight layout (out_features, in_features)
    w_proj: (C, C)
    """
    B, T, C = x.shape
    # c_attn: (B*T, C) x (3C, C) -> (B*T, 3C); reshape (B,T,C)<->(B*T,C) is free.
    qkv = _linear(x.reshape(B * T, C), w_attn).reshape(B, T, 3 * C)
    # flash attention consumes packed qkv directly (head split via index maps).
    attn_out = _flash_attention(qkv, n_head)                 # (B, T, C)
    # c_proj
    y = _linear(attn_out.reshape(B * T, C), w_proj).reshape(B, T, C)
    return y


# ---------------- demo ---------------------------------------------------------------

if __name__ == "__main__":
    # Small config consistent with the module: n_embd % n_head == 0, no bias.
    # hd = 128 keeps attention blocks lane-dense on TPU.
    B, T, C, H = 2, 256, 512, 4

    key = jax.random.PRNGKey(0)
    kx, ka, kp = jax.random.split(key, 3)

    x = jax.random.normal(kx, (B, T, C), dtype=jnp.float32)

    # nn.Linear default init: U(-1/sqrt(in), 1/sqrt(in)); bias=False per config.
    bound = 1.0 / math.sqrt(C)
    w_attn = jax.random.uniform(ka, (3 * C, C), jnp.float32, -bound, bound)
    w_proj = jax.random.uniform(kp, (C, C), jnp.float32, -bound, bound)

    fwd = jax.jit(causal_self_attention, static_argnums=3)
    y = fwd(x, w_attn, w_proj, H)
    jax.block_until_ready(y)

    # Pure-JAX reference for sanity.
    def ref(x, w_attn, w_proj, n_head):
        B, T, C = x.shape
        hd = C // n_head
        qkv = x @ w_attn.T
        q, k, v = jnp.split(qkv, 3, axis=-1)
        q = q.reshape(B, T, n_head, hd).transpose(0, 2, 1, 3)
        k = k.reshape(B, T, n_head, hd).transpose(0, 2, 1, 3)
        v = v.reshape(B, T, n_head, hd).transpose(0, 2, 1, 3)
        s = (q @ jnp.swapaxes(k, -1, -2)) / math.sqrt(hd)
        mask = jnp.tril(jnp.ones((T, T), bool))
        s = jnp.where(mask, s, -jnp.inf)
        p = jax.nn.softmax(s, axis=-1)
        o = (p @ v).transpose(0, 2, 1, 3).reshape(B, T, C)
        return o @ w_proj.T

    y_ref = ref(x, w_attn, w_proj, H)
    max_err = float(jnp.max(jnp.abs(y - y_ref)))
    # Tolerance accounts for approx reciprocal in the softmax epilogue.
    assert jnp.allclose(y, y_ref, atol=1e-2, rtol=1e-2), f"mismatch vs reference: {max_err}"

    print("KERNEL_OK")
</pallas_src>

<mosaic_0001>
module attributes {stable_mosaic.version = 11 : i64} {
  func.func @_linear_kernel(%arg0: i32, %arg1: i32, %arg2: i32, %arg3: memref<256x512xf32, #tpu.memory_space<vmem>>, %arg4: memref<256x512xf32, #tpu.memory_space<vmem>>, %arg5: memref<256x256xf32, #tpu.memory_space<vmem>>, %arg6: memref<256x256xf32, #tpu.memory_space<vmem>>) attributes {dimension_semantics = [#tpu.dimension_semantics<parallel>, #tpu.dimension_semantics<parallel>, #tpu.dimension_semantics<arbitrary>], iteration_bounds = array<i64: 2, 2, 1>, scalar_prefetch = 0 : i64, scratch_operands = 1 : i64, tpu.core_type = #tpu.core_type<tc>, window_params = [{transform_indices = @transform_0, window_bounds = array<i64: 256, 512>}, {transform_indices = @transform_1, window_bounds = array<i64: 256, 512>}, {transform_indices = @transform_2, window_bounds = array<i64: 256, 256>}]} {
    %c0_i32 = arith.constant 0 : i32
    %0 = arith.cmpi eq, %arg2, %c0_i32 : i32
    %1 = arith.extui %0 : i1 to i32
    %c0_i32_0 = arith.constant 0 : i32
    %2 = arith.cmpi ne, %1, %c0_i32_0 : i32
    scf.if %2 {
      %cst_10 = arith.constant 0.000000e+00 : f32
      %12 = vector.broadcast %cst_10 : f32 to vector<256x256xf32>
      %c0_11 = arith.constant 0 : index
      %c0_12 = arith.constant 0 : index
      %13 = vector.load %arg6[%c0_11, %c0_12] : memref<256x256xf32, #tpu.memory_space<vmem>>, vector<256x256xf32>
      tpu.vector_store %arg6[%c0_11, %c0_12], %12 {strides = array<i32>} : memref<256x256xf32, #tpu.memory_space<vmem>>, vector<256x256xf32>,
    } else {
    }
    %c0 = arith.constant 0 : index
    %c0_1 = arith.constant 0 : index
    %3 = vector.load %arg6[%c0, %c0_1] : memref<256x256xf32, #tpu.memory_space<vmem>>, vector<256x256xf32>
    %c0_2 = arith.constant 0 : index
    %c0_3 = arith.constant 0 : index
    %4 = vector.load %arg3[%c0_2, %c0_3] : memref<256x512xf32, #tpu.memory_space<vmem>>, vector<256x512xf32>
    %c0_4 = arith.constant 0 : index
    %c0_5 = arith.constant 0 : index
    %5 = vector.load %arg4[%c0_4, %c0_5] : memref<256x512xf32, #tpu.memory_space<vmem>>, vector<256x512xf32>
    %cst = arith.constant dense<0.000000e+00> : vector<256x256xf32>
    %6 = tpu.matmul %4, %5, %cst {dimension_numbers = #tpu.dot_dimension_numbers<[1], [1], [0], [0], [0, 0, 1, 0], [], []>} : vector<256x512xf32>, vector<256x512xf32>, vector<256x256xf32> -> vector<256x256xf32>
    %7 = arith.addf %3, %6 : vector<256x256xf32>
    %c0_6 = arith.constant 0 : index
    %c0_7 = arith.constant 0 : index
    %8 = vector.load %arg6[%c0_6, %c0_7] : memref<256x256xf32, #tpu.memory_space<vmem>>, vector<256x256xf32>
    tpu.vector_store %arg6[%c0_6, %c0_7], %7 {strides = array<i32>} : memref<256x256xf32, #tpu.memory_space<vmem>>, vector<256x256xf32>,
    %c0_i32_8 = arith.constant 0 : i32
    %9 = arith.cmpi eq, %arg2, %c0_i32_8 : i32
    %10 = arith.extui %9 : i1 to i32
    %c0_i32_9 = arith.constant 0 : i32
    %11 = arith.cmpi ne, %10, %c0_i32_9 : i32
    scf.if %11 {
      %c0_10 = arith.constant 0 : index
      %c0_11 = arith.constant 0 : index
      %12 = vector.load %arg6[%c0_10, %c0_11] : memref<256x256xf32, #tpu.memory_space<vmem>>, vector<256x256xf32>
      %c0_12 = arith.constant 0 : index
      %c0_13 = arith.constant 0 : index
      %13 = vector.load %arg5[%c0_12, %c0_13] : memref<256x256xf32, #tpu.memory_space<vmem>>, vector<256x256xf32>
      tpu.vector_store %arg5[%c0_12, %c0_13], %12 {strides = array<i32>} : memref<256x256xf32, #tpu.memory_space<vmem>>, vector<256x256xf32>,
    } else {
    }
    return
  }
  func.func @transform_0(%arg0: i32, %arg1: i32, %arg2: i32) -> (i32, i32) {
    %c0_i32 = arith.constant 0 : i32
    return %arg0, %arg2 : i32, i32
  }
  func.func @transform_1(%arg0: i32, %arg1: i32, %arg2: i32) -> (i32, i32) {
    %c0_i32 = arith.constant 0 : i32
    return %arg1, %arg2 : i32, i32
  }
  func.func @transform_2(%arg0: i32, %arg1: i32, %arg2: i32) -> (i32, i32) {
    %c0_i32 = arith.constant 0 : i32
    return %arg0, %arg1 : i32, i32
  }
}

module attributes {stable_mosaic.version = 11 : i64} {
  func.func @_linear_kernel(%arg0: i32, %arg1: i32, %arg2: i32, %arg3: memref<256x512xf32, #tpu.memory_space<vmem>>, %arg4: memref<256x512xf32, #tpu.memory_space<vmem>>, %arg5: memref<256x256xf32, #tpu.memory_space<vmem>>, %arg6: memref<256x256xf32, #tpu.memory_space<vmem>>) attributes {dimension_semantics = [#tpu.dimension_semantics<parallel>, #tpu.dimension_semantics<parallel>, #tpu.dimension_semantics<arbitrary>], iteration_bounds = array<i64: 2, 6, 1>, scalar_prefetch = 0 : i64, scratch_operands = 1 : i64, tpu.core_type = #tpu.core_type<tc>, window_params = [{transform_indices = @transform_0, window_bounds = array<i64: 256, 512>}, {transform_indices = @transform_1, window_bounds = array<i64: 256, 512>}, {transform_indices = @transform_2, window_bounds = array<i64: 256, 256>}]} {
    %c0_i32 = arith.constant 0 : i32
    %0 = arith.cmpi eq, %arg2, %c0_i32 : i32
    %1 = arith.extui %0 : i1 to i32
    %c0_i32_0 = arith.constant 0 : i32
    %2 = arith.cmpi ne, %1, %c0_i32_0 : i32
    scf.if %2 {
      %cst_10 = arith.constant 0.000000e+00 : f32
      %12 = vector.broadcast %cst_10 : f32 to vector<256x256xf32>
      %c0_11 = arith.constant 0 : index
      %c0_12 = arith.constant 0 : index
      %13 = vector.load %arg6[%c0_11, %c0_12] : memref<256x256xf32, #tpu.memory_space<vmem>>, vector<256x256xf32>
      tpu.vector_store %arg6[%c0_11, %c0_12], %12 {strides = array<i32>} : memref<256x256xf32, #tpu.memory_space<vmem>>, vector<256x256xf32>,
    } else {
    }
    %c0 = arith.constant 0 : index
    %c0_1 = arith.constant 0 : index
    %3 = vector.load %arg6[%c0, %c0_1] : memref<256x256xf32, #tpu.memory_space<vmem>>, vector<256x256xf32>
    %c0_2 = arith.constant 0 : index
    %c0_3 = arith.constant 0 : index
    %4 = vector.load %arg3[%c0_2, %c0_3] : memref<256x512xf32, #tpu.memory_space<vmem>>, vector<256x512xf32>
    %c0_4 = arith.constant 0 : index
    %c0_5 = arith.constant 0 : index
    %5 = vector.load %arg4[%c0_4, %c0_5] : memref<256x512xf32, #tpu.memory_space<vmem>>, vector<256x512xf32>
    %cst = arith.constant dense<0.000000e+00> : vector<256x256xf32>
    %6 = tpu.matmul %4, %5, %cst {dimension_numbers = #tpu.dot_dimension_numbers<[1], [1], [0], [0], [0, 0, 1, 0], [], []>} : vector<256x512xf32>, vector<256x512xf32>, vector<256x256xf32> -> vector<256x256xf32>
    %7 = arith.addf %3, %6 : vector<256x256xf32>
    %c0_6 = arith.constant 0 : index
    %c0_7 = arith.constant 0 : index
    %8 = vector.load %arg6[%c0_6, %c0_7] : memref<256x256xf32, #tpu.memory_space<vmem>>, vector<256x256xf32>
    tpu.vector_store %arg6[%c0_6, %c0_7], %7 {strides = array<i32>} : memref<256x256xf32, #tpu.memory_space<vmem>>, vector<256x256xf32>,
    %c0_i32_8 = arith.constant 0 : i32
    %9 = arith.cmpi eq, %arg2, %c0_i32_8 : i32
    %10 = arith.extui %9 : i1 to i32
    %c0_i32_9 = arith.constant 0 : i32
    %11 = arith.cmpi ne, %10, %c0_i32_9 : i32
    scf.if %11 {
      %c0_10 = arith.constant 0 : index
      %c0_11 = arith.constant 0 : index
      %12 = vector.load %arg6[%c0_10, %c0_11] : memref<256x256xf32, #tpu.memory_space<vmem>>, vector<256x256xf32>
      %c0_12 = arith.constant 0 : index
      %c0_13 = arith.constant 0 : index
      %13 = vector.load %arg5[%c0_12, %c0_13] : memref<256x256xf32, #tpu.memory_space<vmem>>, vector<256x256xf32>
      tpu.vector_store %arg5[%c0_12, %c0_13], %12 {strides = array<i32>} : memref<256x256xf32, #tpu.memory_space<vmem>>, vector<256x256xf32>,
    } else {
    }
    return
  }
  func.func @transform_0(%arg0: i32, %arg1: i32, %arg2: i32) -> (i32, i32) {
    %c0_i32 = arith.constant 0 : i32
    return %arg0, %arg2 : i32, i32
  }
  func.func @transform_1(%arg0: i32, %arg1: i32, %arg2: i32) -> (i32, i32) {
    %c0_i32 = arith.constant 0 : i32
    return %arg1, %arg2 : i32, i32
  }
  func.func @transform_2(%arg0: i32, %arg1: i32, %arg2: i32) -> (i32, i32) {
    %c0_i32 = arith.constant 0 : i32
    return %arg0, %arg1 : i32, i32
  }
}

module attributes {stable_mosaic.version = 11 : i64} {
  func.func @_flash_kernel(%arg0: i32, %arg1: i32, %arg2: i32, %arg3: i32, %arg4: memref<1x128x128xf32, #tpu.memory_space<vmem>>, %arg5: memref<1x128x128xf32, #tpu.memory_space<vmem>>, %arg6: memref<1x128x128xf32, #tpu.memory_space<vmem>>, %arg7: memref<1x128x128xf32, #tpu.memory_space<vmem>>, %arg8: memref<128x1xf32, #tpu.memory_space<vmem>>, %arg9: memref<128x1xf32, #tpu.memory_space<vmem>>, %arg10: memref<128x128xf32, #tpu.memory_space<vmem>>) attributes {dimension_semantics = [#tpu.dimension_semantics<parallel>, #tpu.dimension_semantics<parallel>, #tpu.dimension_semantics<parallel>, #tpu.dimension_semantics<arbitrary>], iteration_bounds = array<i64: 2, 4, 2, 2>, scalar_prefetch = 0 : i64, scratch_operands = 3 : i64, tpu.core_type = #tpu.core_type<tc>, window_params = [{transform_indices = @transform_0, window_bounds = array<i64: 1, 128, 128>}, {transform_indices = @transform_1, window_bounds = array<i64: 1, 128, 128>}, {transform_indices = @transform_2, window_bounds = array<i64: 1, 128, 128>}, {transform_indices = @transform_3, window_bounds = array<i64: 1, 128, 128>}]} {
    %c0_i32 = arith.constant 0 : i32
    %0 = arith.cmpi eq, %arg3, %c0_i32 : i32
    %1 = arith.extui %0 : i1 to i32
    %c0_i32_0 = arith.constant 0 : i32
    %2 = arith.cmpi ne, %1, %c0_i32_0 : i32
    scf.if %2 {
      %cst = arith.constant -1.000000e+30 : f32
      %9 = vector.broadcast %cst : f32 to vector<128x1xf32>
      %c0 = arith.constant 0 : index
      %c0_3 = arith.constant 0 : index
      %10 = vector.load %arg8[%c0, %c0_3] : memref<128x1xf32, #tpu.memory_space<vmem>>, vector<128x1xf32>
      tpu.vector_store %arg8[%c0, %c0_3], %9 {strides = array<i32>} : memref<128x1xf32, #tpu.memory_space<vmem>>, vector<128x1xf32>,
      %cst_4 = arith.constant 0.000000e+00 : f32
      %11 = vector.broadcast %cst_4 : f32 to vector<128x1xf32>
      %c0_5 = arith.constant 0 : index
      %c0_6 = arith.constant 0 : index
      %12 = vector.load %arg9[%c0_5, %c0_6] : memref<128x1xf32, #tpu.memory_space<vmem>>, vector<128x1xf32>
      tpu.vector_store %arg9[%c0_5, %c0_6], %11 {strides = array<i32>} : memref<128x1xf32, #tpu.memory_space<vmem>>, vector<128x1xf32>,
      %cst_7 = arith.constant 0.000000e+00 : f32
      %13 = vector.broadcast %cst_7 : f32 to vector<128x128xf32>
      %c0_8 = arith.constant 0 : index
      %c0_9 = arith.constant 0 : index
      %14 = vector.load %arg10[%c0_8, %c0_9] : memref<128x128xf32, #tpu.memory_space<vmem>>, vector<128x128xf32>
      tpu.vector_store %arg10[%c0_8, %c0_9], %13 {strides = array<i32>} : memref<128x128xf32, #tpu.memory_space<vmem>>, vector<128x128xf32>,
    } else {
    }
    %3 = arith.cmpi sle, %arg3, %arg2 : i32
    %4 = arith.extui %3 : i1 to i32
    %c0_i32_1 = arith.constant 0 : i32
    %5 = arith.cmpi ne, %4, %c0_i32_1 : i32
    scf.if %5 {
      %c0 = arith.constant 0 : index
      %c0_3 = arith.constant 0 : index
      %c0_4 = arith.constant 0 : index
      %9 = vector.load %arg4[%c0, %c0_3, %c0_4] : memref<1x128x128xf32, #tpu.memory_space<vmem>>, vector<1x128x128xf32>
      %10 = vector.shape_cast %9 : vector<1x128x128xf32> to vector<128x128xf32>
      %c0_5 = arith.constant 0 : index
      %c0_6 = arith.constant 0 : index
      %c0_7 = arith.constant 0 : index
      %11 = vector.load %arg5[%c0_5, %c0_6, %c0_7] : memref<1x128x128xf32, #tpu.memory_space<vmem>>, vector<1x128x128xf32>
      %12 = vector.shape_cast %11 : vector<1x128x128xf32> to vector<128x128xf32>
      %cst = arith.constant dense<0.000000e+00> : vector<128x128xf32>
      %13 = tpu.matmul %10, %12, %cst {dimension_numbers = #tpu.dot_dimension_numbers<[1], [1], [0], [0], [0, 0, 1, 0], [], []>} : vector<128x128xf32>, vector<128x128xf32>, vector<128x128xf32> -> vector<128x128xf32>
      %cst_8 = arith.constant 0.0883883461 : f32
      %14 = vector.broadcast %cst_8 : f32 to vector<128x128xf32>
      %15 = arith.mulf %13, %14 : vector<128x128xf32>
      %c128_i32 = arith.constant 128 : i32
      %16 = arith.muli %arg2, %c128_i32 : i32
      %17 = tpu.iota {dimensions = array<i32: 0>} : vector<128x128xi32>
      %18 = vector.broadcast %16 : i32 to vector<128x128xi32>
      %19 = arith.addi %18, %17 : vector<128x128xi32>
      %c128_i32_9 = arith.constant 128 : i32
      %20 = arith.muli %arg3, %c128_i32_9 : i32
      %21 = tpu.iota {dimensions = array<i32: 1>} : vector<128x128xi32>
      %22 = vector.broadcast %20 : i32 to vector<128x128xi32>
      %23 = arith.addi %22, %21 : vector<128x128xi32>
      %24 = arith.cmpi sle, %23, %19 : vector<128x128xi32>
      %cst_10 = arith.constant -1.000000e+30 : f32
      %25 = vector.broadcast %cst_10 : f32 to vector<128x128xf32>
      %26 = arith.select %24, %15, %25 : vector<128x128xi1>, vector<128x128xf32>
      %c0_11 = arith.constant 0 : index
      %c0_12 = arith.constant 0 : index
      %27 = vector.load %arg8[%c0_11, %c0_12] : memref<128x1xf32, #tpu.memory_space<vmem>>, vector<128x1xf32>
      %cst_13 = arith.constant dense<0xFF800000> : vector<128xf32>
      %28 = vector.multi_reduction <maximumf>, %26, %cst_13 [1] : vector<128x128xf32> to vector<128xf32>
      %29 = vector.shape_cast %28 : vector<128xf32> to vector<128x1xf32>
      %30 = arith.maximumf %27, %29 : vector<128x1xf32>
      %31 = arith.subf %27, %30 : vector<128x1xf32>
      %32 = math.exp %31 : vector<128x1xf32>
      %33 = vector.broadcast %30 : vector<128x1xf32> to vector<128x128xf32>
      %34 = arith.subf %26, %33 : vector<128x128xf32>
      %35 = math.exp %34 : vector<128x128xf32>
      %c0_14 = arith.constant 0 : index
      %c0_15 = arith.constant 0 : index
      %36 = vector.load %arg9[%c0_14, %c0_15] : memref<128x1xf32, #tpu.memory_space<vmem>>, vector<128x1xf32>
      %37 = arith.mulf %32, %36 : vector<128x1xf32>
      %cst_16 = arith.constant dense<0.000000e+00> : vector<128xf32>
      %38 = vector.multi_reduction <add>, %35, %cst_16 [1] : vector<128x128xf32> to vector<128xf32>
      %39 = vector.shape_cast %38 : vector<128xf32> to vector<128x1xf32>
      %40 = arith.addf %37, %39 : vector<128x1xf32>
      %c0_17 = arith.constant 0 : index
      %c0_18 = arith.constant 0 : index
      %41 = vector.load %arg9[%c0_17, %c0_18] : memref<128x1xf32, #tpu.memory_space<vmem>>, vector<128x1xf32>
      tpu.vector_store %arg9[%c0_17, %c0_18], %40 {strides = array<i32>} : memref<128x1xf32, #tpu.memory_space<vmem>>, vector<128x1xf32>,
      %c0_19 = arith.constant 0 : index
      %c0_20 = arith.constant 0 : index
      %42 = vector.load %arg10[%c0_19, %c0_20] : memref<128x128xf32, #tpu.memory_space<vmem>>, vector<128x128xf32>
      %43 = vector.broadcast %32 : vector<128x1xf32> to vector<128x128xf32>
      %44 = arith.mulf %43, %42 : vector<128x128xf32>
      %c0_21 = arith.constant 0 : index
      %c0_22 = arith.constant 0 : index
      %c0_23 = arith.constant 0 : index
      %45 = vector.load %arg6[%c0_21, %c0_22, %c0_23] : memref<1x128x128xf32, #tpu.memory_space<vmem>>, vector<1x128x128xf32>
      %46 = vector.shape_cast %45 : vector<1x128x128xf32> to vector<128x128xf32>
      %cst_24 = arith.constant dense<0.000000e+00> : vector<128x128xf32>
      %47 = tpu.matmul %35, %46, %cst_24 {dimension_numbers = #tpu.dot_dimension_numbers<[1], [0], [0], [1], [0, 0, 1, 1], [], []>} : vector<128x128xf32>, vector<128x128xf32>, vector<128x128xf32> -> vector<128x128xf32>
      %48 = arith.addf %44, %47 : vector<128x128xf32>
      %c0_25 = arith.constant 0 : index
      %c0_26 = arith.constant 0 : index
      %49 = vector.load %arg10[%c0_25, %c0_26] : memref<128x128xf32, #tpu.memory_space<vmem>>, vector<128x128xf32>
      tpu.vector_store %arg10[%c0_25, %c0_26], %48 {strides = array<i32>} : memref<128x128xf32, #tpu.memory_space<vmem>>, vector<128x128xf32>,
      %c0_27 = arith.constant 0 : index
      %c0_28 = arith.constant 0 : index
      %50 = vector.load %arg8[%c0_27, %c0_28] : memref<128x1xf32, #tpu.memory_space<vmem>>, vector<128x1xf32>
      tpu.vector_store %arg8[%c0_27, %c0_28], %30 {strides = array<i32>} : memref<128x1xf32, #tpu.memory_space<vmem>>, vector<128x1xf32>,
    } else {
    }
    %c1_i32 = arith.constant 1 : i32
    %6 = arith.cmpi eq, %arg3, %c1_i32 : i32
    %7 = arith.extui %6 : i1 to i32
    %c0_i32_2 = arith.constant 0 : i32
    %8 = arith.cmpi ne, %7, %c0_i32_2 : i32
    scf.if %8 {
      %c0 = arith.constant 0 : index
      %c0_3 = arith.constant 0 : index
      %9 = vector.load %arg9[%c0, %c0_3] : memref<128x1xf32, #tpu.memory_space<vmem>>, vector<128x1xf32>
      %10 = tpu.reciprocal %9 {approx = true} : vector<128x1xf32> -> vector<128x1xf32>
      %c0_4 = arith.constant 0 : index
      %c0_5 = arith.constant 0 : index
      %11 = vector.load %arg10[%c0_4, %c0_5] : memref<128x128xf32, #tpu.memory_space<vmem>>, vector<128x128xf32>
      %12 = vector.broadcast %10 : vector<128x1xf32> to vector<128x128xf32>
      %13 = arith.mulf %11, %12 : vector<128x128xf32>
      %c0_6 = arith.constant 0 : index
      %c0_7 = arith.constant 0 : index
      %c0_8 = arith.constant 0 : index
      %14 = vector.load %arg7[%c0_6, %c0_7, %c0_8] : memref<1x128x128xf32, #tpu.memory_space<vmem>>, vector<1x128x128xf32>
      %15 = vector.shape_cast %14 : vector<1x128x128xf32> to vector<128x128xf32>
      %16 = vector.shape_cast %13 : vector<128x128xf32> to vector<1x128x128xf32>
      tpu.vector_store %arg7[%c0_6, %c0_7, %c0_8], %16 {strides = array<i32>} : memref<1x128x128xf32, #tpu.memory_space<vmem>>, vector<1x128x128xf32>,
    } else {
    }
    return
  }
  func.func @transform_0(%arg0: i32, %arg1: i32, %arg2: i32, %arg3: i32) -> (i32, i32, i32) {
    %c0_i32 = arith.constant 0 : i32
    return %arg0, %arg2, %arg1 : i32, i32, i32
  }
  func.func @transform_1(%arg0: i32, %arg1: i32, %arg2: i32, %arg3: i32) -> (i32, i32, i32) {
    %0 = arith.minsi %arg3, %arg2 : i32
    %c4_i32 = arith.constant 4 : i32
    %1 = arith.addi %c4_i32, %arg1 : i32
    %c0_i32 = arith.constant 0 : i32
    return %arg0, %0, %1 : i32, i32, i32
  }
  func.func @transform_2(%arg0: i32, %arg1: i32, %arg2: i32, %arg3: i32) -> (i32, i32, i32) {
    %0 = arith.minsi %arg3, %arg2 : i32
    %c8_i32 = arith.constant 8 : i32
    %1 = arith.addi %c8_i32, %arg1 : i32
    %c0_i32 = arith.constant 0 : i32
    return %arg0, %0, %1 : i32, i32, i32
  }
  func.func @transform_3(%arg0: i32, %arg1: i32, %arg2: i32, %arg3: i32) -> (i32, i32, i32) {
    %c0_i32 = arith.constant 0 : i32
    return %arg0, %arg2, %arg1 : i32, i32, i32
  }
}

</mosaic_0001>

<bundles_post_ra>
// kernel: causal_self_attention.5
= control target key start
LH: loop header
LB: loop body
LE: loop exit
PB: predicated region body
PF: predicated region fallthrough
CT: control target
= control target key end

     0   :  { %7 = vsyncpa [#allocation4], 0  ;;  %s2383_s0 = inlined_call_operand.vmem [shape: f32[512,512], index: 0, kind: input, shape index: {}]   ;;  %s2384_s1 = inlined_call_operand.vmem [shape: f32[512,512], index: 1, kind: input, shape index: {}]   ;;  %s2385_s2 = inlined_call_operand.hbm [shape: f32[512,512], index: 2, kind: output, shape index: {}]  }
   0x1   :  { %9 = vsyncpa [#allocation4 + $0x1], 0  ;;  %s1911_s9 = smov 0   ;;  %s1913_s10 = smov 0  }
   0x2   :  { %s1915_s11 = smov 0   ;;  %s1917_s12 = smov 0  }
   0x3   :  { %s1919_s13 = smov 0   ;;  %s1921_s14 = smov 0  }
   0x4   :  { %s1923_s15 = smov 0   ;;  %s1925_s16 = smov 0  }
   0x5 LB: > { %s1508_s17 = sadd.s32 4294967295, %s1890_s16   ;;  %s1509_s18 = sadd.s32 4294967294, %s1890_s16   ;;  %s1890_s16 = sphi %s1925_s16, %s15_s16   ;;  %s1886_s15 = sphi %s1923_s15, %s2394_s15   ;;  %s1882_s14 = sphi %s1921_s14, %s2393_s14   ;;  %s1878_s13 = sphi %s1919_s13, %s2392_s13   ;;  %s1874_s12 = sphi %s1917_s12, %s2391_s12   ;;  %s1870_s11 = sphi %s1915_s11, %s2390_s11   ;;  %s1866_s10 = sphi %s1913_s10, %s2389_s10   ;;  %s1862_s9 = sphi %s1911_s9, %s2388_s9  }
   0x6   : > { %s30_s19 = sadd.s32 1, %s1882_s14  ;;  %s34_s20 = sadd.s32 1, %s1886_s15 }
   0x7   : > { %p32_p0 = scmp.ge.s32.totalorder %s30_s19, 2  ;;  %p109_p1 = scmp.ne.s32.totalorder %s1870_s11, %s1866_s10 }
   0x8   : > { %p110_p2 = scmp.eq.s32.totalorder %s1508_s17, 3  ;;  %p115_p5 = scmp.ne.s32.totalorder %s1866_s10, %s1862_s9 }
   0x9   : > { %s2396_s19 = smov (%p32_p0, %s30_s19), 0  ;;  %s2398_s20 = smov (!%p32_p0, %s34_s20), %s1886_s15 }
   0xa   : > { %s95_s21 = ssub.s32 %s1882_s14, %s2396_s19  ;;  %p1962_p3 = por %p110_p2, %p109_p1 }
   0xb   : > { %p36_p4 = scmp.ge.s32.totalorder %s2398_s20, 2  ;;  %p116_p6 = scmp.eq.s32.totalorder %s1509_s18, 3 }
   0xc   : > { %p1512_p7 = scmp.ge.s32.totalorder %s1890_s16, 1  ;;  %p164_p9 = scmp.lt.s32.totalorder %s1890_s16, 5 }
   0xd   : > { %s2400_s20 = smov (%p36_p4, %s2398_s20), 0  ;;  %p1971_p8 = por %p116_p6, %p115_p5 }
   0xe   : > { %s94_s24 = ssub.s32 %s1886_s15, %s2400_s20  ;;  %s99_s25 = sadd.s32 1, %s1870_s11 }
   0xf   : > { %s96_s26 = sor.u32 %s95_s21, %s94_s24  ;;  %p165_p10 = pnand %p1512_p7, %p164_p9 }
  0x10   : > { %p97_p11 = scmp.eq.s32.totalorder %s96_s26, 0  ;;  %s1517_s28 = sshll.u32 (!%p165_p10), %s1874_s12, 5 }
  0x11   : > { %168 = sbr.rel (%p165_p10) target bundleno = 515 (0x203), region = 28  ;;  %p215_p12 = scmp.lt.s32.totalorder (!%p165_p10), %s1517_s28, 63 }
  0x12   : > { %s1980_s27 = scalar_select %p97_p11, %s1870_s11, %s99_s25  }
  0x13   : > { %s1514_s5 = sshll.u32 (!%p165_p10), %s1878_s13, 5  ;;  %s198_s18 = sand.u32 (!%p165_p10), 1, %s1866_s10  }
  0x14   : > { %p203_p13 = scmp.lt.s32.totalorder (!%p165_p10), %s1514_s5, 63  ;;  %s1513_s21 = sshll.u32 (!%p165_p10), %s198_s18, 9 }
  0x15   : > { %s2253_s24 = scalar_lea.vmem (!%p165_p10), [#allocation3], %s1513_s21  ;;  %s1522_s25 = sshll.u32 (!%p165_p10), %s1874_s12, 1 }
  0x16   : > { %s1529_s26 = sshll.u32 (!%p165_p10), %s1878_s13, 7  ;;  %s1405_s13 = sshll.u32 (!%p165_p10), %s2253_s24, 4  ;;  %s2325_s13 = int_to_ptr.vmem [resolvable:$true] %s1405_s13 }
  0x18   : > { %s2402_s28 = smov (!%p215_p12, %s1517_s28), 63  ;;  %s2404_s5 = smov (!%p203_p13, %s1514_s5), 63 }
  0x19   : > { %s1528_s29 = sshll.u32 %s2402_s28, 5  ;;  %s1527_s6 = sshll.u32 %s2404_s5, 5 }
  0x1a   : > { %s1986_s4 = scalar_lea.vmem %s2384_s1, %s1528_s29  ;;  %s2044_s17 = scalar_lea.vmem %s2383_s0, %s1527_s6 }
  0x1b   : > { %v488_v0 = vld [vmem:[%s1986_s4 + $0x8] sm:$0xff]  ;;  %v490_v2 = vld [vmem:[%s1986_s4 + $0x18] sm:$0xff]  ;;  %v487_v5 = vld [vmem:[%s1986_s4] sm:$0xff]  ;;  %s1402_s28 = sadd.s32 %s1529_s26, %s1522_s25  ;;  %s1796_s5 = scalar_lea.vmem %s2325_s13, 8192 }
  0x1c   : > { %v492_v1 = vld [vmem:[%s1986_s4 + $0x28] sm:$0xff]  ;;  %v494_v4 = vld [vmem:[%s1986_s4 + $0x38] sm:$0xff]  ;;  %v491_v6 = vld [vmem:[%s1986_s4 + $0x20] sm:$0xff]  ;;  %s1524_s12 = sshll.u32 %s1402_s28, 7  ;;  %p1797_p0 = scmp.ne.s32.totalorder %s2325_s13, %s1796_s5 }
  0x1d   : > { %v1530_v3 = vpack.c.bf16 %v492_v1, %v488_v0  ;;  %v1594_v7 = vpack.c.bf16 %v494_v4, %v490_v2  ;;  %v1532_v8 = vpack.c.bf16 %v491_v6, %v487_v5  ;;  %v489_v9 = vld [vmem:[%s1986_s4 + $0x10] sm:$0xff]  ;;  %v496_v11 = vld [vmem:[%s1986_s4 + $0x48] sm:$0xff]  ;;  %v498_v14 = vld [vmem:[%s1986_s4 + $0x58] sm:$0xff]  ;;  %s2323_s3 = scalar_lea.hbm %s2385_s2, %s1524_s12  ;;  %s1892_s6 = smov [#allocation3]  }
  0x1e   : > { %v493_v10 = vld [vmem:[%s1986_s4 + $0x30] sm:$0xff]  ;;  %v500_v13 = vld [vmem:[%s1986_s4 + $0x68] sm:$0xff]  ;;  %v502_v15 = vld [vmem:[%s1986_s4 + $0x78] sm:$0xff]  ;;  %p1798_p1 = pnand %p1797_p0, %p1962_p3  ;;  %s1800_s7 = sshll.u32 %s1892_s6, 4  ;;  %s1801_s7 = int_to_ptr.vmem [resolvable:$false] %s1800_s7 }
  0x1f   : > { %1531 = vmatprep.subr.bf16.mxu1 %v1530_v3  ;;  %v1596_v12 = vpack.c.bf16 %v493_v10, %v489_v9  ;;  %1595 = vmatprep.subr.bf16.mxu0 %v1594_v7  ;;  %v1534_v16 = vpack.c.bf16 %v500_v13, %v496_v11  ;;  %v1598_v17 = vpack.c.bf16 %v502_v15, %v498_v14  ;;  %v495_v18 = vld [vmem:[%s1986_s4 + $0x40] sm:$0xff]  ;;  %v497_v20 = vld [vmem:[%s1986_s4 + $0x50] sm:$0xff]  ;;  %v504_v22 = vld [vmem:[%s1986_s4 + $0x88] sm:$0xff]  ;;  %s1802_s8 = scalar_lea.vmem %s1801_s7, 16384  ;;  %p1803_p4 = scmp.lt.s32.totalorder %s2325_s13, %s1801_s7 }
  0x20   : > { %1533 = vmatpush1.bf16.xpose.msra.mxu1 %v1532_v8  ;;  %v499_v19 = vld [vmem:[%s1986_s4 + $0x60] sm:$0xff]  ;;  %v501_v21 = vld [vmem:[%s1986_s4 + $0x70] sm:$0xff]  ;;  %v508_v23 = vld [vmem:[%s1986_s4 + $0xa8] sm:$0xff]  ;;  %p1799_p2 = pneg %p1798_p1  ;;  %p1804_p5 = scmp.lt.s32.totalorder %s1802_s8, %s1796_s5 }
  0x21   : > { %1597 = vmatpush1.bf16.xpose.msra.mxu0 %v1596_v12  ;;  %1535 = vmatprep.subr.bf16.mxu1 %v1534_v16  ;;  %v506_v24 = vld [vmem:[%s1986_s4 + $0x98] sm:$0xff]  ;;  %v1536_v26 = vpack.c.bf16 %v499_v19, %v495_v18  ;;  %v1600_v27 = vpack.c.bf16 %v501_v21, %v497_v20  ;;  %v1538_v28 = vpack.c.bf16 %v508_v23, %v504_v22  ;;  %v503_v30 = vld [vmem:[%s1986_s4 + $0x80] sm:$0xff]  ;;  %v505_v32 = vld [vmem:[%s1986_s4 + $0x90] sm:$0xff] }
  0x22   : > { %1599 = vmatprep.subr.bf16.mxu0 %v1598_v17  ;;  %v510_v25 = vld [vmem:[%s1986_s4 + $0xb8] sm:$0xff]  ;;  %v507_v31 = vld [vmem:[%s1986_s4 + $0xa0] sm:$0xff]  ;;  %v509_v33 = vld [vmem:[%s1986_s4 + $0xb0] sm:$0xff]  ;;  %p1805_p6 = por %p1804_p5, %p1803_p4 }
  0x23   : > { %v1602_v29 = vpack.c.bf16 %v510_v25, %v506_v24  ;;  %v512_v34 = vld [vmem:[%s1986_s4 + $0xc8] sm:$0xff]  ;;  %v514_v36 = vld [vmem:[%s1986_s4 + $0xd8] sm:$0xff]  ;;  %v1540_v38 = vpack.c.bf16 %v507_v31, %v503_v30  ;;  %v1604_v39 = vpack.c.bf16 %v509_v33, %v505_v32  ;;  %v511_v42 = vld [vmem:[%s1986_s4 + $0xc0] sm:$0xff] }
  0x24   : > { %v516_v35 = vld [vmem:[%s1986_s4 + $0xe8] sm:$0xff]  ;;  %v518_v37 = vld [vmem:[%s1986_s4 + $0xf8] sm:$0xff]  ;;  %v515_v43 = vld [vmem:[%s1986_s4 + $0xe0] sm:$0xff]  ;;  %p1806_p7 = pnand %p1805_p6, %p1799_p2 }
  0x25   : > { %v1542_v40 = vpack.c.bf16 %v516_v35, %v512_v34  ;;  %v1606_v41 = vpack.c.bf16 %v518_v37, %v514_v36  ;;  %v513_v44 = vld [vmem:[%s1986_s4 + $0xd0] sm:$0xff]  ;;  %v520_v46 = vld [vmem:[%s1986_s4 + $0x108] sm:$0xff]  ;;  %v522_v48 = vld [vmem:[%s1986_s4 + $0x118] sm:$0xff]  ;;  %v1544_v50 = vpack.c.bf16 %v515_v43, %v511_v42 }
  0x26   : > { %v517_v45 = vld [vmem:[%s1986_s4 + $0xf0] sm:$0xff]  ;;  %v524_v47 = vld [vmem:[%s1986_s4 + $0x128] sm:$0xff]  ;;  %v526_v49 = vld [vmem:[%s1986_s4 + $0x138] sm:$0xff] }
  0x27   : > { %v1608_v51 = vpack.c.bf16 %v517_v45, %v513_v44  ;;  %v1546_v52 = vpack.c.bf16 %v524_v47, %v520_v46  ;;  %v1610_v53 = vpack.c.bf16 %v526_v49, %v522_v48  ;;  %v519_v54 = vld [vmem:[%s1986_s4 + $0x100] sm:$0xff]  ;;  %v521_v56 = vld [vmem:[%s1986_s4 + $0x110] sm:$0xff]  ;;  %v528_v58 = vld [vmem:[%s1986_s4 + $0x148] sm:$0xff] }
  0x28   : > { %1537 = vmatpush1.bf16.xpose.msra.mxu1 %v1536_v26  ;;  %v523_v55 = vld [vmem:[%s1986_s4 + $0x120] sm:$0xff]  ;;  %v525_v57 = vld [vmem:[%s1986_s4 + $0x130] sm:$0xff]  ;;  %v532_v59 = vld [vmem:[%s1986_s4 + $0x168] sm:$0xff] }
  0x29   : > { %1601 = vmatpush1.bf16.xpose.msra.mxu0 %v1600_v27  ;;  %1539 = vmatprep.subr.bf16.mxu1 %v1538_v28  ;;  %v530_v60 = vld [vmem:[%s1986_s4 + $0x158] sm:$0xff]  ;;  %v1548_v62 = vpack.c.bf16 %v523_v55, %v519_v54  ;;  %v1612_v63 = vpack.c.bf16 %v525_v57, %v521_v56  ;;  %v1550_v0 = vpack.c.bf16 %v532_v59, %v528_v58  ;;  %v527_v2 = vld [vmem:[%s1986_s4 + $0x140] sm:$0xff]  ;;  %v529_v4 = vld [vmem:[%s1986_s4 + $0x150] sm:$0xff] }
  0x2a   : > { %1603 = vmatprep.subr.bf16.mxu0 %v1602_v29  ;;  %v534_v61 = vld [vmem:[%s1986_s4 + $0x178] sm:$0xff]  ;;  %v531_v3 = vld [vmem:[%s1986_s4 + $0x160] sm:$0xff]  ;;  %v533_v5 = vld [vmem:[%s1986_s4 + $0x170] sm:$0xff] }
  0x2b   : > { %v1614_v1 = vpack.c.bf16 %v534_v61, %v530_v60  ;;  %v536_v6 = vld [vmem:[%s1986_s4 + $0x188] sm:$0xff]  ;;  %v538_v8 = vld [vmem:[%s1986_s4 + $0x198] sm:$0xff]  ;;  %v1552_v10 = vpack.c.bf16 %v531_v3, %v527_v2  ;;  %v1616_v11 = vpack.c.bf16 %v533_v5, %v529_v4  ;;  %v535_v16 = vld [vmem:[%s1986_s4 + $0x180] sm:$0xff] }
  0x2c   : > { %v540_v7 = vld [vmem:[%s1986_s4 + $0x1a8] sm:$0xff]  ;;  %v542_v9 = vld [vmem:[%s1986_s4 + $0x1b8] sm:$0xff]  ;;  %v539_v17 = vld [vmem:[%s1986_s4 + $0x1a0] sm:$0xff] }
  0x2d   : > { %v1554_v12 = vpack.c.bf16 %v540_v7, %v536_v6  ;;  %v1618_v13 = vpack.c.bf16 %v542_v9, %v538_v8  ;;  %v360_v14 = vld [vmem:[%s2044_s17 + $0x8] sm:$0xff]  ;;  %v362_v15 = vld [vmem:[%s2044_s17 + $0x18] sm:$0xff]  ;;  %v537_v18 = vld [vmem:[%s1986_s4 + $0x190] sm:$0xff]  ;;  %v1556_v24 = vpack.c.bf16 %v539_v17, %v535_v16 }
  0x2e   : > { %679 = vmatprep.mubr.f32.mxu1 %v360_v14  ;;  %936 = vmatprep.mubr.f32.mxu0 %v362_v15  ;;  %v541_v19 = vld [vmem:[%s1986_s4 + $0x1b0] sm:$0xff]  ;;  %v544_v20 = vld [vmem:[%s1986_s4 + $0x1c8] sm:$0xff]  ;;  %v546_v22 = vld [vmem:[%s1986_s4 + $0x1d8] sm:$0xff] }
  0x2f   : > { %v548_v21 = vld [vmem:[%s1986_s4 + $0x1e8] sm:$0xff]  ;;  %v550_v23 = vld [vmem:[%s1986_s4 + $0x1f8] sm:$0xff]  ;;  %v1620_v25 = vpack.c.bf16 %v541_v19, %v537_v18  ;;  %v543_v28 = vld [vmem:[%s1986_s4 + $0x1c0] sm:$0xff] }
  0x30   : > { %1541 = vmatpush1.bf16.xpose.msra.mxu1 %v1540_v38  ;;  %v1558_v26 = vpack.c.bf16 %v548_v21, %v544_v20  ;;  %v1622_v27 = vpack.c.bf16 %v550_v23, %v546_v22  ;;  %v547_v29 = vld [vmem:[%s1986_s4 + $0x1e0] sm:$0xff]  ;;  %v545_v30 = vld [vmem:[%s1986_s4 + $0x1d0] sm:$0xff]  ;;  %v552_v32 = vld [vmem:[%s1986_s4 + $0x208] sm:$0xff] }
  0x31   : > { %1605 = vmatpush1.bf16.xpose.msra.mxu0 %v1604_v39  ;;  %1543 = vmatprep.subr.bf16.mxu1 %v1542_v40  ;;  %v549_v31 = vld [vmem:[%s1986_s4 + $0x1f0] sm:$0xff]  ;;  %v556_v33 = vld [vmem:[%s1986_s4 + $0x228] sm:$0xff]  ;;  %v554_v34 = vld [vmem:[%s1986_s4 + $0x218] sm:$0xff]  ;;  %v1560_v36 = vpack.c.bf16 %v547_v29, %v543_v28 }
  0x32   : > { %1607 = vmatprep.subr.bf16.mxu0 %v1606_v41  ;;  %v558_v35 = vld [vmem:[%s1986_s4 + $0x238] sm:$0xff]  ;;  %v1624_v37 = vpack.c.bf16 %v549_v31, %v545_v30  ;;  %v1562_v38 = vpack.c.bf16 %v556_v33, %v552_v32  ;;  %v551_v40 = vld [vmem:[%s1986_s4 + $0x200] sm:$0xff]  ;;  %v553_v42 = vld [vmem:[%s1986_s4 + $0x210] sm:$0xff] }
  0x33   : > { %v1626_v39 = vpack.c.bf16 %v558_v35, %v554_v34  ;;  %v555_v41 = vld [vmem:[%s1986_s4 + $0x220] sm:$0xff]  ;;  %v557_v43 = vld [vmem:[%s1986_s4 + $0x230] sm:$0xff]  ;;  %v560_v44 = vld [vmem:[%s1986_s4 + $0x248] sm:$0xff] }
  0x34   : > { %v564_v45 = vld [vmem:[%s1986_s4 + $0x268] sm:$0xff]  ;;  %v562_v46 = vld [vmem:[%s1986_s4 + $0x258] sm:$0xff]  ;;  %v1564_v48 = vpack.c.bf16 %v555_v41, %v551_v40  ;;  %v1628_v49 = vpack.c.bf16 %v557_v43, %v553_v42  ;;  %v561_v54 = vld [vmem:[%s1986_s4 + $0x250] sm:$0xff] }
  0x35   : > { %v566_v47 = vld [vmem:[%s1986_s4 + $0x278] sm:$0xff]  ;;  %v565_v55 = vld [vmem:[%s1986_s4 + $0x270] sm:$0xff]  ;;  %v568_v56 = vld [vmem:[%s1986_s4 + $0x288] sm:$0xff] }
  0x36   : > { %v572_v57 = vld [vmem:[%s1986_s4 + $0x2a8] sm:$0xff]  ;;  %v570_v58 = vld [vmem:[%s1986_s4 + $0x298] sm:$0xff]  ;;  %v1632_v61 = vpack.c.bf16 %v565_v55, %v561_v54  ;;  %v569_v2 = vld [vmem:[%s1986_s4 + $0x290] sm:$0xff] }
  0x37   : > { %v574_v59 = vld [vmem:[%s1986_s4 + $0x2b8] sm:$0xff]  ;;  %v573_v3 = vld [vmem:[%s1986_s4 + $0x2b0] sm:$0xff]  ;;  %v576_v4 = vld [vmem:[%s1986_s4 + $0x2c8] sm:$0xff] }
  0x38   : > { %1545 = vmatpush1.bf16.xpose.msra.mxu1 %v1544_v50  ;;  %v1566_v50 = vpack.c.bf16 %v564_v45, %v560_v44  ;;  %v580_v5 = vld [vmem:[%s1986_s4 + $0x2e8] sm:$0xff]  ;;  %v578_v6 = vld [vmem:[%s1986_s4 + $0x2d8] sm:$0xff]  ;;  %v1636_v9 = vpack.c.bf16 %v573_v3, %v569_v2  ;;  %v577_v14 = vld [vmem:[%s1986_s4 + $0x2d0] sm:$0xff] }
  0x39   : > { %1609 = vmatpush1.bf16.xpose.msra.mxu0 %v1608_v51  ;;  %1547 = vmatprep.subr.bf16.mxu1 %v1546_v52  ;;  %v1630_v51 = vpack.c.bf16 %v566_v47, %v562_v46  ;;  %v559_v52 = vld [vmem:[%s1986_s4 + $0x240] sm:$0xff]  ;;  %v582_v7 = vld [vmem:[%s1986_s4 + $0x2f8] sm:$0xff]  ;;  %v581_v15 = vld [vmem:[%s1986_s4 + $0x2f0] sm:$0xff] }
  0x3a   : > { %1611 = vmatprep.subr.bf16.mxu0 %v1610_v53  ;;  %v563_v53 = vld [vmem:[%s1986_s4 + $0x260] sm:$0xff]  ;;  %v584_v16 = vld [vmem:[%s1986_s4 + $0x308] sm:$0xff]  ;;  %v586_v18 = vld [vmem:[%s1986_s4 + $0x318] sm:$0xff]  ;;  %v1640_v21 = vpack.c.bf16 %v581_v15, %v577_v14 }
  0x3b   : > { %v1568_v60 = vpack.c.bf16 %v563_v53, %v559_v52  ;;  %v588_v17 = vld [vmem:[%s1986_s4 + $0x328] sm:$0xff]  ;;  %v590_v19 = vld [vmem:[%s1986_s4 + $0x338] sm:$0xff]  ;;  %v359_v2 = vld [vmem:[%s2044_s17] sm:$0xff] }
  0x3c   : > { %v1578_v22 = vpack.c.bf16 %v588_v17, %v584_v16  ;;  %v1642_v23 = vpack.c.bf16 %v590_v19, %v586_v18  ;;  %v592_v28 = vld [vmem:[%s1986_s4 + $0x348] sm:$0xff]  ;;  %v594_v30 = vld [vmem:[%s1986_s4 + $0x358] sm:$0xff]  ;;  %v361_v3 = vld [vmem:[%s2044_s17 + $0x10] sm:$0xff] }
  0x3d   : > { %v596_v29 = vld [vmem:[%s1986_s4 + $0x368] sm:$0xff]  ;;  %v598_v31 = vld [vmem:[%s1986_s4 + $0x378] sm:$0xff]  ;;  %v371_v14 = vld [vmem:[%s2044_s17 + $0x60] sm:$0xff] }
  0x3e   : > { %v1582_v34 = vpack.c.bf16 %v596_v29, %v592_v28  ;;  %v1646_v35 = vpack.c.bf16 %v598_v31, %v594_v30  ;;  %v600_v40 = vld [vmem:[%s1986_s4 + $0x388] sm:$0xff]  ;;  %v602_v42 = vld [vmem:[%s1986_s4 + $0x398] sm:$0xff]  ;;  %v373_v15 = vld [vmem:[%s2044_s17 + $0x70] sm:$0xff] }
  0x3f   : > { %v604_v41 = vld [vmem:[%s1986_s4 + $0x3a8] sm:$0xff]  ;;  %v606_v43 = vld [vmem:[%s1986_s4 + $0x3b8] sm:$0xff]  ;;  %v375_v18 = vld [vmem:[%s2044_s17 + $0x80] sm:$0xff] }
  0x40   : > { %1549 = vmatpush1.bf16.xpose.msra.mxu1 %v1548_v62  ;;  %v1570_v62 = vpack.c.bf16 %v572_v57, %v568_v56  ;;  %v1586_v46 = vpack.c.bf16 %v604_v41, %v600_v40  ;;  %v1650_v47 = vpack.c.bf16 %v606_v43, %v602_v42  ;;  %v608_v52 = vld [vmem:[%s1986_s4 + $0x3c8] sm:$0xff]  ;;  %v610_v54 = vld [vmem:[%s1986_s4 + $0x3d8] sm:$0xff]  ;;  %v377_v19 = vld [vmem:[%s2044_s17 + $0x90] sm:$0xff] }
  0x41   : > { %1613 = vmatpush1.bf16.xpose.msra.mxu0 %v1612_v63  ;;  %1551 = vmatprep.subr.bf16.mxu1 %v1550_v0  ;;  %v1634_v63 = vpack.c.bf16 %v574_v59, %v570_v58  ;;  %v567_v0 = vld [vmem:[%s1986_s4 + $0x280] sm:$0xff]  ;;  %v612_v53 = vld [vmem:[%s1986_s4 + $0x3e8] sm:$0xff]  ;;  %v614_v55 = vld [vmem:[%s1986_s4 + $0x3f8] sm:$0xff] }
  0x42   : > { %1615 = vmatprep.subr.bf16.mxu0 %v1614_v1  ;;  %v571_v1 = vld [vmem:[%s1986_s4 + $0x2a0] sm:$0xff]  ;;  %v1590_v58 = vpack.c.bf16 %v612_v53, %v608_v52  ;;  %v1654_v59 = vpack.c.bf16 %v614_v55, %v610_v54  ;;  %v376_v16 = vld [vmem:[%s2044_s17 + $0x88] sm:$0xff]  ;;  %v378_v17 = vld [vmem:[%s2044_s17 + $0x98] sm:$0xff] }
  0x43   : > { %v1572_v8 = vpack.c.bf16 %v571_v1, %v567_v0  ;;  %v388_v28 = vld [vmem:[%s2044_s17 + $0xe8] sm:$0xff]  ;;  %v390_v29 = vld [vmem:[%s2044_s17 + $0xf8] sm:$0xff]  ;;  %v387_v30 = vld [vmem:[%s2044_s17 + $0xe0] sm:$0xff] }
  0x44   : > { %v389_v31 = vld [vmem:[%s2044_s17 + $0xf0] sm:$0xff]  ;;  %v400_v40 = vld [vmem:[%s2044_s17 + $0x148] sm:$0xff]  ;;  %v402_v41 = vld [vmem:[%s2044_s17 + $0x158] sm:$0xff] }
  0x45   : > { %v399_v42 = vld [vmem:[%s2044_s17 + $0x140] sm:$0xff]  ;;  %v401_v43 = vld [vmem:[%s2044_s17 + $0x150] sm:$0xff]  ;;  %v412_v52 = vld [vmem:[%s2044_s17 + $0x1a8] sm:$0xff] }
  0x46   : > { %v414_v53 = vld [vmem:[%s2044_s17 + $0x1b8] sm:$0xff]  ;;  %v411_v54 = vld [vmem:[%s2044_s17 + $0x1a0] sm:$0xff]  ;;  %v413_v55 = vld [vmem:[%s2044_s17 + $0x1b0] sm:$0xff] }
  0x48   : > { %1553 = vmatpush1.bf16.xpose.msra.mxu1 %v1552_v10  ;;  %v1574_v10 = vpack.c.bf16 %v580_v5, %v576_v4  ;;  %v364_v4 = vld [vmem:[%s2044_s17 + $0x28] sm:$0xff]  ;;  %v366_v5 = vld [vmem:[%s2044_s17 + $0x38] sm:$0xff] }
  0x49   : > { %1617 = vmatpush1.bf16.xpose.msra.mxu0 %v1616_v11  ;;  %1555 = vmatprep.subr.bf16.mxu1 %v1554_v12  ;;  %v1638_v11 = vpack.c.bf16 %v582_v7, %v578_v6  ;;  %v575_v12 = vld [vmem:[%s1986_s4 + $0x2c0] sm:$0xff]  ;;  %v365_v7 = vld [vmem:[%s2044_s17 + $0x30] sm:$0xff] }
  0x4a   : > { %1619 = vmatprep.subr.bf16.mxu0 %v1618_v13  ;;  %v579_v13 = vld [vmem:[%s1986_s4 + $0x2e0] sm:$0xff] }
  0x4b   : > { %v1576_v20 = vpack.c.bf16 %v579_v13, %v575_v12  ;;  %v363_v6 = vld [vmem:[%s2044_s17 + $0x20] sm:$0xff]  ;;  %v372_v12 = vld [vmem:[%s2044_s17 + $0x68] sm:$0xff]  ;;  %v374_v13 = vld [vmem:[%s2044_s17 + $0x78] sm:$0xff] }
  0x50   : > { %1557 = vmatpush1.bf16.xpose.msra.mxu1 %v1556_v24  ;;  %v583_v24 = vld [vmem:[%s1986_s4 + $0x300] sm:$0xff] }
  0x51   : > { %1621 = vmatpush1.bf16.xpose.msra.mxu0 %v1620_v25  ;;  %1559 = vmatprep.subr.bf16.mxu1 %v1558_v26  ;;  %v587_v25 = vld [vmem:[%s1986_s4 + $0x320] sm:$0xff]  ;;  %v585_v26 = vld [vmem:[%s1986_s4 + $0x310] sm:$0xff] }
  0x52   : > { %1623 = vmatprep.subr.bf16.mxu0 %v1622_v27  ;;  %v589_v27 = vld [vmem:[%s1986_s4 + $0x330] sm:$0xff]  ;;  %v1580_v32 = vpack.c.bf16 %v587_v25, %v583_v24  ;;  %v384_v24 = vld [vmem:[%s2044_s17 + $0xc8] sm:$0xff]  ;;  %v386_v25 = vld [vmem:[%s2044_s17 + $0xd8] sm:$0xff] }
  0x53   : > { %v1644_v33 = vpack.c.bf16 %v589_v27, %v585_v26  ;;  %v383_v26 = vld [vmem:[%s2044_s17 + $0xc0] sm:$0xff]  ;;  %v385_v27 = vld [vmem:[%s2044_s17 + $0xd0] sm:$0xff] }
  0x58   : > { %1561 = vmatpush1.bf16.xpose.msra.mxu1 %v1560_v36  ;;  %v591_v36 = vld [vmem:[%s1986_s4 + $0x340] sm:$0xff] }
  0x59   : > { %1625 = vmatpush1.bf16.xpose.msra.mxu0 %v1624_v37  ;;  %1563 = vmatprep.subr.bf16.mxu1 %v1562_v38  ;;  %v595_v37 = vld [vmem:[%s1986_s4 + $0x360] sm:$0xff]  ;;  %v593_v38 = vld [vmem:[%s1986_s4 + $0x350] sm:$0xff] }
  0x5a   : > { %1627 = vmatprep.subr.bf16.mxu0 %v1626_v39  ;;  %v597_v39 = vld [vmem:[%s1986_s4 + $0x370] sm:$0xff]  ;;  %v1584_v44 = vpack.c.bf16 %v595_v37, %v591_v36  ;;  %v396_v36 = vld [vmem:[%s2044_s17 + $0x128] sm:$0xff]  ;;  %v398_v37 = vld [vmem:[%s2044_s17 + $0x138] sm:$0xff] }
  0x5b   : > { %v1648_v45 = vpack.c.bf16 %v597_v39, %v593_v38  ;;  %v395_v38 = vld [vmem:[%s2044_s17 + $0x120] sm:$0xff]  ;;  %v397_v39 = vld [vmem:[%s2044_s17 + $0x130] sm:$0xff] }
  0x60   : > { %1565 = vmatpush1.bf16.xpose.msra.mxu1 %v1564_v48  ;;  %v599_v48 = vld [vmem:[%s1986_s4 + $0x380] sm:$0xff] }
  0x61   : > { %1629 = vmatpush1.bf16.xpose.msra.mxu0 %v1628_v49  ;;  %1567 = vmatprep.subr.bf16.mxu1 %v1566_v50  ;;  %v603_v49 = vld [vmem:[%s1986_s4 + $0x3a0] sm:$0xff]  ;;  %v601_v50 = vld [vmem:[%s1986_s4 + $0x390] sm:$0xff] }
  0x62   : > { %1631 = vmatprep.subr.bf16.mxu0 %v1630_v51  ;;  %v605_v51 = vld [vmem:[%s1986_s4 + $0x3b0] sm:$0xff]  ;;  %v1588_v56 = vpack.c.bf16 %v603_v49, %v599_v48  ;;  %v408_v48 = vld [vmem:[%s2044_s17 + $0x188] sm:$0xff]  ;;  %v410_v49 = vld [vmem:[%s2044_s17 + $0x198] sm:$0xff] }
  0x63   : > { %v1652_v57 = vpack.c.bf16 %v605_v51, %v601_v50  ;;  %v407_v50 = vld [vmem:[%s2044_s17 + $0x180] sm:$0xff]  ;;  %v409_v51 = vld [vmem:[%s2044_s17 + $0x190] sm:$0xff] }
  0x68   : > { %1569 = vmatpush1.bf16.xpose.msra.mxu1 %v1568_v60  ;;  %v607_v60 = vld [vmem:[%s1986_s4 + $0x3c0] sm:$0xff] }
  0x69   : > { %1633 = vmatpush1.bf16.xpose.msra.mxu0 %v1632_v61  ;;  %1571 = vmatprep.subr.bf16.mxu1 %v1570_v62  ;;  %v611_v61 = vld [vmem:[%s1986_s4 + $0x3e0] sm:$0xff]  ;;  %v609_v62 = vld [vmem:[%s1986_s4 + $0x3d0] sm:$0xff] }
  0x6a   : > { %1635 = vmatprep.subr.bf16.mxu0 %v1634_v63  ;;  %v613_v63 = vld [vmem:[%s1986_s4 + $0x3f0] sm:$0xff]  ;;  %v1592_v0 = vpack.c.bf16 %v611_v61, %v607_v60  ;;  %v420_v60 = vld [vmem:[%s2044_s17 + $0x1e8] sm:$0xff]  ;;  %v422_v61 = vld [vmem:[%s2044_s17 + $0x1f8] sm:$0xff]  ;;  %s2331_s4 = scalar_lea.sflag [#allocation4], %s198_s18 }
  0x6b   : > { %v1656_v1 = vpack.c.bf16 %v613_v63, %v609_v62  ;;  %v419_v62 = vld [vmem:[%s2044_s17 + $0x1e0] sm:$0xff]  ;;  %v421_v63 = vld [vmem:[%s2044_s17 + $0x1f0] sm:$0xff] }
  0x70   : > { %1573 = vmatpush1.bf16.xpose.msra.mxu1 %v1572_v8  ;;  %v368_v8 = vld [vmem:[%s2044_s17 + $0x48] sm:$0xff] }
  0x71   : > { %1637 = vmatpush1.bf16.xpose.msra.mxu0 %v1636_v9  ;;  %1575 = vmatprep.subr.bf16.mxu1 %v1574_v10  ;;  %v370_v9 = vld [vmem:[%s2044_s17 + $0x58] sm:$0xff]  ;;  %v367_v10 = vld [vmem:[%s2044_s17 + $0x40] sm:$0xff] }
  0x72   : > { %1639 = vmatprep.subr.bf16.mxu0 %v1638_v11  ;;  %v369_v11 = vld [vmem:[%s2044_s17 + $0x50] sm:$0xff] }
  0x78   : > { %1577 = vmatpush1.bf16.xpose.msra.mxu1 %v1576_v20  ;;  %v380_v20 = vld [vmem:[%s2044_s17 + $0xa8] sm:$0xff] }
  0x79   : > { %1641 = vmatpush1.bf16.xpose.msra.mxu0 %v1640_v21  ;;  %1579 = vmatprep.subr.bf16.mxu1 %v1578_v22  ;;  %v382_v21 = vld [vmem:[%s2044_s17 + $0xb8] sm:$0xff]  ;;  %v379_v22 = vld [vmem:[%s2044_s17 + $0xa0] sm:$0xff] }
  0x7a   : > { %1643 = vmatprep.subr.bf16.mxu0 %v1642_v23  ;;  %v381_v23 = vld [vmem:[%s2044_s17 + $0xb0] sm:$0xff] }
  0x80   : > { %1581 = vmatpush1.bf16.xpose.msra.mxu1 %v1580_v32  ;;  %v392_v32 = vld [vmem:[%s2044_s17 + $0x108] sm:$0xff] }
  0x81   : > { %1645 = vmatpush1.bf16.xpose.msra.mxu0 %v1644_v33  ;;  %1583 = vmatprep.subr.bf16.mxu1 %v1582_v34  ;;  %v394_v33 = vld [vmem:[%s2044_s17 + $0x118] sm:$0xff]  ;;  %v391_v34 = vld [vmem:[%s2044_s17 + $0x100] sm:$0xff] }
  0x82   : > { %1647 = vmatprep.subr.bf16.mxu0 %v1646_v35  ;;  %v393_v35 = vld [vmem:[%s2044_s17 + $0x110] sm:$0xff] }
  0x88   : > { %1585 = vmatpush1.bf16.xpose.msra.mxu1 %v1584_v44  ;;  %v404_v44 = vld [vmem:[%s2044_s17 + $0x168] sm:$0xff] }
  0x89   : > { %1649 = vmatpush1.bf16.xpose.msra.mxu0 %v1648_v45  ;;  %1587 = vmatprep.subr.bf16.mxu1 %v1586_v46  ;;  %v406_v45 = vld [vmem:[%s2044_s17 + $0x178] sm:$0xff]  ;;  %v403_v46 = vld [vmem:[%s2044_s17 + $0x160] sm:$0xff] }
  0x8a   : > { %1651 = vmatprep.subr.bf16.mxu0 %v1650_v47  ;;  %v405_v47 = vld [vmem:[%s2044_s17 + $0x170] sm:$0xff] }
  0x90   : > { %1589 = vmatpush1.bf16.xpose.msra.mxu1 %v1588_v56  ;;  %v416_v56 = vld [vmem:[%s2044_s17 + $0x1c8] sm:$0xff] }
  0x91   : > { %1653 = vmatpush1.bf16.xpose.msra.mxu0 %v1652_v57  ;;  %1591 = vmatprep.subr.bf16.mxu1 %v1590_v58  ;;  %v418_v57 = vld [vmem:[%s2044_s17 + $0x1d8] sm:$0xff]  ;;  %v415_v58 = vld [vmem:[%s2044_s17 + $0x1c0] sm:$0xff] }
  0x92   : > { %1655 = vmatprep.subr.bf16.mxu0 %v1654_v59  ;;  %v417_v59 = vld [vmem:[%s2044_s17 + $0x1d0] sm:$0xff] }
  0x98   : > { %1593 = vmatpush1.bf16.xpose.msra.mxu1 %v1592_v0  ;;  %v424_v0 = vld [vmem:[%s2044_s17 + $0x208] sm:$0xff] }
  0x99   : > { %1657 = vmatpush1.bf16.xpose.msra.mxu0 %v1656_v1  ;;  %v426_v1 = vld [vmem:[%s2044_s17 + $0x218] sm:$0xff] }
  0x9f   : > { %680 = vmatmul.mubr.f32.vlgmr.msra.gmra.mrb[0].mxu1 %v359_v2  ;;  %v423_v2 = vld [vmem:[%s2044_s17 + $0x200] sm:$0xff] }
  0xa0   : > { %937 = vmatmul.mubr.f32.vlgmr.msra.gmra.mrb[0].mxu0 %v361_v3  ;;  %685 = vmatprep.mubr.f32.mxu1 %v364_v4  ;;  %v425_v3 = vld [vmem:[%s2044_s17 + $0x210] sm:$0xff]  ;;  %v428_v4 = vld [vmem:[%s2044_s17 + $0x228] sm:$0xff] }
  0xa1   : > { %942 = vmatprep.mubr.f32.mxu0 %v366_v5  ;;  %v430_v5 = vld [vmem:[%s2044_s17 + $0x238] sm:$0xff] }
  0xa3   : > { %686 = vmatmul.mubr.f32.gmra.mrb[2].mxu1 %v363_v6  ;;  %v427_v6 = vld [vmem:[%s2044_s17 + $0x220] sm:$0xff] }
  0xa4   : > { %943 = vmatmul.mubr.f32.gmra.mrb[2].mxu0 %v365_v7  ;;  %691 = vmatprep.mubr.f32.mxu1 %v368_v8  ;;  %v429_v7 = vld [vmem:[%s2044_s17 + $0x230] sm:$0xff]  ;;  %v432_v8 = vld [vmem:[%s2044_s17 + $0x248] sm:$0xff] }
  0xa5   : > { %948 = vmatprep.mubr.f32.mxu0 %v370_v9  ;;  %v434_v9 = vld [vmem:[%s2044_s17 + $0x258] sm:$0xff] }
  0xa7   : > { %692 = vmatmul.mubr.f32.gmra.mrb[4].mxu1 %v367_v10  ;;  %v431_v10 = vld [vmem:[%s2044_s17 + $0x240] sm:$0xff] }
  0xa8   : > { %949 = vmatmul.mubr.f32.gmra.mrb[4].mxu0 %v369_v11  ;;  %697 = vmatprep.mubr.f32.mxu1 %v372_v12  ;;  %v433_v11 = vld [vmem:[%s2044_s17 + $0x250] sm:$0xff]  ;;  %v436_v12 = vld [vmem:[%s2044_s17 + $0x268] sm:$0xff] }
  0xa9   : > { %954 = vmatprep.mubr.f32.mxu0 %v374_v13  ;;  %v438_v13 = vld [vmem:[%s2044_s17 + $0x278] sm:$0xff] }
  0xab   : > { %698 = vmatmul.mubr.f32.gmra.mrb[6].mxu1 %v371_v14  ;;  %v435_v14 = vld [vmem:[%s2044_s17 + $0x260] sm:$0xff] }
  0xac   : > { %955 = vmatmul.mubr.f32.gmra.mrb[6].mxu0 %v373_v15  ;;  %703 = vmatprep.mubr.f32.mxu1 %v376_v16  ;;  %v437_v15 = vld [vmem:[%s2044_s17 + $0x270] sm:$0xff]  ;;  %v440_v16 = vld [vmem:[%s2044_s17 + $0x288] sm:$0xff] }
  0xad   : > { %960 = vmatprep.mubr.f32.mxu0 %v378_v17  ;;  %v442_v17 = vld [vmem:[%s2044_s17 + $0x298] sm:$0xff] }
  0xaf   : > { %704 = vmatmul.mubr.f32.gmra.mrb[8].mxu1 %v375_v18  ;;  %v439_v18 = vld [vmem:[%s2044_s17 + $0x280] sm:$0xff] }
  0xb0   : > { %961 = vmatmul.mubr.f32.gmra.mrb[8].mxu0 %v377_v19  ;;  %709 = vmatprep.mubr.f32.mxu1 %v380_v20  ;;  %v441_v19 = vld [vmem:[%s2044_s17 + $0x290] sm:$0xff]  ;;  %v444_v20 = vld [vmem:[%s2044_s17 + $0x2a8] sm:$0xff] }
  0xb1   : > { %966 = vmatprep.mubr.f32.mxu0 %v382_v21  ;;  %v446_v21 = vld [vmem:[%s2044_s17 + $0x2b8] sm:$0xff] }
  0xb3   : > { %710 = vmatmul.mubr.f32.gmra.mrb[10].mxu1 %v379_v22  ;;  %v443_v22 = vld [vmem:[%s2044_s17 + $0x2a0] sm:$0xff] }
  0xb4   : > { %967 = vmatmul.mubr.f32.gmra.mrb[10].mxu0 %v381_v23  ;;  %715 = vmatprep.mubr.f32.mxu1 %v384_v24  ;;  %v445_v23 = vld [vmem:[%s2044_s17 + $0x2b0] sm:$0xff]  ;;  %v448_v24 = vld [vmem:[%s2044_s17 + $0x2c8] sm:$0xff] }
  0xb5   : > { %972 = vmatprep.mubr.f32.mxu0 %v386_v25  ;;  %v450_v25 = vld [vmem:[%s2044_s17 + $0x2d8] sm:$0xff] }
  0xb7   : > { %716 = vmatmul.mubr.f32.gmra.mrb[12].mxu1 %v383_v26  ;;  %v447_v26 = vld [vmem:[%s2044_s17 + $0x2c0] sm:$0xff] }
  0xb8   : > { %973 = vmatmul.mubr.f32.gmra.mrb[12].mxu0 %v385_v27  ;;  %721 = vmatprep.mubr.f32.mxu1 %v388_v28  ;;  %v449_v27 = vld [vmem:[%s2044_s17 + $0x2d0] sm:$0xff]  ;;  %v452_v28 = vld [vmem:[%s2044_s17 + $0x2e8] sm:$0xff] }
  0xb9   : > { %978 = vmatprep.mubr.f32.mxu0 %v390_v29  ;;  %v454_v29 = vld [vmem:[%s2044_s17 + $0x2f8] sm:$0xff] }
  0xbb   : > { %722 = vmatmul.mubr.f32.gmra.mrb[14].mxu1 %v387_v30  ;;  %v451_v30 = vld [vmem:[%s2044_s17 + $0x2e0] sm:$0xff] }
  0xbc   : > { %979 = vmatmul.mubr.f32.gmra.mrb[14].mxu0 %v389_v31  ;;  %727 = vmatprep.mubr.f32.mxu1 %v392_v32  ;;  %v453_v31 = vld [vmem:[%s2044_s17 + $0x2f0] sm:$0xff]  ;;  %v456_v32 = vld [vmem:[%s2044_s17 + $0x308] sm:$0xff] }
  0xbd   : > { %984 = vmatprep.mubr.f32.mxu0 %v394_v33  ;;  %v458_v33 = vld [vmem:[%s2044_s17 + $0x318] sm:$0xff] }
  0xbf   : > { %728 = vmatmul.mubr.f32.gmra.mrb[16].mxu1 %v391_v34  ;;  %v455_v34 = vld [vmem:[%s2044_s17 + $0x300] sm:$0xff] }
  0xc0   : > { %985 = vmatmul.mubr.f32.gmra.mrb[16].mxu0 %v393_v35  ;;  %733 = vmatprep.mubr.f32.mxu1 %v396_v36  ;;  %v457_v35 = vld [vmem:[%s2044_s17 + $0x310] sm:$0xff]  ;;  %v460_v36 = vld [vmem:[%s2044_s17 + $0x328] sm:$0xff] }
  0xc1   : > { %990 = vmatprep.mubr.f32.mxu0 %v398_v37  ;;  %v462_v37 = vld [vmem:[%s2044_s17 + $0x338] sm:$0xff] }
  0xc3   : > { %734 = vmatmul.mubr.f32.gmra.mrb[18].mxu1 %v395_v38  ;;  %v459_v38 = vld [vmem:[%s2044_s17 + $0x320] sm:$0xff] }
  0xc4   : > { %991 = vmatmul.mubr.f32.gmra.mrb[18].mxu0 %v397_v39  ;;  %739 = vmatprep.mubr.f32.mxu1 %v400_v40  ;;  %v461_v39 = vld [vmem:[%s2044_s17 + $0x330] sm:$0xff]  ;;  %v464_v40 = vld [vmem:[%s2044_s17 + $0x348] sm:$0xff] }
  0xc5   : > { %996 = vmatprep.mubr.f32.mxu0 %v402_v41  ;;  %v466_v41 = vld [vmem:[%s2044_s17 + $0x358] sm:$0xff] }
  0xc7   : > { %740 = vmatmul.mubr.f32.gmra.mrb[20].mxu1 %v399_v42  ;;  %v463_v42 = vld [vmem:[%s2044_s17 + $0x340] sm:$0xff] }
  0xc8   : > { %997 = vmatmul.mubr.f32.gmra.mrb[20].mxu0 %v401_v43  ;;  %745 = vmatprep.mubr.f32.mxu1 %v404_v44  ;;  %v465_v43 = vld [vmem:[%s2044_s17 + $0x350] sm:$0xff]  ;;  %v468_v44 = vld [vmem:[%s2044_s17 + $0x368] sm:$0xff] }
  0xc9   : > { %1002 = vmatprep.mubr.f32.mxu0 %v406_v45  ;;  %v470_v45 = vld [vmem:[%s2044_s17 + $0x378] sm:$0xff] }
  0xcb   : > { %746 = vmatmul.mubr.f32.gmra.mrb[22].mxu1 %v403_v46  ;;  %v467_v46 = vld [vmem:[%s2044_s17 + $0x360] sm:$0xff] }
  0xcc   : > { %1003 = vmatmul.mubr.f32.gmra.mrb[22].mxu0 %v405_v47  ;;  %751 = vmatprep.mubr.f32.mxu1 %v408_v48  ;;  %v469_v47 = vld [vmem:[%s2044_s17 + $0x370] sm:$0xff]  ;;  %v472_v48 = vld [vmem:[%s2044_s17 + $0x388] sm:$0xff] }
  0xcd   : > { %1008 = vmatprep.mubr.f32.mxu0 %v410_v49  ;;  %v474_v49 = vld [vmem:[%s2044_s17 + $0x398] sm:$0xff] }
  0xcf   : > { %752 = vmatmul.mubr.f32.gmra.mrb[24].mxu1 %v407_v50  ;;  %v471_v50 = vld [vmem:[%s2044_s17 + $0x380] sm:$0xff] }
  0xd0   : > { %1009 = vmatmul.mubr.f32.gmra.mrb[24].mxu0 %v409_v51  ;;  %757 = vmatprep.mubr.f32.mxu1 %v412_v52  ;;  %v473_v51 = vld [vmem:[%s2044_s17 + $0x390] sm:$0xff]  ;;  %v476_v52 = vld [vmem:[%s2044_s17 + $0x3a8] sm:$0xff] }
  0xd1   : > { %1014 = vmatprep.mubr.f32.mxu0 %v414_v53  ;;  %v478_v53 = vld [vmem:[%s2044_s17 + $0x3b8] sm:$0xff] }
  0xd3   : > { %758 = vmatmul.mubr.f32.gmra.mrb[26].mxu1 %v411_v54  ;;  %v475_v54 = vld [vmem:[%s2044_s17 + $0x3a0] sm:$0xff] }
  0xd4   : > { %1015 = vmatmul.mubr.f32.gmra.mrb[26].mxu0 %v413_v55  ;;  %763 = vmatprep.mubr.f32.mxu1 %v416_v56  ;;  %v477_v55 = vld [vmem:[%s2044_s17 + $0x3b0] sm:$0xff]  ;;  %v480_v56 = vld [vmem:[%s2044_s17 + $0x3c8] sm:$0xff] }
  0xd5   : > { %1020 = vmatprep.mubr.f32.mxu0 %v418_v57  ;;  %v482_v57 = vld [vmem:[%s2044_s17 + $0x3d8] sm:$0xff] }
  0xd7   : > { %764 = vmatmul.mubr.f32.gmra.mrb[28].mxu1 %v415_v58  ;;  %v479_v58 = vld [vmem:[%s2044_s17 + $0x3c0] sm:$0xff] }
  0xd8   : > { %1021 = vmatmul.mubr.f32.gmra.mrb[28].mxu0 %v417_v59  ;;  %769 = vmatprep.mubr.f32.mxu1 %v420_v60  ;;  %v481_v59 = vld [vmem:[%s2044_s17 + $0x3d0] sm:$0xff]  ;;  %v484_v60 = vld [vmem:[%s2044_s17 + $0x3e8] sm:$0xff] }
  0xd9   : > { %1026 = vmatprep.mubr.f32.mxu0 %v422_v61  ;;  %v486_v61 = vld [vmem:[%s2044_s17 + $0x3f8] sm:$0xff] }
  0xdb   : > { %770 = vmatmul.mubr.f32.gmra.mrb[30].mxu1 %v419_v62  ;;  %v483_v62 = vld [vmem:[%s2044_s17 + $0x3e0] sm:$0xff] }
  0xdc   : > { %1027 = vmatmul.mubr.f32.gmra.mrb[30].mxu0 %v421_v63  ;;  %775 = vmatprep.mubr.f32.mxu1 %v424_v0  ;;  %v485_v63 = vld [vmem:[%s2044_s17 + $0x3f0] sm:$0xff] }
  0xdd   : > { %1032 = vmatprep.mubr.f32.mxu0 %v426_v1 }
  0xdf   : > { %776 = vmatmul.mubr.f32.gmra.mrb[32].mxu1 %v423_v2 }
  0xe0   : > { %1033 = vmatmul.mubr.f32.gmra.mrb[32].mxu0 %v425_v3  ;;  %781 = vmatprep.mubr.f32.mxu1 %v428_v4 }
  0xe1   : > { %1038 = vmatprep.mubr.f32.mxu0 %v430_v5 }
  0xe3   : > { %782 = vmatmul.mubr.f32.gmra.mrb[34].mxu1 %v427_v6 }
  0xe4   : > { %1039 = vmatmul.mubr.f32.gmra.mrb[34].mxu0 %v429_v7  ;;  %787 = vmatprep.mubr.f32.mxu1 %v432_v8 }
  0xe5   : > { %1044 = vmatprep.mubr.f32.mxu0 %v434_v9 }
  0xe7   : > { %788 = vmatmul.mubr.f32.gmra.mrb[36].mxu1 %v431_v10 }
  0xe8   : > { %1045 = vmatmul.mubr.f32.gmra.mrb[36].mxu0 %v433_v11  ;;  %793 = vmatprep.mubr.f32.mxu1 %v436_v12 }
  0xe9   : > { %1050 = vmatprep.mubr.f32.mxu0 %v438_v13 }
  0xeb   : > { %794 = vmatmul.mubr.f32.gmra.mrb[38].mxu1 %v435_v14 }
  0xec   : > { %1051 = vmatmul.mubr.f32.gmra.mrb[38].mxu0 %v437_v15  ;;  %799 = vmatprep.mubr.f32.mxu1 %v440_v16 }
  0xed   : > { %1056 = vmatprep.mubr.f32.mxu0 %v442_v17 }
  0xef   : > { %800 = vmatmul.mubr.f32.gmra.mrb[40].mxu1 %v439_v18 }
  0xf0   : > { %1057 = vmatmul.mubr.f32.gmra.mrb[40].mxu0 %v441_v19  ;;  %805 = vmatprep.mubr.f32.mxu1 %v444_v20 }
  0xf1   : > { %1062 = vmatprep.mubr.f32.mxu0 %v446_v21 }
  0xf3   : > { %806 = vmatmul.mubr.f32.gmra.mrb[42].mxu1 %v443_v22 }
  0xf4   : > { %1063 = vmatmul.mubr.f32.gmra.mrb[42].mxu0 %v445_v23  ;;  %811 = vmatprep.mubr.f32.mxu1 %v448_v24 }
  0xf5   : > { %1068 = vmatprep.mubr.f32.mxu0 %v450_v25 }
  0xf7   : > { %812 = vmatmul.mubr.f32.gmra.mrb[44].mxu1 %v447_v26 }
  0xf8   : > { %1069 = vmatmul.mubr.f32.gmra.mrb[44].mxu0 %v449_v27  ;;  %817 = vmatprep.mubr.f32.mxu1 %v452_v28 }
  0xf9   : > { %1074 = vmatprep.mubr.f32.mxu0 %v454_v29 }
  0xfb   : > { %818 = vmatmul.mubr.f32.gmra.mrb[46].mxu1 %v451_v30 }
  0xfc   : > { %1075 = vmatmul.mubr.f32.gmra.mrb[46].mxu0 %v453_v31  ;;  %823 = vmatprep.mubr.f32.mxu1 %v456_v32 }
  0xfd   : > { %1080 = vmatprep.mubr.f32.mxu0 %v458_v33 }
  0xff   : > { %824 = vmatmul.mubr.f32.gmra.mrb[48].mxu1 %v455_v34 }
 0x100   : > { %1081 = vmatmul.mubr.f32.gmra.mrb[48].mxu0 %v457_v35  ;;  %829 = vmatprep.mubr.f32.mxu1 %v460_v36 }
 0x101   : > { %1086 = vmatprep.mubr.f32.mxu0 %v462_v37 }
 0x103   : > { %830 = vmatmul.mubr.f32.gmra.mrb[50].mxu1 %v459_v38 }
 0x104   : > { %1087 = vmatmul.mubr.f32.gmra.mrb[50].mxu0 %v461_v39  ;;  %835 = vmatprep.mubr.f32.mxu1 %v464_v40 }
 0x105   : > { %1092 = vmatprep.mubr.f32.mxu0 %v466_v41 }
 0x107   : > { %836 = vmatmul.mubr.f32.gmra.mrb[52].mxu1 %v463_v42 }
 0x108   : > { %1093 = vmatmul.mubr.f32.gmra.mrb[52].mxu0 %v465_v43  ;;  %841 = vmatprep.mubr.f32.mxu1 %v468_v44 }
 0x109   : > { %1098 = vmatprep.mubr.f32.mxu0 %v470_v45 }
 0x10b   : > { %842 = vmatmul.mubr.f32.gmra.mrb[54].mxu1 %v467_v46 }
 0x10c   : > { %1099 = vmatmul.mubr.f32.gmra.mrb[54].mxu0 %v469_v47  ;;  %847 = vmatprep.mubr.f32.mxu1 %v472_v48 }
 0x10d   : > { %1104 = vmatprep.mubr.f32.mxu0 %v474_v49 }
 0x10f   : > { %848 = vmatmul.mubr.f32.gmra.mrb[56].mxu1 %v471_v50 }
 0x110   : > { %1105 = vmatmul.mubr.f32.gmra.mrb[56].mxu0 %v473_v51  ;;  %853 = vmatprep.mubr.f32.mxu1 %v476_v52 }
 0x111   : > { %1110 = vmatprep.mubr.f32.mxu0 %v478_v53 }
 0x113   : > { %854 = vmatmul.mubr.f32.gmra.mrb[58].mxu1 %v475_v54 }
 0x114   : > { %1111 = vmatmul.mubr.f32.gmra.mrb[58].mxu0 %v477_v55  ;;  %859 = vmatprep.mubr.f32.mxu1 %v480_v56 }
 0x115   : > { %1116 = vmatprep.mubr.f32.mxu0 %v482_v57 }
 0x117   : > { %860 = vmatmul.mubr.f32.gmra.mrb[60].mxu1 %v479_v58 }
 0x118   : > { %1117 = vmatmul.mubr.f32.gmra.mrb[60].mxu0 %v481_v59  ;;  %865 = vmatprep.mubr.f32.mxu1 %v484_v60 }
 0x119   : > { %1122 = vmatprep.mubr.f32.mxu0 %v486_v61 }
 0x11b   : > { %866 = vmatmul.mubr.f32.gmra.mrb[62].mxu1 %v483_v62 }
 0x11c   : > { %1123 = vmatmul.mubr.f32.gmra.mrb[62].mxu0 %v485_v63 }
 0x172   : > { %v681_v0 = vpop.f32.mrb[0].mxu1 }
 0x173   : > { %v938_v1 = vpop.f32.mrb[0].mxu0  ;;  %v683_v2 = vpop.f32.mrb[1].mxu1 }
 0x174   : > { %v939_v3 = vadd.f32 %v938_v1, %v681_v0  ;;  %v940_v4 = vpop.f32.mrb[1].mxu0 }
 0x175   : > { %v941_v5 = vadd.f32 %v940_v4, %v683_v2 }
 0x176   : > { %1324 = vst [vmem:[%s2253_s24] sm:$0xff] %v939_v3  ;;  %v687_v6 = vpop.f32.mrb[2].mxu1 }
 0x177   : > { %1325 = vst [vmem:[%s2253_s24 + $0x8] sm:$0xff] %v941_v5  ;;  %v944_v7 = vpop.f32.mrb[2].mxu0  ;;  %v689_v8 = vpop.f32.mrb[3].mxu1 }
 0x178   : > { %v945_v9 = vadd.f32 %v944_v7, %v687_v6  ;;  %v946_v10 = vpop.f32.mrb[3].mxu0 }
 0x179   : > { %v947_v11 = vadd.f32 %v946_v10, %v689_v8 }
 0x17a   : > { %1326 = vst [vmem:[%s2253_s24 + $0x10] sm:$0xff] %v945_v9  ;;  %v693_v12 = vpop.f32.mrb[4].mxu1 }
 0x17b   : > { %1327 = vst [vmem:[%s2253_s24 + $0x18] sm:$0xff] %v947_v11  ;;  %v950_v13 = vpop.f32.mrb[4].mxu0  ;;  %v695_v14 = vpop.f32.mrb[5].mxu1 }
 0x17c   : > { %v951_v15 = vadd.f32 %v950_v13, %v693_v12  ;;  %v952_v16 = vpop.f32.mrb[5].mxu0 }
 0x17d   : > { %v953_v17 = vadd.f32 %v952_v16, %v695_v14 }
 0x17e   : > { %1328 = vst [vmem:[%s2253_s24 + $0x20] sm:$0xff] %v951_v15  ;;  %v699_v18 = vpop.f32.mrb[6].mxu1 }
 0x17f   : > { %1329 = vst [vmem:[%s2253_s24 + $0x28] sm:$0xff] %v953_v17  ;;  %v956_v19 = vpop.f32.mrb[6].mxu0  ;;  %v701_v20 = vpop.f32.mrb[7].mxu1 }
 0x180   : > { %v957_v21 = vadd.f32 %v956_v19, %v699_v18  ;;  %v958_v22 = vpop.f32.mrb[7].mxu0 }
 0x181   : > { %v959_v23 = vadd.f32 %v958_v22, %v701_v20 }
 0x182   : > { %1330 = vst [vmem:[%s2253_s24 + $0x30] sm:$0xff] %v957_v21  ;;  %v705_v24 = vpop.f32.mrb[8].mxu1 }
 0x183   : > { %1331 = vst [vmem:[%s2253_s24 + $0x38] sm:$0xff] %v959_v23  ;;  %v962_v25 = vpop.f32.mrb[8].mxu0  ;;  %v707_v26 = vpop.f32.mrb[9].mxu1 }
 0x184   : > { %v963_v27 = vadd.f32 %v962_v25, %v705_v24  ;;  %v964_v28 = vpop.f32.mrb[9].mxu0 }
 0x185   : > { %v965_v29 = vadd.f32 %v964_v28, %v707_v26 }
 0x186   : > { %1332 = vst [vmem:[%s2253_s24 + $0x40] sm:$0xff] %v963_v27  ;;  %v711_v30 = vpop.f32.mrb[10].mxu1 }
 0x187   : > { %1333 = vst [vmem:[%s2253_s24 + $0x48] sm:$0xff] %v965_v29  ;;  %v968_v31 = vpop.f32.mrb[10].mxu0  ;;  %v713_v32 = vpop.f32.mrb[11].mxu1 }
 0x188   : > { %v969_v33 = vadd.f32 %v968_v31, %v711_v30  ;;  %v970_v34 = vpop.f32.mrb[11].mxu0 }
 0x189   : > { %v971_v35 = vadd.f32 %v970_v34, %v713_v32 }
 0x18a   : > { %1334 = vst [vmem:[%s2253_s24 + $0x50] sm:$0xff] %v969_v33  ;;  %v717_v36 = vpop.f32.mrb[12].mxu1 }
 0x18b   : > { %1335 = vst [vmem:[%s2253_s24 + $0x58] sm:$0xff] %v971_v35  ;;  %v974_v37 = vpop.f32.mrb[12].mxu0  ;;  %v719_v38 = vpop.f32.mrb[13].mxu1 }
 0x18c   : > { %v975_v39 = vadd.f32 %v974_v37, %v717_v36  ;;  %v976_v40 = vpop.f32.mrb[13].mxu0 }
 0x18d   : > { %v977_v41 = vadd.f32 %v976_v40, %v719_v38 }
 0x18e   : > { %1336 = vst [vmem:[%s2253_s24 + $0x60] sm:$0xff] %v975_v39  ;;  %v723_v42 = vpop.f32.mrb[14].mxu1 }
 0x18f   : > { %1337 = vst [vmem:[%s2253_s24 + $0x68] sm:$0xff] %v977_v41  ;;  %v980_v43 = vpop.f32.mrb[14].mxu0  ;;  %v725_v44 = vpop.f32.mrb[15].mxu1 }
 0x190   : > { %v981_v45 = vadd.f32 %v980_v43, %v723_v42  ;;  %v982_v46 = vpop.f32.mrb[15].mxu0 }
 0x191   : > { %v983_v47 = vadd.f32 %v982_v46, %v725_v44 }
 0x192   : > { %1338 = vst [vmem:[%s2253_s24 + $0x70] sm:$0xff] %v981_v45  ;;  %v729_v48 = vpop.f32.mrb[16].mxu1 }
 0x193   : > { %1339 = vst [vmem:[%s2253_s24 + $0x78] sm:$0xff] %v983_v47  ;;  %v986_v49 = vpop.f32.mrb[16].mxu0  ;;  %v731_v50 = vpop.f32.mrb[17].mxu1 }
 0x194   : > { %v987_v51 = vadd.f32 %v986_v49, %v729_v48  ;;  %v988_v52 = vpop.f32.mrb[17].mxu0 }
 0x195   : > { %v989_v53 = vadd.f32 %v988_v52, %v731_v50 }
 0x196   : > { %1340 = vst [vmem:[%s2253_s24 + $0x80] sm:$0xff] %v987_v51  ;;  %v735_v54 = vpop.f32.mrb[18].mxu1 }
 0x197   : > { %1341 = vst [vmem:[%s2253_s24 + $0x88] sm:$0xff] %v989_v53  ;;  %v992_v55 = vpop.f32.mrb[18].mxu0  ;;  %v737_v56 = vpop.f32.mrb[19].mxu1 }
 0x198   : > { %v993_v57 = vadd.f32 %v992_v55, %v735_v54  ;;  %v994_v58 = vpop.f32.mrb[19].mxu0 }
 0x199   : > { %v995_v59 = vadd.f32 %v994_v58, %v737_v56 }
 0x19a   : > { %1342 = vst [vmem:[%s2253_s24 + $0x90] sm:$0xff] %v993_v57  ;;  %v741_v60 = vpop.f32.mrb[20].mxu1 }
 0x19b   : > { %1343 = vst [vmem:[%s2253_s24 + $0x98] sm:$0xff] %v995_v59  ;;  %v998_v61 = vpop.f32.mrb[20].mxu0  ;;  %v743_v62 = vpop.f32.mrb[21].mxu1 }
 0x19c   : > { %v999_v63 = vadd.f32 %v998_v61, %v741_v60  ;;  %v1000_v0 = vpop.f32.mrb[21].mxu0 }
 0x19d   : > { %v1001_v1 = vadd.f32 %v1000_v0, %v743_v62 }
 0x19e   : > { %1344 = vst [vmem:[%s2253_s24 + $0xa0] sm:$0xff] %v999_v63  ;;  %v747_v2 = vpop.f32.mrb[22].mxu1 }
 0x19f   : > { %1345 = vst [vmem:[%s2253_s24 + $0xa8] sm:$0xff] %v1001_v1  ;;  %v1004_v3 = vpop.f32.mrb[22].mxu0  ;;  %v749_v4 = vpop.f32.mrb[23].mxu1 }
 0x1a0   : > { %v1005_v5 = vadd.f32 %v1004_v3, %v747_v2  ;;  %v1006_v6 = vpop.f32.mrb[23].mxu0 }
 0x1a1   : > { %v1007_v7 = vadd.f32 %v1006_v6, %v749_v4 }
 0x1a2   : > { %1346 = vst [vmem:[%s2253_s24 + $0xb0] sm:$0xff] %v1005_v5  ;;  %v753_v8 = vpop.f32.mrb[24].mxu1 }
 0x1a3   : > { %1347 = vst [vmem:[%s2253_s24 + $0xb8] sm:$0xff] %v1007_v7  ;;  %v1010_v9 = vpop.f32.mrb[24].mxu0  ;;  %v755_v10 = vpop.f32.mrb[25].mxu1 }
 0x1a4   : > { %v1011_v11 = vadd.f32 %v1010_v9, %v753_v8  ;;  %v1012_v12 = vpop.f32.mrb[25].mxu0 }
 0x1a5   : > { %v1013_v13 = vadd.f32 %v1012_v12, %v755_v10 }
 0x1a6   : > { %1348 = vst [vmem:[%s2253_s24 + $0xc0] sm:$0xff] %v1011_v11  ;;  %v759_v14 = vpop.f32.mrb[26].mxu1 }
 0x1a7   : > { %1349 = vst [vmem:[%s2253_s24 + $0xc8] sm:$0xff] %v1013_v13  ;;  %v1016_v15 = vpop.f32.mrb[26].mxu0  ;;  %v761_v16 = vpop.f32.mrb[27].mxu1 }
 0x1a8   : > { %v1017_v17 = vadd.f32 %v1016_v15, %v759_v14  ;;  %v1018_v18 = vpop.f32.mrb[27].mxu0 }
 0x1a9   : > { %v1019_v19 = vadd.f32 %v1018_v18, %v761_v16 }
 0x1aa   : > { %1350 = vst [vmem:[%s2253_s24 + $0xd0] sm:$0xff] %v1017_v17  ;;  %v765_v20 = vpop.f32.mrb[28].mxu1 }
 0x1ab   : > { %1351 = vst [vmem:[%s2253_s24 + $0xd8] sm:$0xff] %v1019_v19  ;;  %v1022_v21 = vpop.f32.mrb[28].mxu0  ;;  %v767_v22 = vpop.f32.mrb[29].mxu1 }
 0x1ac   : > { %v1023_v23 = vadd.f32 %v1022_v21, %v765_v20  ;;  %v1024_v24 = vpop.f32.mrb[29].mxu0 }
 0x1ad   : > { %v1025_v25 = vadd.f32 %v1024_v24, %v767_v22 }
 0x1ae   : > { %1352 = vst [vmem:[%s2253_s24 + $0xe0] sm:$0xff] %v1023_v23  ;;  %v771_v26 = vpop.f32.mrb[30].mxu1 }
 0x1af   : > { %1353 = vst [vmem:[%s2253_s24 + $0xe8] sm:$0xff] %v1025_v25  ;;  %v1028_v27 = vpop.f32.mrb[30].mxu0  ;;  %v773_v28 = vpop.f32.mrb[31].mxu1 }
 0x1b0   : > { %v1029_v29 = vadd.f32 %v1028_v27, %v771_v26  ;;  %v1030_v30 = vpop.f32.mrb[31].mxu0 }
 0x1b1   : > { %v1031_v31 = vadd.f32 %v1030_v30, %v773_v28 }
 0x1b2   : > { %1354 = vst [vmem:[%s2253_s24 + $0xf0] sm:$0xff] %v1029_v29  ;;  %v777_v32 = vpop.f32.mrb[32].mxu1 }
 0x1b3   : > { %1355 = vst [vmem:[%s2253_s24 + $0xf8] sm:$0xff] %v1031_v31  ;;  %v1034_v33 = vpop.f32.mrb[32].mxu0  ;;  %v779_v34 = vpop.f32.mrb[33].mxu1 }
 0x1b4   : > { %v1035_v35 = vadd.f32 %v1034_v33, %v777_v32  ;;  %v1036_v36 = vpop.f32.mrb[33].mxu0 }
 0x1b5   : > { %v1037_v37 = vadd.f32 %v1036_v36, %v779_v34 }
 0x1b6   : > { %1356 = vst [vmem:[%s2253_s24 + $0x100] sm:$0xff] %v1035_v35  ;;  %v783_v38 = vpop.f32.mrb[34].mxu1 }
 0x1b7   : > { %1357 = vst [vmem:[%s2253_s24 + $0x108] sm:$0xff] %v1037_v37  ;;  %v1040_v39 = vpop.f32.mrb[34].mxu0  ;;  %v785_v40 = vpop.f32.mrb[35].mxu1 }
 0x1b8   : > { %v1041_v41 = vadd.f32 %v1040_v39, %v783_v38  ;;  %v1042_v42 = vpop.f32.mrb[35].mxu0 }
 0x1b9   : > { %v1043_v43 = vadd.f32 %v1042_v42, %v785_v40 }
 0x1ba   : > { %1358 = vst [vmem:[%s2253_s24 + $0x110] sm:$0xff] %v1041_v41  ;;  %v789_v44 = vpop.f32.mrb[36].mxu1 }
 0x1bb   : > { %1359 = vst [vmem:[%s2253_s24 + $0x118] sm:$0xff] %v1043_v43  ;;  %v1046_v45 = vpop.f32.mrb[36].mxu0  ;;  %v791_v46 = vpop.f32.mrb[37].mxu1 }
 0x1bc   : > { %v1047_v47 = vadd.f32 %v1046_v45, %v789_v44  ;;  %v1048_v48 = vpop.f32.mrb[37].mxu0 }
 0x1bd   : > { %v1049_v49 = vadd.f32 %v1048_v48, %v791_v46 }
 0x1be   : > { %1360 = vst [vmem:[%s2253_s24 + $0x120] sm:$0xff] %v1047_v47  ;;  %v795_v50 = vpop.f32.mrb[38].mxu1 }
 0x1bf   : > { %1361 = vst [vmem:[%s2253_s24 + $0x128] sm:$0xff] %v1049_v49  ;;  %v1052_v51 = vpop.f32.mrb[38].mxu0  ;;  %v797_v52 = vpop.f32.mrb[39].mxu1 }
 0x1c0   : > { %v1053_v53 = vadd.f32 %v1052_v51, %v795_v50  ;;  %v1054_v54 = vpop.f32.mrb[39].mxu0 }
 0x1c1   : > { %v1055_v55 = vadd.f32 %v1054_v54, %v797_v52 }
 0x1c2   : > { %1362 = vst [vmem:[%s2253_s24 + $0x130] sm:$0xff] %v1053_v53  ;;  %v801_v56 = vpop.f32.mrb[40].mxu1 }
 0x1c3   : > { %1363 = vst [vmem:[%s2253_s24 + $0x138] sm:$0xff] %v1055_v55  ;;  %v1058_v57 = vpop.f32.mrb[40].mxu0  ;;  %v803_v58 = vpop.f32.mrb[41].mxu1 }
 0x1c4   : > { %v1059_v59 = vadd.f32 %v1058_v57, %v801_v56  ;;  %v1060_v60 = vpop.f32.mrb[41].mxu0 }
 0x1c5   : > { %v1061_v61 = vadd.f32 %v1060_v60, %v803_v58 }
 0x1c6   : > { %1364 = vst [vmem:[%s2253_s24 + $0x140] sm:$0xff] %v1059_v59  ;;  %v807_v62 = vpop.f32.mrb[42].mxu1 }
 0x1c7   : > { %1365 = vst [vmem:[%s2253_s24 + $0x148] sm:$0xff] %v1061_v61  ;;  %v1064_v63 = vpop.f32.mrb[42].mxu0  ;;  %v809_v0 = vpop.f32.mrb[43].mxu1 }
 0x1c8   : > { %v1065_v1 = vadd.f32 %v1064_v63, %v807_v62  ;;  %v1066_v2 = vpop.f32.mrb[43].mxu0 }
 0x1c9   : > { %v1067_v3 = vadd.f32 %v1066_v2, %v809_v0 }
 0x1ca   : > { %1366 = vst [vmem:[%s2253_s24 + $0x150] sm:$0xff] %v1065_v1  ;;  %v813_v4 = vpop.f32.mrb[44].mxu1 }
 0x1cb   : > { %1367 = vst [vmem:[%s2253_s24 + $0x158] sm:$0xff] %v1067_v3  ;;  %v1070_v5 = vpop.f32.mrb[44].mxu0  ;;  %v815_v6 = vpop.f32.mrb[45].mxu1 }
 0x1cc   : > { %v1071_v7 = vadd.f32 %v1070_v5, %v813_v4  ;;  %v1072_v8 = vpop.f32.mrb[45].mxu0 }
 0x1cd   : > { %v1073_v9 = vadd.f32 %v1072_v8, %v815_v6 }
 0x1ce   : > { %1368 = vst [vmem:[%s2253_s24 + $0x160] sm:$0xff] %v1071_v7  ;;  %v819_v10 = vpop.f32.mrb[46].mxu1 }
 0x1cf   : > { %1369 = vst [vmem:[%s2253_s24 + $0x168] sm:$0xff] %v1073_v9  ;;  %v1076_v11 = vpop.f32.mrb[46].mxu0  ;;  %v821_v12 = vpop.f32.mrb[47].mxu1 }
 0x1d0   : > { %v1077_v13 = vadd.f32 %v1076_v11, %v819_v10  ;;  %v1078_v14 = vpop.f32.mrb[47].mxu0 }
 0x1d1   : > { %v1079_v15 = vadd.f32 %v1078_v14, %v821_v12 }
 0x1d2   : > { %1370 = vst [vmem:[%s2253_s24 + $0x170] sm:$0xff] %v1077_v13  ;;  %v825_v16 = vpop.f32.mrb[48].mxu1 }
 0x1d3   : > { %1371 = vst [vmem:[%s2253_s24 + $0x178] sm:$0xff] %v1079_v15  ;;  %v1082_v17 = vpop.f32.mrb[48].mxu0  ;;  %v827_v18 = vpop.f32.mrb[49].mxu1 }
 0x1d4   : > { %v1083_v19 = vadd.f32 %v1082_v17, %v825_v16  ;;  %v1084_v20 = vpop.f32.mrb[49].mxu0 }
 0x1d5   : > { %v1085_v21 = vadd.f32 %v1084_v20, %v827_v18 }
 0x1d6   : > { %1372 = vst [vmem:[%s2253_s24 + $0x180] sm:$0xff] %v1083_v19  ;;  %v831_v22 = vpop.f32.mrb[50].mxu1 }
 0x1d7   : > { %1373 = vst [vmem:[%s2253_s24 + $0x188] sm:$0xff] %v1085_v21  ;;  %v1088_v23 = vpop.f32.mrb[50].mxu0  ;;  %v833_v24 = vpop.f32.mrb[51].mxu1 }
 0x1d8   : > { %v1089_v25 = vadd.f32 %v1088_v23, %v831_v22  ;;  %v1090_v26 = vpop.f32.mrb[51].mxu0 }
 0x1d9   : > { %v1091_v27 = vadd.f32 %v1090_v26, %v833_v24 }
 0x1da   : > { %1374 = vst [vmem:[%s2253_s24 + $0x190] sm:$0xff] %v1089_v25  ;;  %v837_v28 = vpop.f32.mrb[52].mxu1 }
 0x1db   : > { %1375 = vst [vmem:[%s2253_s24 + $0x198] sm:$0xff] %v1091_v27  ;;  %v1094_v29 = vpop.f32.mrb[52].mxu0  ;;  %v839_v30 = vpop.f32.mrb[53].mxu1 }
 0x1dc   : > { %v1095_v31 = vadd.f32 %v1094_v29, %v837_v28  ;;  %v1096_v32 = vpop.f32.mrb[53].mxu0 }
 0x1dd   : > { %v1097_v33 = vadd.f32 %v1096_v32, %v839_v30 }
 0x1de   : > { %1376 = vst [vmem:[%s2253_s24 + $0x1a0] sm:$0xff] %v1095_v31  ;;  %v843_v34 = vpop.f32.mrb[54].mxu1 }
 0x1df   : > { %1377 = vst [vmem:[%s2253_s24 + $0x1a8] sm:$0xff] %v1097_v33  ;;  %v1100_v35 = vpop.f32.mrb[54].mxu0  ;;  %v845_v36 = vpop.f32.mrb[55].mxu1 }
 0x1e0   : > { %v1101_v37 = vadd.f32 %v1100_v35, %v843_v34  ;;  %v1102_v38 = vpop.f32.mrb[55].mxu0 }
 0x1e1   : > { %v1103_v39 = vadd.f32 %v1102_v38, %v845_v36 }
 0x1e2   : > { %1378 = vst [vmem:[%s2253_s24 + $0x1b0] sm:$0xff] %v1101_v37  ;;  %v849_v40 = vpop.f32.mrb[56].mxu1 }
 0x1e3   : > { %1379 = vst [vmem:[%s2253_s24 + $0x1b8] sm:$0xff] %v1103_v39  ;;  %v1106_v41 = vpop.f32.mrb[56].mxu0  ;;  %v851_v42 = vpop.f32.mrb[57].mxu1 }
 0x1e4   : > { %v1107_v43 = vadd.f32 %v1106_v41, %v849_v40  ;;  %v1108_v44 = vpop.f32.mrb[57].mxu0 }
 0x1e5   : > { %v1109_v45 = vadd.f32 %v1108_v44, %v851_v42 }
 0x1e6   : > { %1380 = vst [vmem:[%s2253_s24 + $0x1c0] sm:$0xff] %v1107_v43  ;;  %v855_v46 = vpop.f32.mrb[58].mxu1 }
 0x1e7   : > { %1381 = vst [vmem:[%s2253_s24 + $0x1c8] sm:$0xff] %v1109_v45  ;;  %v1112_v47 = vpop.f32.mrb[58].mxu0  ;;  %v857_v48 = vpop.f32.mrb[59].mxu1 }
 0x1e8   : > { %v1113_v49 = vadd.f32 %v1112_v47, %v855_v46  ;;  %v1114_v50 = vpop.f32.mrb[59].mxu0 }
 0x1e9   : > { %v1115_v51 = vadd.f32 %v1114_v50, %v857_v48 }
 0x1ea   : > { %1382 = vst [vmem:[%s2253_s24 + $0x1d0] sm:$0xff] %v1113_v49  ;;  %v861_v52 = vpop.f32.mrb[60].mxu1 }
 0x1eb   : > { %1383 = vst [vmem:[%s2253_s24 + $0x1d8] sm:$0xff] %v1115_v51  ;;  %v1118_v53 = vpop.f32.mrb[60].mxu0  ;;  %v863_v54 = vpop.f32.mrb[61].mxu1 }
 0x1ec   : > { %v1119_v55 = vadd.f32 %v1118_v53, %v861_v52  ;;  %v1120_v56 = vpop.f32.mrb[61].mxu0 }
 0x1ed   : > { %v1121_v57 = vadd.f32 %v1120_v56, %v863_v54 }
 0x1ee   : > { %1384 = vst [vmem:[%s2253_s24 + $0x1e0] sm:$0xff] %v1119_v55  ;;  %v867_v58 = vpop.f32.mrb[62].mxu1 }
 0x1ef   : > { %1385 = vst [vmem:[%s2253_s24 + $0x1e8] sm:$0xff] %v1121_v57  ;;  %v1124_v59 = vpop.f32.mrb[62].mxu0  ;;  %v869_v60 = vpop.f32.mrb[63].mxu1 }
 0x1f0   : > { %v1125_v61 = vadd.f32 %v1124_v59, %v867_v58  ;;  %v1126_v62 = vpop.f32.mrb[63].mxu0 }
 0x1f1   : > { %v1127_v63 = vadd.f32 %v1126_v62, %v869_v60 }
 0x1f2   : > { %1386 = vst [vmem:[%s2253_s24 + $0x1f0] sm:$0xff] %v1125_v61 }
 0x1f3   : > { %1387 = vst [vmem:[%s2253_s24 + $0x1f8] sm:$0xff] %v1127_v63 }
 0x1f4   : > { %1809 = shalt.err (!%p1806_p7)
}
 0x1f5   : > { %s1810_s17 = scalar_lea.hbm %s2323_s3, 8192  ;;  %s1814_s24 = scalar_lea.hbm %s2385_s2, 32768 }
 0x1f6   : > { %p1811_p9 = scmp.ne.s32.totalorder %s2323_s3, %s1810_s17  ;;  %p1815_p12 = scmp.lt.u32.totalorder %s2323_s3, %s2385_s2 }
 0x1f7   : > { %p1816_p13 = scmp.lt.u32.totalorder %s1814_s24, %s1810_s17  ;;  %p1818_p1 = scmp.lt.u32.totalorder %s1810_s17, %s2323_s3 }
 0x1f8   : > { %p1812_p10 = pnand %p1811_p9, %p1962_p3 }
 0x1f9   : > { %p1817_p0 = por %p1816_p13, %p1815_p12 }
 0x1fa   : > { %p1813_p11 = pneg %p1812_p10 }
 0x1fb   : > { %p1819_p2 = por %p1818_p1, %p1817_p0 }
 0x1fd   : > { %p1820_p4 = pnand %p1819_p2, %p1813_p11 }
 0x1ff   : > { %1823 = shalt.err (!%p1820_p4)
}
 0x200   : > { %s1893_s28 = smov 256   ;;  %s1894_s12 = smov 512  }
 0x201   : > { %s1895_s29 = smov 16  }
 0x202   : > { %1722 = dma.vmem_to_hbm [thread:$0]  (%p1962_p3), %s2325_s13, 8192, %s2323_s3, %s2331_s4, %s1893_s28, %s1894_s12, %s1895_s29  }
 0x203 PF: > { %p1728_p5 = scmp.ge.s32.totalorder %s1890_s16, 2  ;;  %s1420_s30 = sand.u32 1, %s1862_s9  }
 0x204   : > { %s1421_s5 = scalar_lea.sflag [#allocation4], %s1420_s30 }
 0x205   : > { %p1725_p6 = pnand %p1728_p5, %p1971_p8 }
 0x207   : > { %1857 = dma.done.wait (!%p1725_p6), %s1421_s5, 8192  }
 0x208   : > { %1859 = vsyncadd (!%p1725_p6), %s1421_s5, 4294959104  ;;  %s15_s16 = sadd.s32 1, %s1890_s16   ;;  %s2388_s9 = smov %s1866_s10 }
 0x209   : > { %p12_p7 = scmp.ge.s32.totalorder %s15_s16, 6   ;;  %s2389_s10 = smov %s1870_s11 }
 0x20a   : > { %s2390_s11 = smov %s1980_s27  ;;  %s2391_s12 = smov %s1882_s14 }
 0x20b   : > { %s2392_s13 = smov %s1886_s15  ;;  %s2393_s14 = smov %s2396_s19 }
 0x20c   : > { %s2394_s15 = smov %s2400_s20  ;;  %14 = sbr.rel (!%p12_p7) target bundleno = 5 (0x5), region = 74 }
 0x213   :  { %1426 = vsyncpa [#allocation4], 1 }
 0x214   :  { %1428 = vsyncpa [#allocation4 + $0x1], 1 }

// kernel: causal_self_attention.4
= control target key start
LH: loop header
LB: loop body
LE: loop exit
PB: predicated region body
PF: predicated region fallthrough
CT: control target
= control target key end

     0   :  { %s3432_s0 = inlined_call_operand.vmem [shape: f32[2,256,1536], index: 0, kind: input, shape index: {}, may-alias: {0,1,2}]   ;;  %s3433_s1 = inlined_call_operand.vmem [shape: f32[2,256,1536], index: 1, kind: input, shape index: {}, may-alias: {0,1,2}]   ;;  %s3434_s2 = inlined_call_operand.vmem [shape: f32[2,256,1536], index: 2, kind: input, shape index: {}, may-alias: {0,1,2}]   ;;  %s3435_s3 = inlined_call_operand.vmem [shape: f32[2,256,512], index: 3, kind: output, shape index: {}]  }
   0x1   :  { %3441 = sst [smem:[#allocation18_spill]] %s3435_s3 }
   0x2   :  { %s2628_s12 = smov 0   ;;  %s2630_s13 = smov 0  }
   0x3   :  { %s2632_s14 = smov 0   ;;  %s2634_s15 = smov 0  }
   0x4   :  { %s2636_s16 = smov 0   ;;  %s2638_s17 = smov 0  }
   0x5   :  { %s2640_s18 = smov 0   ;;  %s2642_s19 = smov 0  }
   0x6   :  { %s2644_s20 = smov 0   ;;  %s2646_s21 = smov 0  }
   0x7   :  { %s2648_s22 = smov 0   ;;  %s2650_s23 = smov 0  }
   0x8   :  { %s2652_s24 = smov 0   ;;  %s2654_s25 = smov 0  }
   0x9   :  { %s2656_s26 = smov 0  }
   0xa LB: > { %3442 = sst [smem:[#allocation9_spill]] %s2570_s18  ;;  %s28_s28 = sadd.s32 1, %s2586_s22  ;;  %s2602_s26 = sphi %s2656_s26, %s13_s26   ;;  %s2598_s25 = sphi %s2654_s25, %s3485_s25   ;;  %s2594_s24 = sphi %s2652_s24, %s3484_s24   ;;  %s2590_s23 = sphi %s2650_s23, %s3483_s23   ;;  %s2586_s22 = sphi %s2648_s22, %s3469_s22   ;;  %s2582_s21 = sphi %s2646_s21, %s3482_s21   ;;  %s2578_s20 = sphi %s2644_s20, %s3481_s20   ;;  %s2574_s19 = sphi %s2642_s19, %s3480_s19   ;;  %s2570_s18 = sphi %s2640_s18, %s3468_s18   ;;  %s2566_s17 = sphi %s2638_s17, %s3479_s17   ;;  %s2562_s16 = sphi %s2636_s16, %s3478_s16   ;;  %s2558_s15 = sphi %s2634_s15, %s3477_s15   ;;  %s2554_s14 = sphi %s2632_s14, %s3476_s14   ;;  %s2550_s13 = sphi %s2630_s13, %s3475_s13   ;;  %s2546_s12 = sphi %s2628_s12, %s3474_s12  }
   0xb   : > { %3443 = sst [smem:[#allocation10_spill]] %s2574_s19  ;;  %p29_p0 = scmp.ge.s32.totalorder %s28_s28, 2 }
   0xc   : > { %3444 = sst [smem:[#allocation11_spill]] %s2578_s20  ;;  %s31_s29 = sadd.s32 1, %s2590_s23 }
   0xd   : > { %3445 = sst [smem:[#allocation12_spill]] %s2582_s21  ;;  %s35_s30 = sadd.s32 1, %s2594_s24 }
   0xe   : > { %3446 = sst [smem:[#allocation13_spill]] %s2586_s22  ;;  %s39_s4 = sadd.s32 1, %s2598_s25 }
   0xf   : > { %s3487_s28 = smov (%p29_p0, %s28_s28), 0  ;;  %s3489_s29 = smov (!%p29_p0, %s31_s29), %s2590_s23 }
  0x10   : > { %3447 = sst [smem:[#allocation14_spill]] %s3487_s28  ;;  %p57_p1 = scmp.ne.s32.totalorder %s2566_s17, %s2562_s16 }
  0x11   : > { %p33_p2 = scmp.ge.s32.totalorder %s3489_s29, 2  ;;  %p58_p3 = scmp.eq.s32.totalorder %s2602_s26, 0 }
  0x12   : > { %p73_p4 = scmp.lt.s32.totalorder %s2586_s22, %s2590_s23  ;;  %s75_s6 = sadd.s32 4, %s2594_s24 }
  0x13   : > { %s3491_s29 = smov (%p33_p2, %s3489_s29), 0  ;;  %s3493_s30 = smov (!%p33_p2, %s35_s30), %s2594_s24 }
  0x14   : > { %3448 = sst [smem:[#allocation15_spill]] %s3491_s29  ;;  %s44_s7 = ssub.s32 %s2590_s23, %s3491_s29 }
  0x15   : > { %p2728_p5 = por %p58_p3, %p57_p1  ;;  %p37_p6 = scmp.ge.s32.totalorder %s3493_s30, 4 }
  0x16   : > { %p76_p7 = scmp.lt.s32.totalorder %s3487_s28, %s3491_s29  ;;  %s86_s3 = sadd.s32 1, %s2558_s15 }
  0x17   : > { %s2736_s9 = scalar_select %p73_p4, %s2586_s22, %s2590_s23 }
  0x18   : > { %s3495_s30 = smov (%p37_p6, %s3493_s30), 0  ;;  %s3497_s4 = smov (!%p37_p6, %s39_s4), %s2598_s25 }
  0x19   : > { %3450 = sst [smem:[#allocation16_spill]] %s3495_s30  ;;  %s46_s10 = ssub.s32 %s2594_s24, %s3495_s30 }
  0x1a   : > { %s78_s11 = sadd.s32 4, %s3495_s30  ;;  %p41_p8 = scmp.ge.s32.totalorder %s3497_s4, 2 }
  0x1b   : > { %s82_s27 = ssub.s32 %s75_s6, %s78_s11  ;;  %p93_p9 = scmp.ne.s32.totalorder %s2558_s15, %s2554_s14 }
  0x1c   : > { %s77_s5 = scalar_select %p76_p7, %s3487_s28, %s3491_s29 }
  0x1d   : > { %s3499_s4 = smov (%p41_p8, %s3497_s4), 0  ;;  %p2756_p12 = por %p93_p9, %p58_p3 }
  0x1e   : > { %3451 = sst [smem:[#allocation17_spill]] %s3499_s4  ;;  %s80_s22 = ssub.s32 %s2736_s9, %s77_s5 }
  0x1f   : > { %s43_s20 = ssub.s32 %s2598_s25, %s3499_s4  ;;  %s111_s5 = sadd.s32 8, %s2594_s24 }
  0x20   : > { %s45_s21 = sor.u32 %s44_s7, %s43_s20  ;;  %s81_s19 = sor.u32 %s80_s22, %s43_s20 }
  0x21   : > { %s47_s18 = sor.u32 %s46_s10, %s45_s21  ;;  %s83_s6 = sor.u32 %s82_s27, %s81_s19 }
  0x22   : > { %p48_p10 = scmp.eq.s32.totalorder %s47_s18, 0  ;;  %p84_p11 = scmp.eq.s32.totalorder %s83_s6, 0 }
  0x23   : > { %s3453_s29 = sadd.s32 1, %s2566_s17  ;;  %s114_s20 = sadd.s32 8, %s3495_s30 }
  0x24   : > { %s2764_s4 = scalar_select %p48_p10, %s2566_s17, %s3453_s29  }
  0x25   : > { %s2767_s28 = scalar_select %p84_p11, %s2558_s15, %s86_s3  }
  0x26   : > { %s122_s22 = sadd.s32 1, %s2550_s13  ;;  %s118_s21 = ssub.s32 %s111_s5, %s114_s20 }
  0x27   : > { %p129_p13 = scmp.ne.s32.totalorder %s2550_s13, %s2546_s12  ;;  %s119_s7 = sor.u32 %s118_s21, %s81_s19 }
  0x28   : > { %s3454_s27 = sadd.s32 4294967295, %s2602_s26   ;;  %p120_p2 = scmp.eq.s32.totalorder %s119_s7, 0 }
  0x29   : > { %p163_p0 = scmp.eq.s32.totalorder %s3454_s27, 31  ;;  %p2777_p4 = por %p129_p13, %p58_p3 }
  0x2a   : > { %s2789_s3 = scalar_select %p120_p2, %s2550_s13, %s122_s22  }
  0x2b   : > { %p2784_p6 = por %p163_p0, %p57_p1  ;;  %p1959_p7 = scmp.ge.s32.totalorder %s2602_s26, 32 }
  0x2d   : > { %185 = sbr.rel (%p1959_p7) target bundleno = 124 (0x7c), region = 16 }
  0x34   : > { %188 = sbr.rel (!%p2728_p5) target bundleno = 76 (0x4c), region = 20  ;;  %s190_s19 = sand.u32 (%p2728_p5), 1, %s2566_s17  }
  0x35   : > { %s2258_s29 = smul.u32 (%p2728_p5), 192, %s2590_s23  ;;  %s1960_s6 = sshll.u32 (%p2728_p5), %s190_s19, 7 }
  0x36   : > { %s2259_s5 = smul.u32 (%p2728_p5), 384, %s2598_s25  ;;  %s192_s8 = scalar_lea.vmem (%p2728_p5), [#allocation5], %s1960_s6 }
  0x37   : > { %s195_s20 = sadd.s32 (%p2728_p5), %s2594_s24, %s2258_s29 }
  0x38   : > { %s197_s21 = sadd.s32 (%p2728_p5), %s2259_s5, %s195_s20 }
  0x39   : > { %s1963_s7 = sshll.u32 (%p2728_p5), %s197_s21, 3 }
  0x3a   : > { %s2801_s30 = scalar_lea.vmem (%p2728_p5), %s3432_s0, %s1963_s7 }
  0x3b   : > { %v257_v0 = vld [vmem:[%s2801_s30] sm:$0xff] }
  0x3c   : > { %v259_v1 = vld [vmem:[%s2801_s30 + $0x60] sm:$0xff]  ;;  %258 = vst [vmem:[%s192_s8] sm:$0xff] %v257_v0 }
  0x3d   : > { %v261_v2 = vld [vmem:[%s2801_s30 + $0xc0] sm:$0xff]  ;;  %260 = vst [vmem:[%s192_s8 + $0x8] sm:$0xff] %v259_v1 }
  0x3e   : > { %262 = vst [vmem:[%s192_s8 + $0x10] sm:$0xff] %v261_v2  ;;  %v263_v3 = vld [vmem:[%s2801_s30 + $0x120] sm:$0xff] }
  0x3f   : > { %v265_v4 = vld [vmem:[%s2801_s30 + $0x180] sm:$0xff]  ;;  %264 = vst [vmem:[%s192_s8 + $0x18] sm:$0xff] %v263_v3 }
  0x40   : > { %v267_v5 = vld [vmem:[%s2801_s30 + $0x1e0] sm:$0xff]  ;;  %266 = vst [vmem:[%s192_s8 + $0x20] sm:$0xff] %v265_v4 }
  0x41   : > { %268 = vst [vmem:[%s192_s8 + $0x28] sm:$0xff] %v267_v5  ;;  %v269_v6 = vld [vmem:[%s2801_s30 + $0x240] sm:$0xff] }
  0x42   : > { %v271_v7 = vld [vmem:[%s2801_s30 + $0x2a0] sm:$0xff]  ;;  %270 = vst [vmem:[%s192_s8 + $0x30] sm:$0xff] %v269_v6 }
  0x43   : > { %v273_v8 = vld [vmem:[%s2801_s30 + $0x300] sm:$0xff]  ;;  %272 = vst [vmem:[%s192_s8 + $0x38] sm:$0xff] %v271_v7 }
  0x44   : > { %274 = vst [vmem:[%s192_s8 + $0x40] sm:$0xff] %v273_v8  ;;  %v275_v9 = vld [vmem:[%s2801_s30 + $0x360] sm:$0xff] }
  0x45   : > { %v277_v10 = vld [vmem:[%s2801_s30 + $0x3c0] sm:$0xff]  ;;  %276 = vst [vmem:[%s192_s8 + $0x48] sm:$0xff] %v275_v9 }
  0x46   : > { %v279_v11 = vld [vmem:[%s2801_s30 + $0x420] sm:$0xff]  ;;  %278 = vst [vmem:[%s192_s8 + $0x50] sm:$0xff] %v277_v10 }
  0x47   : > { %280 = vst [vmem:[%s192_s8 + $0x58] sm:$0xff] %v279_v11  ;;  %v281_v12 = vld [vmem:[%s2801_s30 + $0x480] sm:$0xff] }
  0x48   : > { %v283_v13 = vld [vmem:[%s2801_s30 + $0x4e0] sm:$0xff]  ;;  %282 = vst [vmem:[%s192_s8 + $0x60] sm:$0xff] %v281_v12 }
  0x49   : > { %v285_v14 = vld [vmem:[%s2801_s30 + $0x540] sm:$0xff]  ;;  %284 = vst [vmem:[%s192_s8 + $0x68] sm:$0xff] %v283_v13 }
  0x4a   : > { %286 = vst [vmem:[%s192_s8 + $0x70] sm:$0xff] %v285_v14  ;;  %v287_v15 = vld [vmem:[%s2801_s30 + $0x5a0] sm:$0xff] }
  0x4b   : > { %288 = vst [vmem:[%s192_s8 + $0x78] sm:$0xff] %v287_v15 }
  0x4c PF: > { %294 = sbr.rel (!%p2756_p12) target bundleno = 100 (0x64), region = 58  ;;  %s296_s19 = sand.u32 (%p2756_p12), 1, %s2558_s15  }
  0x4d   : > { %s1844_s29 = smul.u32 (%p2756_p12), 192, %s2736_s9  ;;  %s1964_s6 = sshll.u32 (%p2756_p12), %s296_s19, 7 }
  0x4e   : > { %s1846_s5 = smul.u32 (%p2756_p12), 384, %s2598_s25  ;;  %s298_s11 = scalar_lea.vmem (%p2756_p12), [#allocation6], %s1964_s6 }
  0x4f   : > { %s1845_s20 = sadd.s32 (%p2756_p12), %s2594_s24, %s1844_s29 }
  0x50   : > { %s1847_s21 = sadd.s32 (%p2756_p12), %s1846_s5, %s1845_s20 }
  0x51   : > { %s1965_s7 = sshll.u32 (%p2756_p12), %s1847_s21, 3 }
  0x52   : > { %s2828_s30 = scalar_lea.vmem (%p2756_p12), %s3433_s1, %s1965_s7 }
  0x53   : > { %v1966_v16 = vld [vmem:[%s2828_s30 + $0x20] sm:$0xff] }
  0x54   : > { %v1967_v17 = vld [vmem:[%s2828_s30 + $0x80] sm:$0xff]  ;;  %367 = vst [vmem:[%s298_s11] sm:$0xff] %v1966_v16 }
  0x55   : > { %v1968_v18 = vld [vmem:[%s2828_s30 + $0xe0] sm:$0xff]  ;;  %369 = vst [vmem:[%s298_s11 + $0x8] sm:$0xff] %v1967_v17 }
  0x56   : > { %371 = vst [vmem:[%s298_s11 + $0x10] sm:$0xff] %v1968_v18  ;;  %v1969_v19 = vld [vmem:[%s2828_s30 + $0x140] sm:$0xff] }
  0x57   : > { %v1970_v20 = vld [vmem:[%s2828_s30 + $0x1a0] sm:$0xff]  ;;  %373 = vst [vmem:[%s298_s11 + $0x18] sm:$0xff] %v1969_v19 }
  0x58   : > { %v1971_v21 = vld [vmem:[%s2828_s30 + $0x200] sm:$0xff]  ;;  %375 = vst [vmem:[%s298_s11 + $0x20] sm:$0xff] %v1970_v20 }
  0x59   : > { %377 = vst [vmem:[%s298_s11 + $0x28] sm:$0xff] %v1971_v21  ;;  %v1972_v22 = vld [vmem:[%s2828_s30 + $0x260] sm:$0xff] }
  0x5a   : > { %v1973_v23 = vld [vmem:[%s2828_s30 + $0x2c0] sm:$0xff]  ;;  %379 = vst [vmem:[%s298_s11 + $0x30] sm:$0xff] %v1972_v22 }
  0x5b   : > { %v1974_v24 = vld [vmem:[%s2828_s30 + $0x320] sm:$0xff]  ;;  %381 = vst [vmem:[%s298_s11 + $0x38] sm:$0xff] %v1973_v23 }
  0x5c   : > { %383 = vst [vmem:[%s298_s11 + $0x40] sm:$0xff] %v1974_v24  ;;  %v1975_v25 = vld [vmem:[%s2828_s30 + $0x380] sm:$0xff] }
  0x5d   : > { %v1976_v26 = vld [vmem:[%s2828_s30 + $0x3e0] sm:$0xff]  ;;  %385 = vst [vmem:[%s298_s11 + $0x48] sm:$0xff] %v1975_v25 }
  0x5e   : > { %v1977_v27 = vld [vmem:[%s2828_s30 + $0x440] sm:$0xff]  ;;  %387 = vst [vmem:[%s298_s11 + $0x50] sm:$0xff] %v1976_v26 }
  0x5f   : > { %389 = vst [vmem:[%s298_s11 + $0x58] sm:$0xff] %v1977_v27  ;;  %v1978_v28 = vld [vmem:[%s2828_s30 + $0x4a0] sm:$0xff] }
  0x60   : > { %v1979_v29 = vld [vmem:[%s2828_s30 + $0x500] sm:$0xff]  ;;  %391 = vst [vmem:[%s298_s11 + $0x60] sm:$0xff] %v1978_v28 }
  0x61   : > { %v1980_v30 = vld [vmem:[%s2828_s30 + $0x560] sm:$0xff]  ;;  %393 = vst [vmem:[%s298_s11 + $0x68] sm:$0xff] %v1979_v29 }
  0x62   : > { %395 = vst [vmem:[%s298_s11 + $0x70] sm:$0xff] %v1980_v30  ;;  %v1981_v31 = vld [vmem:[%s2828_s30 + $0x5c0] sm:$0xff] }
  0x63   : > { %397 = vst [vmem:[%s298_s11 + $0x78] sm:$0xff] %v1981_v31 }
  0x64 PF: > { %403 = sbr.rel (!%p2777_p4) target bundleno = 124 (0x7c), region = 96  ;;  %s405_s8 = sand.u32 (%p2777_p4), 1, %s2550_s13  }
  0x65   : > { %s1853_s19 = smul.u32 (%p2777_p4), 192, %s2736_s9  ;;  %s1982_s29 = sshll.u32 (%p2777_p4), %s405_s8, 7 }
  0x66   : > { %s1855_s6 = smul.u32 (%p2777_p4), 384, %s2598_s25  ;;  %s407_s9 = scalar_lea.vmem (%p2777_p4), [#allocation7], %s1982_s29 }
  0x67   : > { %s1854_s5 = sadd.s32 (%p2777_p4), %s2594_s24, %s1853_s19 }
  0x68   : > { %s1856_s20 = sadd.s32 (%p2777_p4), %s1855_s6, %s1854_s5 }
  0x69   : > { %s1983_s21 = sshll.u32 (%p2777_p4), %s1856_s20, 3 }
  0x6a   : > { %s2855_s22 = scalar_lea.vmem (%p2777_p4), %s3434_s2, %s1983_s21 }
  0x6b   : > { %v1984_v32 = vld [vmem:[%s2855_s22 + $0x40] sm:$0xff] }
  0x6c   : > { %v1985_v33 = vld [vmem:[%s2855_s22 + $0xa0] sm:$0xff]  ;;  %476 = vst [vmem:[%s407_s9] sm:$0xff] %v1984_v32 }
  0x6d   : > { %v1986_v34 = vld [vmem:[%s2855_s22 + $0x100] sm:$0xff]  ;;  %478 = vst [vmem:[%s407_s9 + $0x8] sm:$0xff] %v1985_v33 }
  0x6e   : > { %480 = vst [vmem:[%s407_s9 + $0x10] sm:$0xff] %v1986_v34  ;;  %v1987_v35 = vld [vmem:[%s2855_s22 + $0x160] sm:$0xff] }
  0x6f   : > { %v1988_v36 = vld [vmem:[%s2855_s22 + $0x1c0] sm:$0xff]  ;;  %482 = vst [vmem:[%s407_s9 + $0x18] sm:$0xff] %v1987_v35 }
  0x70   : > { %v1989_v37 = vld [vmem:[%s2855_s22 + $0x220] sm:$0xff]  ;;  %484 = vst [vmem:[%s407_s9 + $0x20] sm:$0xff] %v1988_v36 }
  0x71   : > { %486 = vst [vmem:[%s407_s9 + $0x28] sm:$0xff] %v1989_v37  ;;  %v1990_v38 = vld [vmem:[%s2855_s22 + $0x280] sm:$0xff] }
  0x72   : > { %v1991_v39 = vld [vmem:[%s2855_s22 + $0x2e0] sm:$0xff]  ;;  %488 = vst [vmem:[%s407_s9 + $0x30] sm:$0xff] %v1990_v38 }
  0x73   : > { %v1992_v40 = vld [vmem:[%s2855_s22 + $0x340] sm:$0xff]  ;;  %490 = vst [vmem:[%s407_s9 + $0x38] sm:$0xff] %v1991_v39 }
  0x74   : > { %492 = vst [vmem:[%s407_s9 + $0x40] sm:$0xff] %v1992_v40  ;;  %v1993_v41 = vld [vmem:[%s2855_s22 + $0x3a0] sm:$0xff] }
  0x75   : > { %v1994_v42 = vld [vmem:[%s2855_s22 + $0x400] sm:$0xff]  ;;  %494 = vst [vmem:[%s407_s9 + $0x48] sm:$0xff] %v1993_v41 }
  0x76   : > { %v1995_v43 = vld [vmem:[%s2855_s22 + $0x460] sm:$0xff]  ;;  %496 = vst [vmem:[%s407_s9 + $0x50] sm:$0xff] %v1994_v42 }
  0x77   : > { %498 = vst [vmem:[%s407_s9 + $0x58] sm:$0xff] %v1995_v43  ;;  %v1996_v44 = vld [vmem:[%s2855_s22 + $0x4c0] sm:$0xff] }
  0x78   : > { %v1997_v45 = vld [vmem:[%s2855_s22 + $0x520] sm:$0xff]  ;;  %500 = vst [vmem:[%s407_s9 + $0x60] sm:$0xff] %v1996_v44 }
  0x79   : > { %v1998_v46 = vld [vmem:[%s2855_s22 + $0x580] sm:$0xff]  ;;  %502 = vst [vmem:[%s407_s9 + $0x68] sm:$0xff] %v1997_v45 }
  0x7a   : > { %504 = vst [vmem:[%s407_s9 + $0x70] sm:$0xff] %v1998_v46  ;;  %v1999_v47 = vld [vmem:[%s2855_s22 + $0x5e0] sm:$0xff] }
  0x7b   : > { %506 = vst [vmem:[%s407_s9 + $0x78] sm:$0xff] %v1999_v47 }
  0x7c PF: > { %p2000_p1 = scmp.ge.s32.totalorder %s2602_s26, 1  ;;  %p511_p3 = scmp.lt.s32.totalorder %s2602_s26, 33 }
  0x7e   : > { %p512_p5 = pnand %p2000_p1, %p511_p3 }
  0x7f   : > { %s518_s18 = sand.u32 (!%p512_p5), 1, %s2562_s16   ;;  %s525_s30 = sand.u32 (!%p512_p5), 1, %s2554_s14  }
  0x80   : > { %515 = sbr.rel (%p512_p5) target bundleno = 1200 (0x4b0), region = 134  ;;  %s2001_s11 = sshll.u32 (!%p512_p5), %s518_s18, 7 }
  0x81   : > { %s2002_s8 = sshll.u32 (!%p512_p5), %s525_s30, 7  ;;  %s532_s19 = sand.u32 (!%p512_p5), 1, %s2546_s12  }
  0x82   : > { %s2003_s29 = sshll.u32 (!%p512_p5), %s532_s19, 7  ;;  %s2878_s6 = scalar_lea.vmem (!%p512_p5), [#allocation5], %s2001_s11 }
  0x83   : > { %s2880_s5 = scalar_lea.vmem (!%p512_p5), [#allocation6], %s2002_s8  ;;  %s2882_s20 = scalar_lea.vmem (!%p512_p5), [#allocation7], %s2003_s29 }
  0x84   : > { %s2884_s21 = scalar_lea.vmem (!%p512_p5), [#allocation8], %s2001_s11  ;;  %s3457_s7 = sld [smem:[#allocation9_spill]] (!%p512_p5) }
  0x8a   : > { %p2005_p8 = scmp.ne.s32.totalorder %s3457_s7, 0 }
  0x8b   : > { %vm576_vm0 = vcmask (!%p2005_p8), 7168   ;;  %v2604_v48 = vmov (!%p2005_p8), -1e+30   ;;  %v2605_v49 = vmov (!%p2005_p8), 0.0  }
  0x8c   : > { %575 = sbr.rel (%p2005_p8) target bundleno = 164 (0xa4), region = 150  ;;  %577 = vst.msk [vmem:[#allocation2] sm:$0xff] (!%p2005_p8), %vm576_vm0, %v2604_v48  ;;  %578 = vst.msk [vmem:[#allocation2 + $0x8] sm:$0xff] (!%p2005_p8), %vm576_vm0, %v2604_v48 }
  0x8d   : > { %579 = vst.msk [vmem:[#allocation2 + $0x10] sm:$0xff] (!%p2005_p8), %vm576_vm0, %v2604_v48  ;;  %580 = vst.msk [vmem:[#allocation2 + $0x18] sm:$0xff] (!%p2005_p8), %vm576_vm0, %v2604_v48 }
  0x8e   : > { %581 = vst.msk [vmem:[#allocation2 + $0x20] sm:$0xff] (!%p2005_p8), %vm576_vm0, %v2604_v48  ;;  %582 = vst.msk [vmem:[#allocation2 + $0x28] sm:$0xff] (!%p2005_p8), %vm576_vm0, %v2604_v48 }
  0x8f   : > { %583 = vst.msk [vmem:[#allocation2 + $0x30] sm:$0xff] (!%p2005_p8), %vm576_vm0, %v2604_v48  ;;  %584 = vst.msk [vmem:[#allocation2 + $0x38] sm:$0xff] (!%p2005_p8), %vm576_vm0, %v2604_v48 }
  0x90   : > { %585 = vst.msk [vmem:[#allocation2 + $0x40] sm:$0xff] (!%p2005_p8), %vm576_vm0, %v2604_v48  ;;  %586 = vst.msk [vmem:[#allocation2 + $0x48] sm:$0xff] (!%p2005_p8), %vm576_vm0, %v2604_v48 }
  0x91   : > { %587 = vst.msk [vmem:[#allocation2 + $0x50] sm:$0xff] (!%p2005_p8), %vm576_vm0, %v2604_v48  ;;  %588 = vst.msk [vmem:[#allocation2 + $0x58] sm:$0xff] (!%p2005_p8), %vm576_vm0, %v2604_v48 }
  0x92   : > { %589 = vst.msk [vmem:[#allocation2 + $0x60] sm:$0xff] (!%p2005_p8), %vm576_vm0, %v2604_v48  ;;  %590 = vst.msk [vmem:[#allocation2 + $0x68] sm:$0xff] (!%p2005_p8), %vm576_vm0, %v2604_v48 }
  0x93   : > { %591 = vst.msk [vmem:[#allocation2 + $0x70] sm:$0xff] %vm576_vm0, %v2604_v48  ;;  %592 = vst.msk [vmem:[#allocation2 + $0x78] sm:$0xff] %vm576_vm0, %v2604_v48 }
  0x94   : > { %593 = vst.msk [vmem:[#allocation3] sm:$0xff] %vm576_vm0, %v2605_v49  ;;  %594 = vst.msk [vmem:[#allocation3 + $0x8] sm:$0xff] %vm576_vm0, %v2605_v49 }
  0x95   : > { %595 = vst.msk [vmem:[#allocation3 + $0x10] sm:$0xff] %vm576_vm0, %v2605_v49  ;;  %596 = vst.msk [vmem:[#allocation3 + $0x18] sm:$0xff] %vm576_vm0, %v2605_v49 }
  0x96   : > { %597 = vst.msk [vmem:[#allocation3 + $0x20] sm:$0xff] %vm576_vm0, %v2605_v49  ;;  %598 = vst.msk [vmem:[#allocation3 + $0x28] sm:$0xff] %vm576_vm0, %v2605_v49 }
  0x97   : > { %599 = vst.msk [vmem:[#allocation3 + $0x30] sm:$0xff] %vm576_vm0, %v2605_v49  ;;  %600 = vst.msk [vmem:[#allocation3 + $0x38] sm:$0xff] %vm576_vm0, %v2605_v49 }
  0x98   : > { %601 = vst.msk [vmem:[#allocation3 + $0x40] sm:$0xff] %vm576_vm0, %v2605_v49  ;;  %602 = vst.msk [vmem:[#allocation3 + $0x48] sm:$0xff] %vm576_vm0, %v2605_v49 }
  0x99   : > { %603 = vst.msk [vmem:[#allocation3 + $0x50] sm:$0xff] %vm576_vm0, %v2605_v49  ;;  %604 = vst.msk [vmem:[#allocation3 + $0x58] sm:$0xff] %vm576_vm0, %v2605_v49 }
  0x9a   : > { %605 = vst.msk [vmem:[#allocation3 + $0x60] sm:$0xff] %vm576_vm0, %v2605_v49  ;;  %606 = vst.msk [vmem:[#allocation3 + $0x68] sm:$0xff] %vm576_vm0, %v2605_v49 }
  0x9b   : > { %607 = vst.msk [vmem:[#allocation3 + $0x70] sm:$0xff] %vm576_vm0, %v2605_v49  ;;  %608 = vst.msk [vmem:[#allocation3 + $0x78] sm:$0xff] %vm576_vm0, %v2605_v49 }
  0x9c   : > { %609 = vst [vmem:[#allocation4] sm:$0xff] %v2605_v49  ;;  %610 = vst [vmem:[#allocation4 + $0x8] sm:$0xff] %v2605_v49 }
  0x9d   : > { %611 = vst [vmem:[#allocation4 + $0x10] sm:$0xff] %v2605_v49  ;;  %612 = vst [vmem:[#allocation4 + $0x18] sm:$0xff] %v2605_v49 }
  0x9e   : > { %613 = vst [vmem:[#allocation4 + $0x20] sm:$0xff] %v2605_v49  ;;  %614 = vst [vmem:[#allocation4 + $0x28] sm:$0xff] %v2605_v49 }
  0x9f   : > { %615 = vst [vmem:[#allocation4 + $0x30] sm:$0xff] %v2605_v49  ;;  %616 = vst [vmem:[#allocation4 + $0x38] sm:$0xff] %v2605_v49 }
  0xa0   : > { %617 = vst [vmem:[#allocation4 + $0x40] sm:$0xff] %v2605_v49  ;;  %618 = vst [vmem:[#allocation4 + $0x48] sm:$0xff] %v2605_v49 }
  0xa1   : > { %619 = vst [vmem:[#allocation4 + $0x50] sm:$0xff] %v2605_v49  ;;  %620 = vst [vmem:[#allocation4 + $0x58] sm:$0xff] %v2605_v49 }
  0xa2   : > { %621 = vst [vmem:[#allocation4 + $0x60] sm:$0xff] %v2605_v49  ;;  %622 = vst [vmem:[#allocation4 + $0x68] sm:$0xff] %v2605_v49 }
  0xa3   : > { %623 = vst [vmem:[#allocation4 + $0x70] sm:$0xff] %v2605_v49  ;;  %624 = vst [vmem:[#allocation4 + $0x78] sm:$0xff] %v2605_v49 }
  0xa4 PF: > { %s3458_s12 = sld [smem:[#allocation10_spill]]  ;;  %s3459_s14 = sld [smem:[#allocation9_spill]] }
  0xaa   : > { %p2006_p9 = scmp.gt.s32.totalorder %s3459_s14, %s3458_s12 }
  0xab   : > { %v645_v50 = vld [vmem:[%s2880_s5] sm:$0xff] (!%p2006_p9)  ;;  %v646_v51 = vld [vmem:[%s2880_s5 + $0x8] sm:$0xff] (!%p2006_p9)  ;;  %v647_v52 = vld [vmem:[%s2880_s5 + $0x10] sm:$0xff] (!%p2006_p9)  ;;  %s3460_s16 = sld [smem:[#allocation10_spill]] (!%p2006_p9)  ;;  %s3461_s27 = sld [smem:[#allocation9_spill]] (!%p2006_p9)  ;;  %v823_v26 = vlaneseq (!%p2006_p9) }
  0xac   : > { %628 = sbr.rel (%p2006_p9) target bundleno = 1002 (0x3ea), region = 154  ;;  %v2194_v53 = vpack.c.bf16 (!%p2006_p9), %v646_v51, %v645_v50  ;;  %v648_v54 = vld [vmem:[%s2880_s5 + $0x18] sm:$0xff] (!%p2006_p9)  ;;  %v629_v56 = vld [vmem:[%s2878_s6] sm:$0xff] (!%p2006_p9)  ;;  %v650_v58 = vld [vmem:[%s2880_s5 + $0x28] sm:$0xff] (!%p2006_p9) }
  0xad   : > { %v2198_v55 = vpack.c.bf16 (!%p2006_p9), %v648_v54, %v647_v52  ;;  %v649_v57 = vld [vmem:[%s2880_s5 + $0x20] sm:$0xff] (!%p2006_p9)  ;;  %2114 = vmatprep.mubr.f32.mxu0 (!%p2006_p9), %v629_v56  ;;  %v651_v60 = vld [vmem:[%s2880_s5 + $0x30] sm:$0xff] (!%p2006_p9)  ;;  %v652_v61 = vld [vmem:[%s2880_s5 + $0x38] sm:$0xff] (!%p2006_p9)  ;;  %v2955_v27 = vshrl.u32 (!%p2006_p9), %v823_v26, 7  ;;  %v859_v28 = vand.u32 (!%p2006_p9), 127, %v823_v26 }
  0xae   : > { %2195 = vmatprep.subr.bf16.mxu0 (!%p2006_p9), %v2194_v53  ;;  %v2202_v59 = vpack.c.bf16 (!%p2006_p9), %v650_v58, %v649_v57  ;;  %v2206_v62 = vpack.c.bf16 (!%p2006_p9), %v652_v61, %v651_v60  ;;  %v653_v63 = vld [vmem:[%s2880_s5 + $0x40] sm:$0xff] (!%p2006_p9)  ;;  %v654_v0 = vld [vmem:[%s2880_s5 + $0x48] sm:$0xff] (!%p2006_p9)  ;;  %v655_v2 = vld [vmem:[%s2880_s5 + $0x50] sm:$0xff] (!%p2006_p9) }
  0xaf   : > { %2197 = vmatpush3.bf16.xpose.msra.mxu0 (!%p2006_p9), %v2194_v53  ;;  %v2210_v1 = vpack.c.bf16 (!%p2006_p9), %v654_v0, %v653_v63  ;;  %v656_v3 = vld [vmem:[%s2880_s5 + $0x58] sm:$0xff] (!%p2006_p9)  ;;  %v657_v5 = vld [vmem:[%s2880_s5 + $0x60] sm:$0xff] (!%p2006_p9)  ;;  %v658_v6 = vld [vmem:[%s2880_s5 + $0x68] sm:$0xff] (!%p2006_p9)  ;;  %v827_v31 = vadd.s32 (!%p2006_p9), 24, %v2955_v27  ;;  %v825_v34 = vadd.s32 (!%p2006_p9), 8, %v2955_v27  ;;  %v826_v35 = vadd.s32 (!%p2006_p9), 16, %v2955_v27 }
  0xb0   : > { %2199 = vmatprep.subr.bf16.mxu0 (!%p2006_p9), %v2198_v55  ;;  %v2214_v4 = vpack.c.bf16 (!%p2006_p9), %v656_v3, %v655_v2  ;;  %v2218_v7 = vpack.c.bf16 (!%p2006_p9), %v658_v6, %v657_v5  ;;  %v659_v8 = vld [vmem:[%s2880_s5 + $0x70] sm:$0xff] (!%p2006_p9)  ;;  %v660_v9 = vld [vmem:[%s2880_s5 + $0x78] sm:$0xff] (!%p2006_p9)  ;;  %v630_v11 = vld [vmem:[%s2878_s6 + $0x8] sm:$0xff] (!%p2006_p9)  ;;  %v828_v40 = vadd.s32 (!%p2006_p9), 32, %v2955_v27  ;;  %v829_v43 = vadd.s32 (!%p2006_p9), 40, %v2955_v27 }
  0xb1   : > { %v2222_v10 = vpack.c.bf16 (!%p2006_p9), %v660_v9, %v659_v8  ;;  %v631_v12 = vld [vmem:[%s2878_s6 + $0x10] sm:$0xff] (!%p2006_p9)  ;;  %v632_v13 = vld [vmem:[%s2878_s6 + $0x18] sm:$0xff] (!%p2006_p9)  ;;  %v633_v14 = vld [vmem:[%s2878_s6 + $0x20] sm:$0xff] (!%p2006_p9)  ;;  %s2007_s22 = sshll.u32 (!%p2006_p9), %s3460_s16, 7  ;;  %s2008_s9 = sshll.u32 (!%p2006_p9), %s3461_s27, 7  ;;  %v830_v50 = vadd.s32 (!%p2006_p9), 48, %v2955_v27 }
  0xb2   : > { %v634_v15 = vld [vmem:[%s2878_s6 + $0x28] sm:$0xff] (!%p2006_p9)  ;;  %v635_v16 = vld [vmem:[%s2878_s6 + $0x30] sm:$0xff] (!%p2006_p9)  ;;  %v636_v17 = vld [vmem:[%s2878_s6 + $0x38] sm:$0xff] (!%p2006_p9)  ;;  %v2957_v29 = vstv (!%p2006_p9), %s2007_s22  ;;  %v831_v53 = vadd.s32 (!%p2006_p9), 56, %v2955_v27  ;;  %v832_v57 = vadd.s32 (!%p2006_p9), 64, %v2955_v27  ;;  %v833_v0 = vadd.s32 (!%p2006_p9), 72, %v2955_v27 }
  0xb3   : > { %v637_v18 = vld [vmem:[%s2878_s6 + $0x40] sm:$0xff]  ;;  %v638_v19 = vld [vmem:[%s2878_s6 + $0x48] sm:$0xff]  ;;  %v639_v20 = vld [vmem:[%s2878_s6 + $0x50] sm:$0xff]  ;;  %v860_v30 = vstv %s2008_s9  ;;  %v841_v32 = vadd.s32 %v2957_v29, %v2955_v27  ;;  %v844_v37 = vadd.s32 %v2957_v29, %v827_v31  ;;  %v842_v39 = vadd.s32 %v2957_v29, %v825_v34 }
  0xb4   : > { %v640_v21 = vld [vmem:[%s2878_s6 + $0x58] sm:$0xff]  ;;  %v641_v22 = vld [vmem:[%s2878_s6 + $0x60] sm:$0xff]  ;;  %v642_v23 = vld [vmem:[%s2878_s6 + $0x68] sm:$0xff]  ;;  %v2962_v33 = vadd.s32 %v860_v30, %v859_v28  ;;  %v843_v42 = vadd.s32 %v2957_v29, %v826_v35  ;;  %v845_v49 = vadd.s32 %v2957_v29, %v828_v40  ;;  %v846_v52 = vadd.s32 %v2957_v29, %v829_v43 }
  0xb5   : > { %v643_v24 = vld [vmem:[%s2878_s6 + $0x70] sm:$0xff]  ;;  %v644_v25 = vld [vmem:[%s2878_s6 + $0x78] sm:$0xff]  ;;  %v847_v61 = vadd.s32 %v2957_v29, %v830_v50  ;;  %v848_v63 = vadd.s32 %v2957_v29, %v831_v53  ;;  %v849_v3 = vadd.s32 %v2957_v29, %v832_v57  ;;  %v850_v9 = vadd.s32 %v2957_v29, %v833_v0  ;;  %v1343_v50 = vld [vmem:[%s2882_s20] sm:$0xff] }
  0xb6   : > { %vm862_vm1 = vcmp.le.s32.totalorder %v2962_v33, %v841_v32  ;;  %vm865_vm2 = vcmp.le.s32.totalorder %v2962_v33, %v844_v37  ;;  %vm863_vm3 = vcmp.le.s32.totalorder %v2962_v33, %v842_v39  ;;  %vm864_vm4 = vcmp.le.s32.totalorder %v2962_v33, %v843_v42  ;;  %v3065_v0 = vld [vmem:[#allocation2] sm:$0xff] }
  0xb7   : > { %2201 = vmatpush3.bf16.xpose.msra.mxu0 %v2198_v55  ;;  %vm866_vm5 = vcmp.le.s32.totalorder %v2962_v33, %v845_v49  ;;  %vm867_vm6 = vcmp.le.s32.totalorder %v2962_v33, %v846_v52  ;;  %vm868_vm7 = vcmp.le.s32.totalorder %v2962_v33, %v847_v61  ;;  %vm869_vm8 = vcmp.le.s32.totalorder %v2962_v33, %v848_v63  ;;  %v1345_v52 = vld [vmem:[%s2882_s20 + $0x10] sm:$0xff] }
  0xb8   : > { %2203 = vmatprep.subr.bf16.mxu0 %v2202_v59  ;;  %vm870_vm9 = vcmp.le.s32.totalorder %v2962_v33, %v849_v3  ;;  %vm871_vm10 = vcmp.le.s32.totalorder %v2962_v33, %v850_v9  ;;  %v839_v34 = vadd.s32 120, %v2955_v27  ;;  %v1349_v61 = vld [vmem:[%s2882_s20 + $0x30] sm:$0xff]  ;;  %v1352_v9 = vld [vmem:[%s2882_s20 + $0x48] sm:$0xff] }
  0xbf   : > { %2205 = vmatpush3.bf16.xpose.msra.mxu0 %v2202_v59 }
  0xc0   : > { %2207 = vmatprep.subr.bf16.mxu0 %v2206_v62 }
  0xc7   : > { %2209 = vmatpush3.bf16.xpose.msra.mxu0 %v2206_v62 }
  0xc8   : > { %2211 = vmatprep.subr.bf16.mxu0 %v2210_v1 }
  0xcf   : > { %2213 = vmatpush3.bf16.xpose.msra.mxu0 %v2210_v1 }
  0xd0   : > { %2215 = vmatprep.subr.bf16.mxu0 %v2214_v4 }
  0xd7   : > { %2217 = vmatpush3.bf16.xpose.msra.mxu0 %v2214_v4 }
  0xd8   : > { %2219 = vmatprep.subr.bf16.mxu0 %v2218_v7 }
  0xdf   : > { %2221 = vmatpush3.bf16.xpose.msra.mxu0 %v2218_v7  ;;  %v834_v7 = vadd.s32 80, %v2955_v27 }
  0xe0   : > { %2223 = vmatprep.subr.bf16.mxu0 %v2222_v10 }
  0xe7   : > { %2225 = vmatpush3.bf16.xpose.msra.mxu0 %v2222_v10  ;;  %v835_v10 = vadd.s32 88, %v2955_v27 }
  0xee   : > { %2115 = vmatmul.mubr.f32.vlgmr.msra.gmra.mrb[0].mxu0 %v630_v11 }
  0xef   : > { %2117 = vmatprep.mubr.f32.mxu0 %v631_v12 }
  0xf2   : > { %2118 = vmatmul.mubr.f32.gmra.mrb[2].mxu0 %v632_v13 }
  0xf3   : > { %2120 = vmatprep.mubr.f32.mxu0 %v633_v14 }
  0xf6   : > { %2121 = vmatmul.mubr.f32.gmra.mrb[4].mxu0 %v634_v15 }
  0xf7   : > { %2123 = vmatprep.mubr.f32.mxu0 %v635_v16  ;;  %v851_v16 = vadd.s32 %v2957_v29, %v834_v7 }
  0xf9   : > { %vm872_vm11 = vcmp.le.s32.totalorder %v2962_v33, %v851_v16  ;;  %v3085_v16 = vld [vmem:[#allocation2 + $0x10] sm:$0xff] }
  0xfa   : > { %2124 = vmatmul.mubr.f32.gmra.mrb[6].mxu0 %v636_v17  ;;  %v836_v17 = vadd.s32 96, %v2955_v27 }
  0xfb   : > { %2126 = vmatprep.mubr.f32.mxu0 %v637_v18 }
  0xfc   : > { %v853_v30 = vadd.s32 %v2957_v29, %v836_v17  ;;  %v3089_v17 = vld [vmem:[#allocation2 + $0x20] sm:$0xff] }
  0xfe   : > { %2127 = vmatmul.mubr.f32.gmra.mrb[8].mxu0 %v638_v19  ;;  %v852_v19 = vadd.s32 %v2957_v29, %v835_v10  ;;  %vm874_vm13 = vcmp.le.s32.totalorder %v2962_v33, %v853_v30  ;;  %v3106_v30 = vld [vmem:[#allocation2 + $0x30] sm:$0xff] }
  0xff   : > { %2129 = vmatprep.mubr.f32.mxu0 %v639_v20  ;;  %v837_v20 = vadd.s32 104, %v2955_v27 }
 0x100   : > { %vm873_vm12 = vcmp.le.s32.totalorder %v2962_v33, %v852_v19  ;;  %v1353_v19 = vld [vmem:[%s2882_s20 + $0x50] sm:$0xff] }
 0x101   : > { %v854_v32 = vadd.s32 %v2957_v29, %v837_v20  ;;  %v1354_v20 = vld [vmem:[%s2882_s20 + $0x58] sm:$0xff] }
 0x102   : > { %2130 = vmatmul.mubr.f32.gmra.mrb[10].mxu0 %v640_v21 }
 0x103   : > { %2132 = vmatprep.mubr.f32.mxu0 %v641_v22  ;;  %vm875_vm14 = vcmp.le.s32.totalorder %v2962_v33, %v854_v32  ;;  %v1355_v32 = vld [vmem:[%s2882_s20 + $0x60] sm:$0xff] }
 0x106   : > { %2133 = vmatmul.mubr.f32.gmra.mrb[12].mxu0 %v642_v23  ;;  %v838_v23 = vadd.s32 112, %v2955_v27  ;;  %v856_v27 = vadd.s32 %v2957_v29, %v839_v34  ;;  %v1356_v34 = vld [vmem:[%s2882_s20 + $0x68] sm:$0xff] }
 0x107   : > { %2135 = vmatprep.mubr.f32.mxu0 %v643_v24  ;;  %v2606_v24 = vmov 0  }
 0x108   : > { %2384 = vset.pattern.permute.xlu0 %v2606_v24  ;;  %2385 = vset.pattern.permute.xlu1 %v2606_v24  ;;  %v855_v40 = vadd.s32 %v2957_v29, %v838_v23  ;;  %vm877_vm0 = vcmp.le.s32.totalorder %v2962_v33, %v856_v27  ;;  %v2246_v24 = vpack.c.bf16 %v1354_v20, %v1353_v19  ;;  %v3120_v27 = vld [vmem:[#allocation2 + $0x40] sm:$0xff] }
 0x10a   : > { %2136 = vmatmul.mubr.f32.gmra.mrb[14].mxu0 %v644_v25  ;;  %vm876_vm15 = vcmp.le.s32.totalorder %v2962_v33, %v855_v40  ;;  %v1347_v33 = vld [vmem:[%s2882_s20 + $0x20] sm:$0xff]  ;;  %v3114_v40 = vld [vmem:[#allocation2 + $0x38] sm:$0xff] }
 0x1c1   : > { %v2116_v36 = vpop.f32.mrb[0].mxu0 }
 0x1c2   : > { %v727_v38 = vpop.f32.mrb[1].mxu0  ;;  %v807_v44 = vmul.f32 0.088388346, %v2116_v36 }
 0x1c3   : > { %v806_v41 = vmul.f32 0.088388346, %v727_v38 }
 0x1c4   : > { %v2985_v55 = vsel %vm863_vm3, %v807_v44, -1e+30 }
 0x1c5   : > { %v2119_v45 = vpop.f32.mrb[2].mxu0  ;;  %v2972_v46 = vsel %vm862_vm1, %v806_v41, -1e+30  ;;  %vm1214_vm1 = vcmask 7168  }
 0x1c6   : > { %v809_v47 = vmul.f32 0.088388346, %v2119_v45  ;;  %910 = vmax.xlane.f32.xlu0 %v2972_v46  ;;  %v737_v48 = vpop.f32.mrb[3].mxu0 }
 0x1c7   : > { %v808_v51 = vmul.f32 0.088388346, %v737_v48 }
 0x1c8   : > { %v2982_v54 = vsel %vm865_vm2, %v809_v47, -1e+30 }
 0x1c9   : > { %916 = vmax.xlane.f32.xlu1 %v2982_v54  ;;  %v2122_v56 = vpop.f32.mrb[4].mxu0  ;;  %v2989_v58 = vsel %vm864_vm4, %v808_v51, -1e+30  ;;  %v1344_v51 = vld [vmem:[%s2882_s20 + $0x8] sm:$0xff] }
 0x1ca   : > { %912 = vmax.xlane.f32.xlu0 %v2985_v55  ;;  %v811_v59 = vmul.f32 0.088388346, %v2122_v56  ;;  %v747_v60 = vpop.f32.mrb[5].mxu0  ;;  %v2226_v53 = vpack.c.bf16 %v1344_v51, %v1343_v50  ;;  %v1346_v56 = vld [vmem:[%s2882_s20 + $0x18] sm:$0xff] }
 0x1cb   : > { %v810_v62 = vmul.f32 0.088388346, %v747_v60  ;;  %v2230_v57 = vpack.c.bf16 %v1346_v56, %v1345_v52  ;;  %v903_v52 = vld [vmem:[#allocation2 + $0x48] sm:$0xff]  ;;  %v3132_v56 = vld [vmem:[#allocation2 + $0x50] sm:$0xff] }
 0x1cc   : > { %v3000_v4 = vsel %vm867_vm6, %v811_v59, -1e+30  ;;  %v1348_v59 = vld [vmem:[%s2882_s20 + $0x28] sm:$0xff]  ;;  %2227 = vmatprep.subr.bf16.mxu1 %v2226_v53 }
 0x1cd   : > { %914 = vmax.xlane.f32.xlu1 %v2989_v58  ;;  %v2125_v1 = vpop.f32.mrb[6].mxu0  ;;  %v2997_v2 = vsel %vm866_vm5, %v810_v62, -1e+30  ;;  %2229 = vmatpush3.bf16.msra.mxu1 %v2226_v53  ;;  %v2234_v60 = vpack.c.bf16 %v1348_v59, %v1347_v33  ;;  %v1350_v62 = vld [vmem:[%s2882_s20 + $0x38] sm:$0xff] }
 0x1ce   : > { %v813_v5 = vmul.f32 0.088388346, %v2125_v1  ;;  %v757_v6 = vpop.f32.mrb[7].mxu0  ;;  %918 = vmax.xlane.f32.xlu0 %v2997_v2  ;;  %2231 = vmatprep.subr.bf16.mxu1 %v2230_v57  ;;  %v2238_v63 = vpack.c.bf16 %v1350_v62, %v1349_v61  ;;  %v905_v61 = vld [vmem:[#allocation2 + $0x58] sm:$0xff] }
 0x1cf   : > { %v812_v8 = vmul.f32 0.088388346, %v757_v6  ;;  %v3072_v6 = vld [vmem:[#allocation2 + $0x8] sm:$0xff] }
 0x1d0   : > { %v3012_v13 = vsel %vm869_vm8, %v813_v5, -1e+30  ;;  %v3070_v5 = vld [vmem:[#allocation2 + $0x18] sm:$0xff] }
 0x1d1   : > { %920 = vmax.xlane.f32.xlu1 %v3000_v4  ;;  %v2128_v11 = vpop.f32.mrb[8].mxu0  ;;  %v3009_v12 = vsel %vm868_vm7, %v812_v8, -1e+30  ;;  %2233 = vmatpush3.bf16.msra.mxu1 %v2230_v57  ;;  %v1351_v8 = vld [vmem:[%s2882_s20 + $0x40] sm:$0xff] }
 0x1d2   : > { %v815_v14 = vmul.f32 0.088388346, %v2128_v11  ;;  %v767_v15 = vpop.f32.mrb[9].mxu0  ;;  %922 = vmax.xlane.f32.xlu0 %v3009_v12  ;;  %2235 = vmatprep.subr.bf16.mxu1 %v2234_v60 }
 0x1d3   : > { %v814_v18 = vmul.f32 0.088388346, %v767_v15 }
 0x1d4   : > { %v3024_v25 = vsel %vm871_vm10, %v815_v14, -1e+30  ;;  %v2242_v14 = vpack.c.bf16 %v1352_v9, %v1351_v8  ;;  %v907_v9 = vld [vmem:[#allocation2 + $0x68] sm:$0xff] }
 0x1d5   : > { %924 = vmax.xlane.f32.xlu1 %v3012_v13  ;;  %v2131_v21 = vpop.f32.mrb[10].mxu0  ;;  %v3021_v22 = vsel %vm870_vm9, %v814_v18, -1e+30  ;;  %2237 = vmatpush3.bf16.msra.mxu1 %v2234_v60 }
 0x1d6   : > { %v817_v26 = vmul.f32 0.088388346, %v2131_v21  ;;  %v777_v28 = vpop.f32.mrb[11].mxu0  ;;  %926 = vmax.xlane.f32.xlu0 %v3021_v22  ;;  %2239 = vmatprep.subr.bf16.mxu1 %v2238_v63 }
 0x1d7   : > { %v816_v31 = vmul.f32 0.088388346, %v777_v28 }
 0x1d8   : > { %v3035_v37 = vsel %vm873_vm12, %v817_v26, -1e+30  ;;  %v3099_v26 = vld [vmem:[#allocation2 + $0x28] sm:$0xff] }
 0x1d9   : > { %928 = vmax.xlane.f32.xlu1 %v3024_v25  ;;  %v2134_v35 = vpop.f32.mrb[12].mxu0  ;;  %v3033_v36 = vsel %vm872_vm11, %v816_v31, -1e+30  ;;  %2241 = vmatpush3.bf16.msra.mxu1 %v2238_v63  ;;  %v3142_v63 = vld [vmem:[#allocation2 + $0x60] sm:$0xff] }
 0x1da   : > { %v819_v38 = vmul.f32 0.088388346, %v2134_v35  ;;  %v787_v39 = vpop.f32.mrb[13].mxu0  ;;  %930 = vmax.xlane.f32.xlu0 %v3033_v36  ;;  %2243 = vmatprep.subr.bf16.mxu1 %v2242_v14 }
 0x1db   : > { %v818_v41 = vmul.f32 0.088388346, %v787_v39  ;;  %v2250_v39 = vpack.c.bf16 %v1356_v34, %v1355_v32 }
 0x1dc   : > { %v3045_v44 = vsel %vm875_vm14, %v819_v38, -1e+30 }
 0x1dd   : > { %932 = vmax.xlane.f32.xlu1 %v3035_v37  ;;  %v2137_v42 = vpop.f32.mrb[14].mxu0  ;;  %v3043_v43 = vsel %vm874_vm13, %v818_v41, -1e+30  ;;  %2245 = vmatpush3.bf16.msra.mxu1 %v2242_v14  ;;  %v3153_v14 = vld [vmem:[#allocation2 + $0x70] sm:$0xff] }
 0x1de   : > { %v821_v45 = vmul.f32 0.088388346, %v2137_v42  ;;  %934 = vmax.xlane.f32.xlu0 %v3043_v43  ;;  %v797_v47 = vpop.f32.mrb[15].mxu0  ;;  %2247 = vmatprep.subr.bf16.mxu1 %v2246_v24 }
 0x1df   : > { %v820_v29 = vmul.f32 0.088388346, %v797_v47  ;;  %v1358_v47 = vld [vmem:[%s2882_s20 + $0x78] sm:$0xff] }
 0x1e0   : > { %v3053_v49 = vsel %vm877_vm0, %v821_v45, -1e+30  ;;  %v1357_v45 = vld [vmem:[%s2882_s20 + $0x70] sm:$0xff] }
 0x1e1   : > { %936 = vmax.xlane.f32.xlu1 %v3045_v44  ;;  %v3051_v48 = vsel %vm876_vm15, %v820_v29, -1e+30  ;;  %2249 = vmatpush3.bf16.msra.mxu1 %v2246_v24  ;;  %v2254_v51 = vpack.c.bf16 %v1358_v47, %v1357_v45 }
 0x1e2   : > { %938 = vmax.xlane.f32.xlu0 %v3051_v48  ;;  %2251 = vmatprep.subr.bf16.mxu1 %v2250_v39 }
 0x1e5   : > { %940 = vmax.xlane.f32.xlu1 %v3053_v49  ;;  %2253 = vmatpush3.bf16.msra.mxu1 %v2250_v39 }
 0x1e6   : > { %2255 = vmatprep.subr.bf16.mxu1 %v2254_v51 }
 0x1e9   : > { %2257 = vmatpush3.bf16.msra.mxu1 %v2254_v51 }
 0x253   : > { %v911_v1 = vpop.xlane.xlu0 %910 }
 0x254   : > { %v3068_v3 = vmax.f32 %v3065_v0, %v911_v1 }
 0x256   : > { %1536 = vst.msk [vmem:[#allocation2] sm:$0xff] %vm1214_vm1, %v3068_v3  ;;  %v917_v7 = vpop.xlane.xlu1 %916  ;;  %1008 = vperm.xlu0 %2384, %v3068_v3   ;;  %v958_v57 = vsub.f32 %v3065_v0, %v3068_v3 }
 0x257   : > { %v3080_v10 = vmax.f32 %v3070_v5, %v917_v7  ;;  %v913_v11 = vpop.xlane.xlu0 %912 }
 0x258   : > { %v3083_v15 = vmax.f32 %v3072_v6, %v913_v11  ;;  %v974_v1 = vmul.f32 1.442695, %v958_v57 }
 0x259   : > { %1539 = vst.msk [vmem:[#allocation2 + $0x18] sm:$0xff] %vm1214_vm1, %v3080_v10  ;;  %v961_v0 = vsub.f32 %v3070_v5, %v3080_v10 }
 0x25a   : > { %1537 = vst.msk [vmem:[#allocation2 + $0x8] sm:$0xff] %vm1214_vm1, %v3083_v15  ;;  %v915_v18 = vpop.xlane.xlu1 %914  ;;  %1013 = vperm.xlu1 %2385, %v3083_v15   ;;  %2386 = vpow2.f32 %v974_v1 }
 0x25b   : > { %v3097_v21 = vmax.f32 %v3085_v16, %v915_v18  ;;  %v919_v23 = vpop.xlane.xlu0 %918  ;;  %v980_v18 = vmul.f32 1.442695, %v961_v0 }
 0x25c   : > { %v3102_v28 = vmax.f32 %v3089_v17, %v919_v23  ;;  %v3158_v23 = vld [vmem:[#allocation2 + $0x78] sm:$0xff] }
 0x25d   : > { %1538 = vst.msk [vmem:[#allocation2 + $0x10] sm:$0xff] %vm1214_vm1, %v3097_v21  ;;  %2388 = vpow2.f32 %v980_v18 }
 0x25e   : > { %v921_v31 = vpop.xlane.xlu1 %920  ;;  %1023 = vperm.xlu1 %2385, %v3080_v10   ;;  %1540 = vst.msk [vmem:[#allocation2 + $0x20] sm:$0xff] %vm1214_vm1, %v3102_v28  ;;  %v962_v51 = vsub.f32 %v3089_v17, %v3102_v28 }
 0x25f   : > { %v947_v35 = vmax.f32 %v3099_v26, %v921_v31  ;;  %v923_v38 = vpop.xlane.xlu0 %922 }
 0x260   : > { %v3117_v41 = vmax.f32 %v3106_v30, %v923_v38  ;;  %v982_v57 = vmul.f32 1.442695, %v962_v51 }
 0x261   : > { %1541 = vst.msk [vmem:[#allocation2 + $0x28] sm:$0xff] %vm1214_vm1, %v947_v35  ;;  %v963_v5 = vsub.f32 %v3099_v26, %v947_v35 }
 0x262   : > { %v925_v42 = vpop.xlane.xlu1 %924  ;;  %1018 = vperm.xlu1 %2385, %v3097_v21   ;;  %1542 = vst.msk [vmem:[#allocation2 + $0x30] sm:$0xff] %vm1214_vm1, %v3117_v41 }
 0x263   : > { %v949_v29 = vmax.f32 %v3114_v40, %v925_v42  ;;  %v927_v50 = vpop.xlane.xlu0 %926  ;;  %v984_v31 = vmul.f32 1.442695, %v963_v5 }
 0x264   : > { %v3129_v53 = vmax.f32 %v3120_v27, %v927_v50 }
 0x265   : > { %1543 = vst.msk [vmem:[#allocation2 + $0x38] sm:$0xff] %vm1214_vm1, %v949_v29  ;;  %v965_v32 = vsub.f32 %v3114_v40, %v949_v29  ;;  %2390 = vpow2.f32 %v984_v31 }
 0x266   : > { %v929_v33 = vpop.xlane.xlu1 %928  ;;  %1033 = vperm.xlu1 %2385, %v947_v35   ;;  %1544 = vst.msk [vmem:[#allocation2 + $0x40] sm:$0xff] %vm1214_vm1, %v3129_v53  ;;  %v959_v35 = vsub.f32 %v3072_v6, %v3083_v15  ;;  %v960_v6 = vsub.f32 %v3085_v16, %v3097_v21  ;;  %v3183_v15 = vpop.eup %2386 }
 0x267   : > { %v951_v59 = vmax.f32 %v903_v52, %v929_v33  ;;  %v931_v60 = vpop.xlane.xlu0 %930  ;;  %v988_v40 = vmul.f32 1.442695, %v965_v32  ;;  %v964_v33 = vsub.f32 %v3106_v30, %v3117_v41 }
 0x268   : > { %v3139_v62 = vmax.f32 %v3132_v56, %v931_v60  ;;  %v976_v45 = vmul.f32 1.442695, %v959_v35  ;;  %v978_v50 = vmul.f32 1.442695, %v960_v6  ;;  %v966_v60 = vsub.f32 %v3120_v27, %v3129_v53 }
 0x269   : > { %1545 = vst.msk [vmem:[#allocation2 + $0x48] sm:$0xff] %vm1214_vm1, %v951_v59  ;;  %1053 = vperm.xlu0 %2384, %v951_v59   ;;  %v967_v42 = vsub.f32 %v903_v52, %v951_v59  ;;  %2392 = vpow2.f32 %v988_v40  ;;  %v3189_v52 = vpop.eup %2388 }
 0x26a   : > { %v933_v3 = vpop.xlane.xlu1 %932  ;;  %1028 = vperm.xlu1 %2385, %v3102_v28   ;;  %1546 = vst.msk [vmem:[#allocation2 + $0x50] sm:$0xff] %vm1214_vm1, %v3139_v62  ;;  %2394 = vpow2.f32 %v976_v45  ;;  %v986_v28 = vmul.f32 1.442695, %v964_v33  ;;  %v990_v30 = vmul.f32 1.442695, %v966_v60 }
 0x26b   : > { %v953_v7 = vmax.f32 %v905_v61, %v933_v3  ;;  %v935_v8 = vpop.xlane.xlu0 %934  ;;  %v992_v47 = vmul.f32 1.442695, %v967_v42 }
 0x26c   : > { %v3150_v11 = vmax.f32 %v3142_v63, %v935_v8 }
 0x26d   : > { %1547 = vst.msk [vmem:[#allocation2 + $0x58] sm:$0xff] %vm1214_vm1, %v953_v7  ;;  %1063 = vperm.xlu0 %2384, %v953_v7   ;;  %2396 = vpow2.f32 %v992_v47 }
 0x26e   : > { %v937_v10 = vpop.xlane.xlu1 %936  ;;  %1043 = vperm.xlu1 %2385, %v949_v29   ;;  %1548 = vst.msk [vmem:[#allocation2 + $0x60] sm:$0xff] %vm1214_vm1, %v3150_v11  ;;  %v969_v29 = vsub.f32 %v905_v61, %v953_v7  ;;  %2398 = vpow2.f32 %v978_v50 }
 0x26f   : > { %v955_v19 = vmax.f32 %v907_v9, %v937_v10  ;;  %v939_v20 = vpop.xlane.xlu0 %938  ;;  %v3195_v59 = vpop.eup %2390 }
 0x270   : > { %v3161_v24 = vmax.f32 %v3153_v14, %v939_v20  ;;  %v996_v16 = vmul.f32 1.442695, %v969_v29 }
 0x271   : > { %1549 = vst.msk [vmem:[#allocation2 + $0x68] sm:$0xff] %vm1214_vm1, %v955_v19  ;;  %1073 = vperm.xlu0 %2384, %v955_v19   ;;  %v971_v21 = vsub.f32 %v907_v9, %v955_v19 }
 0x272   : > { %1038 = vperm.xlu1 %2385, %v3117_v41   ;;  %v941_v26 = vpop.xlane.xlu1 %940  ;;  %v972_v34 = vsub.f32 %v3153_v14, %v3161_v24  ;;  %1550 = vst.msk [vmem:[#allocation2 + $0x70] sm:$0xff] %vm1214_vm1, %v3161_v24  ;;  %2400 = vpow2.f32 %v996_v16  ;;  %v968_v41 = vsub.f32 %v3132_v56, %v3139_v62 }
 0x273   : > { %v3173_v38 = vmax.f32 %v3158_v23, %v941_v26  ;;  %v1000_v17 = vmul.f32 1.442695, %v971_v21  ;;  %2402 = vpow2.f32 %v982_v57  ;;  %v3201_v61 = vpop.eup %2392 }
 0x274   : > { %v3203_v1 = vpop.eup %2394  ;;  %v994_v27 = vmul.f32 1.442695, %v968_v41 }
 0x275   : > { %v973_v39 = vsub.f32 %v3158_v23, %v3173_v38  ;;  %1551 = vst.msk [vmem:[#allocation2 + $0x78] sm:$0xff] %vm1214_vm1, %v3173_v38  ;;  %1083 = vperm.xlu0 %2384, %v3173_v38   ;;  %2404 = vpow2.f32 %v1000_v17 }
 0x276   : > { %1048 = vperm.xlu1 %2385, %v3129_v53   ;;  %2406 = vpow2.f32 %v986_v28  ;;  %v970_v53 = vsub.f32 %v3142_v63, %v3150_v11 }
 0x277   : > { %v3209_v0 = vpop.eup %2396  ;;  %2408 = vpow2.f32 %v990_v30 }
 0x278   : > { %v3211_v3 = vpop.eup %2398  ;;  %2410 = vpow2.f32 %v994_v27  ;;  %v998_v56 = vmul.f32 1.442695, %v970_v53 }
 0x279   : > { %1249 = vperm.xlu0 %2384, %v3183_v15  }
 0x27a   : > { %1058 = vperm.xlu1 %2385, %v3139_v62   ;;  %2412 = vpow2.f32 %v998_v56 }
 0x27c   : > { %v3217_v7 = vpop.eup %2400 }
 0x27d   : > { %1264 = vperm.xlu0 %2384, %v3189_v52   ;;  %v3219_v8 = vpop.eup %2402 }
 0x27e   : > { %1068 = vperm.xlu1 %2385, %v3150_v11  }
 0x27f   : > { %v3223_v62 = vpop.eup %2404 }
 0x280   : > { %v3225_v9 = vpop.eup %2406 }
 0x281   : > { %1274 = vperm.xlu0 %2384, %v3195_v59   ;;  %v3229_v63 = vpop.eup %2408 }
 0x282   : > { %1078 = vperm.xlu1 %2385, %v3161_v24   ;;  %v3232_v11 = vpop.eup %2410 }
 0x284   : > { %v3235_v18 = vpop.eup %2412 }
 0x285   : > { %1284 = vperm.xlu0 %2384, %v3201_v61  }
 0x286   : > { %1254 = vperm.xlu1 %2385, %v3203_v1  }
 0x289   : > { %1294 = vperm.xlu0 %2384, %v3209_v0  }
 0x28a   : > { %1259 = vperm.xlu1 %2385, %v3211_v3  }
 0x28d   : > { %1304 = vperm.xlu0 %2384, %v3217_v7  }
 0x28e   : > { %1269 = vperm.xlu1 %2385, %v3219_v8  }
 0x291   : > { %1314 = vperm.xlu0 %2384, %v3223_v62  }
 0x292   : > { %1279 = vperm.xlu1 %2385, %v3225_v9  }
 0x296   : > { %1289 = vperm.xlu1 %2385, %v3229_v63  }
 0x29a   : > { %1299 = vperm.xlu1 %2385, %v3232_v11  }
 0x29e   : > { %1309 = vperm.xlu1 %2385, %v3235_v18  }
 0x2d5   : > { %v1009_v5 = vpop.permute.xlu0 %1008 }
 0x2d6   : > { %v1086_v10 = vsub.f32 %v2972_v46, %v1009_v5 }
 0x2d8   : > { %v1102_v19 = vmul.f32 1.442695, %v1086_v10 }
 0x2d9   : > { %v1014_v20 = vpop.permute.xlu1 %1013 }
 0x2da   : > { %2414 = vpow2.f32 %v1102_v19  ;;  %v1087_v31 = vsub.f32 %v2985_v55, %v1014_v20 }
 0x2dc   : > { %v1104_v32 = vmul.f32 1.442695, %v1087_v31 }
 0x2dd   : > { %v1024_v26 = vpop.permute.xlu1 %1023 }
 0x2de   : > { %2416 = vpow2.f32 %v1104_v32  ;;  %v1089_v35 = vsub.f32 %v2982_v54, %v1024_v26 }
 0x2e0   : > { %v1108_v40 = vmul.f32 1.442695, %v1089_v35 }
 0x2e1   : > { %v1019_v42 = vpop.permute.xlu1 %1018 }
 0x2e2   : > { %2418 = vpow2.f32 %v1108_v40  ;;  %v1088_v45 = vsub.f32 %v2989_v58, %v1019_v42 }
 0x2e4   : > { %v2415_v6 = vpop.eup %2414  ;;  %v1106_v47 = vmul.f32 1.442695, %v1088_v45 }
 0x2e5   : > { %v1034_v29 = vpop.permute.xlu1 %1033  ;;  %1166 = vadd.xlane.f32.xlu1 %v2415_v6  ;;  %2170 = vmatprep.mubr.f32.mxu1 %v2415_v6 }
 0x2e6   : > { %2420 = vpow2.f32 %v1106_v47  ;;  %v1091_v46 = vsub.f32 %v3000_v4, %v1034_v29 }
 0x2e8   : > { %v2417_v50 = vpop.eup %2416  ;;  %v1112_v55 = vmul.f32 1.442695, %v1091_v46  ;;  %v1054_v51 = vpop.permute.xlu0 %1053 }
 0x2e9   : > { %v1029_v16 = vpop.permute.xlu1 %1028  ;;  %1168 = vadd.xlane.f32.xlu0 %v2417_v50  ;;  %2171 = vmatmul.mubr.f32.vlgmr.msra.gmra.mrb[0].mxu1 %v2417_v50  ;;  %v1095_v28 = vsub.f32 %v3024_v25, %v1054_v51 }
 0x2ea   : > { %2422 = vpow2.f32 %v1112_v55  ;;  %v1090_v54 = vsub.f32 %v2997_v2, %v1029_v16 }
 0x2eb   : > { %v1120_v2 = vmul.f32 1.442695, %v1095_v28 }
 0x2ec   : > { %v2419_v21 = vpop.eup %2418  ;;  %v1110_v57 = vmul.f32 1.442695, %v1090_v54  ;;  %v1064_v58 = vpop.permute.xlu0 %1063 }
 0x2ed   : > { %v1044_v33 = vpop.permute.xlu1 %1043  ;;  %1172 = vadd.xlane.f32.xlu1 %v2419_v21  ;;  %v1097_v53 = vsub.f32 %v3035_v37, %v1064_v58 }
 0x2ee   : > { %2424 = vpow2.f32 %v1110_v57  ;;  %v1093_v17 = vsub.f32 %v3012_v13, %v1044_v33  ;;  %v1004_v57 = vmul.f32 1.442695, %v973_v39 }
 0x2ef   : > { %v1124_v25 = vmul.f32 1.442695, %v1097_v53 }
 0x2f0   : > { %v2421_v4 = vpop.eup %2420  ;;  %v1116_v60 = vmul.f32 1.442695, %v1093_v17  ;;  %v1074_v41 = vpop.permute.xlu0 %1073 }
 0x2f1   : > { %v1039_v30 = vpop.permute.xlu1 %1038  ;;  %1170 = vadd.xlane.f32.xlu0 %v2421_v4  ;;  %2173 = vmatprep.mubr.f32.mxu1 %v2421_v4  ;;  %v1099_v19 = vsub.f32 %v3045_v44, %v1074_v41 }
 0x2f2   : > { %2426 = vpow2.f32 %v1116_v60  ;;  %v1092_v27 = vsub.f32 %v3009_v12, %v1039_v30  ;;  %2174 = vmatmul.mubr.f32.gmra.mrb[2].mxu1 %v2419_v21  ;;  %v1002_v21 = vmul.f32 1.442695, %v972_v34 }
 0x2f3   : > { %v1128_v37 = vmul.f32 1.442695, %v1099_v19 }
 0x2f4   : > { %v2423_v56 = vpop.eup %2422  ;;  %v1114_v5 = vmul.f32 1.442695, %v1092_v27  ;;  %v1084_v31 = vpop.permute.xlu0 %1083 }
 0x2f5   : > { %v1049_v10 = vpop.permute.xlu1 %1048  ;;  %1176 = vadd.xlane.f32.xlu1 %v2423_v56  ;;  %v1101_v35 = vsub.f32 %v3053_v49, %v1084_v31 }
 0x2f6   : > { %2428 = vpow2.f32 %v1114_v5  ;;  %v1094_v13 = vsub.f32 %v3021_v22, %v1049_v10  ;;  %v1135_v10 = vld [vmem:[#allocation3 + $0x8] sm:$0xff] }
 0x2f7   : > { %2430 = vpow2.f32 %v1120_v2  ;;  %v1132_v45 = vmul.f32 1.442695, %v1101_v35  ;;  %v1134_v2 = vld [vmem:[#allocation3] sm:$0xff] }
 0x2f8   : > { %v2425_v20 = vpop.eup %2424  ;;  %v1118_v32 = vmul.f32 1.442695, %v1094_v13  ;;  %v3268_v14 = vpop.permute.xlu0 %1249  ;;  %v1150_v53 = vmul.f32 %v3183_v15, %v1134_v2  ;;  %v1144_v2 = vld [vmem:[#allocation3 + $0x50] sm:$0xff] }
 0x2f9   : > { %v1059_v26 = vpop.permute.xlu1 %1058  ;;  %1174 = vadd.xlane.f32.xlu0 %v2425_v20  ;;  %2176 = vmatprep.mubr.f32.mxu1 %v2425_v20  ;;  %v1137_v20 = vld [vmem:[#allocation3 + $0x18] sm:$0xff] }
 0x2fa   : > { %2432 = vpow2.f32 %v1118_v32  ;;  %v1096_v12 = vsub.f32 %v3033_v36, %v1059_v26  ;;  %2177 = vmatmul.mubr.f32.gmra.mrb[4].mxu1 %v2423_v56  ;;  %v1153_v32 = vmul.f32 %v3189_v52, %v1137_v20 }
 0x2fb   : > { %2434 = vpow2.f32 %v1124_v25  ;;  %v1151_v25 = vmul.f32 %v3203_v1, %v1135_v10  ;;  %v1160_v10 = vmul.f32 %v3232_v11, %v1144_v2  ;;  %v1148_v11 = vld [vmem:[#allocation3 + $0x70] sm:$0xff] }
 0x2fc   : > { %v2427_v40 = vpop.eup %2426  ;;  %v1122_v22 = vmul.f32 1.442695, %v1096_v12  ;;  %v3272_v34 = vpop.permute.xlu0 %1264  ;;  %v1136_v12 = vld [vmem:[#allocation3 + $0x10] sm:$0xff] }
 0x2fd   : > { %v1069_v42 = vpop.permute.xlu1 %1068  ;;  %1180 = vadd.xlane.f32.xlu1 %v2427_v40  ;;  %v1152_v15 = vmul.f32 %v3211_v3, %v1136_v12 }
 0x2fe   : > { %2436 = vpow2.f32 %v1122_v22  ;;  %v1098_v44 = vsub.f32 %v3043_v43, %v1069_v42 }
 0x2ff   : > { %2438 = vpow2.f32 %v1128_v37 }
 0x300   : > { %v2429_v6 = vpop.eup %2428  ;;  %v1126_v47 = vmul.f32 1.442695, %v1098_v44  ;;  %v3276_v23 = vpop.permute.xlu0 %1274  ;;  %v1138_v44 = vld [vmem:[#allocation3 + $0x20] sm:$0xff] }
 0x301   : > { %v2431_v29 = vpop.eup %2430  ;;  %1178 = vadd.xlane.f32.xlu0 %v2429_v6  ;;  %v1079_v46 = vpop.permute.xlu1 %1078  ;;  %2179 = vmatprep.mubr.f32.mxu1 %v2429_v6  ;;  %v1154_v52 = vmul.f32 %v3219_v8, %v1138_v44 }
 0x302   : > { %2440 = vpow2.f32 %v1126_v47  ;;  %v1100_v36 = vsub.f32 %v3051_v48, %v1079_v46  ;;  %1184 = vadd.xlane.f32.xlu1 %v2431_v29  ;;  %2180 = vmatmul.mubr.f32.gmra.mrb[6].mxu1 %v2427_v40  ;;  %v1139_v40 = vld [vmem:[#allocation3 + $0x28] sm:$0xff]  ;;  %v1141_v47 = vld [vmem:[#allocation3 + $0x38] sm:$0xff] }
 0x303   : > { %2442 = vpow2.f32 %v1132_v45  ;;  %v1155_v1 = vmul.f32 %v3195_v59, %v1139_v40  ;;  %v1157_v3 = vmul.f32 %v3201_v61, %v1141_v47  ;;  %v1234_v47 = vld [vmem:[#allocation4 + $0x18] sm:$0xff] }
 0x304   : > { %v2433_v49 = vpop.eup %2432  ;;  %v1130_v50 = vmul.f32 1.442695, %v1100_v36  ;;  %v3280_v39 = vpop.permute.xlu0 %1284  ;;  %v1140_v36 = vld [vmem:[#allocation3 + $0x30] sm:$0xff] }
 0x305   : > { %v2435_v55 = vpop.eup %2434  ;;  %1182 = vadd.xlane.f32.xlu0 %v2433_v49  ;;  %2182 = vmatprep.mubr.f32.mxu1 %v2433_v49  ;;  %v3266_v17 = vpop.permute.xlu1 %1254  ;;  %v1156_v59 = vmul.f32 %v3225_v9, %v1140_v36 }
 0x306   : > { %2444 = vpow2.f32 %v1130_v50  ;;  %1188 = vadd.xlane.f32.xlu1 %v2435_v55  ;;  %2183 = vmatmul.mubr.f32.gmra.mrb[8].mxu1 %v2431_v29  ;;  %v1143_v50 = vld [vmem:[#allocation3 + $0x48] sm:$0xff] }
 0x307   : > { %2446 = vpow2.f32 %v1002_v21 }
 0x308   : > { %v2437_v43 = vpop.eup %2436  ;;  %2448 = vpow2.f32 %v1004_v57  ;;  %v3284_v60 = vpop.permute.xlu0 %1294 }
 0x309   : > { %v2439_v51 = vpop.eup %2438  ;;  %1186 = vadd.xlane.f32.xlu0 %v2437_v43  ;;  %2185 = vmatprep.mubr.f32.mxu1 %v2437_v43  ;;  %v3270_v24 = vpop.permute.xlu1 %1259 }
 0x30a   : > { %1192 = vadd.xlane.f32.xlu1 %v2439_v51  ;;  %2186 = vmatmul.mubr.f32.gmra.mrb[10].mxu1 %v2435_v55  ;;  %v1159_v55 = vmul.f32 %v3209_v0, %v1143_v50 }
 0x30c   : > { %v2441_v16 = vpop.eup %2440  ;;  %v3288_v41 = vpop.permute.xlu0 %1304 }
 0x30d   : > { %v2443_v54 = vpop.eup %2442  ;;  %1190 = vadd.xlane.f32.xlu0 %v2441_v16  ;;  %2188 = vmatprep.mubr.f32.mxu1 %v2441_v16  ;;  %v3274_v28 = vpop.permute.xlu1 %1269 }
 0x30e   : > { %1196 = vadd.xlane.f32.xlu1 %v2443_v54  ;;  %2189 = vmatmul.mubr.f32.gmra.mrb[12].mxu1 %v2439_v51  ;;  %v1142_v51 = vld [vmem:[#allocation3 + $0x40] sm:$0xff] }
 0x30f   : > { %v1158_v61 = vmul.f32 %v3229_v63, %v1142_v51  ;;  %v1146_v63 = vld [vmem:[#allocation3 + $0x60] sm:$0xff] }
 0x310   : > { %v2445_v48 = vpop.eup %2444  ;;  %v3293_v56 = vpop.permute.xlu0 %1314 }
 0x311   : > { %1194 = vadd.xlane.f32.xlu0 %v2445_v48  ;;  %2191 = vmatprep.mubr.f32.mxu1 %v2445_v48  ;;  %v3260_v58 = vpop.eup %2446  ;;  %v3278_v38 = vpop.permute.xlu1 %1279 }
 0x312   : > { %2192 = vmatmul.mubr.f32.gmra.mrb[14].mxu1 %v2443_v54  ;;  %v3263_v33 = vpop.eup %2448  ;;  %v1145_v54 = vld [vmem:[#allocation3 + $0x58] sm:$0xff] }
 0x313   : > { %v1161_v21 = vmul.f32 %v3217_v7, %v1145_v54 }
 0x315   : > { %v3282_v4 = vpop.permute.xlu1 %1289 }
 0x319   : > { %v3286_v30 = vpop.permute.xlu1 %1299 }
 0x31d   : > { %v3290_v27 = vpop.permute.xlu1 %1309 }
 0x31f   : > { %1319 = vperm.xlu1 %2385, %v3260_v58  }
 0x327   : > { %1324 = vperm.xlu0 %2384, %v3263_v33  }
 0x372   : > { %v1167_v5 = vpop.xlane.xlu1 %1166 }
 0x373   : > { %v1198_v13 = vadd.f32 %v1167_v5, %v1150_v53  ;;  %v1147_v5 = vld [vmem:[#allocation3 + $0x68] sm:$0xff] }
 0x375   : > { %1215 = vst.msk [vmem:[#allocation3] sm:$0xff] %vm1214_vm1, %v1198_v13  ;;  %v1163_v13 = vmul.f32 %v3223_v62, %v1147_v5  ;;  %v1164_v62 = vmul.f32 %v3260_v58, %v1148_v11  ;;  %v1233_v58 = vld [vmem:[#allocation4 + $0x10] sm:$0xff] }
 0x376   : > { %v1169_v19 = vpop.xlane.xlu0 %1168 }
 0x377   : > { %v1199_v31 = vadd.f32 %v1169_v19, %v1151_v25 }
 0x379   : > { %1216 = vst.msk [vmem:[#allocation3 + $0x8] sm:$0xff] %vm1214_vm1, %v1199_v31  ;;  %v1149_v31 = vld [vmem:[#allocation3 + $0x78] sm:$0xff] }
 0x37a   : > { %v1173_v26 = vpop.xlane.xlu1 %1172 }
 0x37b   : > { %v1201_v37 = vadd.f32 %v1173_v26, %v1153_v32  ;;  %v1162_v32 = vmul.f32 %v3235_v18, %v1146_v63  ;;  %v1165_v26 = vmul.f32 %v3263_v33, %v1149_v31  ;;  %v1232_v18 = vld [vmem:[#allocation4 + $0x8] sm:$0xff]  ;;  %v1243_v31 = vld [vmem:[#allocation4 + $0x60] sm:$0xff] }
 0x37d   : > { %1218 = vst.msk [vmem:[#allocation3 + $0x18] sm:$0xff] %vm1214_vm1, %v1201_v37 }
 0x37e   : > { %v1171_v35 = vpop.xlane.xlu0 %1170 }
 0x37f   : > { %v1200_v22 = vadd.f32 %v1171_v35, %v1152_v15 }
 0x381   : > { %1217 = vst.msk [vmem:[#allocation3 + $0x10] sm:$0xff] %vm1214_vm1, %v1200_v22 }
 0x382   : > { %v1177_v42 = vpop.xlane.xlu1 %1176 }
 0x383   : > { %v1203_v45 = vadd.f32 %v1177_v42, %v1155_v1  ;;  %v1231_v1 = vld [vmem:[#allocation4] sm:$0xff]  ;;  %v1328_v42 = vmul.f32 %v3266_v17, %v1232_v18  ;;  %v1236_v17 = vld [vmem:[#allocation4 + $0x28] sm:$0xff] }
 0x384   : > { %v1327_v33 = vmul.f32 %v3268_v14, %v1231_v1  ;;  %v1235_v14 = vld [vmem:[#allocation4 + $0x20] sm:$0xff] }
 0x385   : > { %1220 = vst.msk [vmem:[#allocation3 + $0x28] sm:$0xff] %vm1214_vm1, %v1203_v45 }
 0x386   : > { %v1175_v6 = vpop.xlane.xlu0 %1174 }
 0x387   : > { %v1202_v29 = vadd.f32 %v1175_v6, %v1154_v52 }
 0x389   : > { %1219 = vst.msk [vmem:[#allocation3 + $0x20] sm:$0xff] %vm1214_vm1, %v1202_v29  ;;  %v1330_v29 = vmul.f32 %v3272_v34, %v1234_v47  ;;  %v1238_v34 = vld [vmem:[#allocation4 + $0x38] sm:$0xff] }
 0x38a   : > { %v1181_v46 = vpop.xlane.xlu1 %1180  ;;  %v1334_v54 = vmul.f32 %v3280_v39, %v1238_v34 }
 0x38b   : > { %v1205_v49 = vadd.f32 %v1181_v46, %v1157_v3  ;;  %v1329_v3 = vmul.f32 %v3270_v24, %v1233_v58  ;;  %v1237_v24 = vld [vmem:[#allocation4 + $0x30] sm:$0xff] }
 0x38d   : > { %1222 = vst.msk [vmem:[#allocation3 + $0x38] sm:$0xff] %vm1214_vm1, %v1205_v49 }
 0x38e   : > { %v1179_v43 = vpop.xlane.xlu0 %1178 }
 0x38f   : > { %v1185_v8 = vpop.xlane.xlu1 %1184  ;;  %v1204_v16 = vadd.f32 %v1179_v43, %v1156_v59  ;;  %v1332_v59 = vmul.f32 %v3276_v23, %v1236_v17 }
 0x390   : > { %v1207_v48 = vadd.f32 %v1185_v8, %v1159_v55  ;;  %v1331_v55 = vmul.f32 %v3274_v28, %v1235_v14 }
 0x391   : > { %1221 = vst.msk [vmem:[#allocation3 + $0x30] sm:$0xff] %vm1214_vm1, %v1204_v16 }
 0x392   : > { %1224 = vst.msk [vmem:[#allocation3 + $0x48] sm:$0xff] %vm1214_vm1, %v1207_v48  ;;  %v1183_v57 = vpop.xlane.xlu0 %1182  ;;  %v1240_v48 = vld [vmem:[#allocation4 + $0x48] sm:$0xff] }
 0x393   : > { %v1189_v53 = vpop.xlane.xlu1 %1188  ;;  %v1206_v9 = vadd.f32 %v1183_v57, %v1158_v61  ;;  %v1333_v61 = vmul.f32 %v3278_v38, %v1237_v24  ;;  %v1239_v57 = vld [vmem:[#allocation4 + $0x40] sm:$0xff]  ;;  %v1336_v28 = vmul.f32 %v3284_v60, %v1240_v48  ;;  %v1244_v38 = vld [vmem:[#allocation4 + $0x68] sm:$0xff] }
 0x394   : > { %v1209_v0 = vadd.f32 %v1189_v53, %v1161_v21  ;;  %v1335_v5 = vmul.f32 %v3282_v4, %v1239_v57  ;;  %v1340_v4 = vmul.f32 %v3293_v56, %v1244_v38 }
 0x395   : > { %1223 = vst.msk [vmem:[#allocation3 + $0x40] sm:$0xff] %vm1214_vm1, %v1206_v9  ;;  %v1242_v9 = vld [vmem:[#allocation4 + $0x58] sm:$0xff] }
 0x396   : > { %1226 = vst.msk [vmem:[#allocation3 + $0x58] sm:$0xff] %vm1214_vm1, %v1209_v0  ;;  %v1187_v25 = vpop.xlane.xlu0 %1186  ;;  %v1338_v63 = vmul.f32 %v3288_v41, %v1242_v9  ;;  %v1245_v41 = vld [vmem:[#allocation4 + $0x70] sm:$0xff] }
 0x397   : > { %v1193_v19 = vpop.xlane.xlu1 %1192  ;;  %v1208_v20 = vadd.f32 %v1187_v25, %v1160_v10  ;;  %v1241_v10 = vld [vmem:[#allocation4 + $0x50] sm:$0xff] }
 0x398   : > { %v1211_v7 = vadd.f32 %v1193_v19, %v1163_v13  ;;  %v1337_v19 = vmul.f32 %v3286_v30, %v1241_v10 }
 0x399   : > { %1225 = vst.msk [vmem:[#allocation3 + $0x50] sm:$0xff] %vm1214_vm1, %v1208_v20 }
 0x39a   : > { %1228 = vst.msk [vmem:[#allocation3 + $0x68] sm:$0xff] %vm1214_vm1, %v1211_v7  ;;  %v1191_v12 = vpop.xlane.xlu0 %1190 }
 0x39b   : > { %v1197_v37 = vpop.xlane.xlu1 %1196  ;;  %v1210_v15 = vadd.f32 %v1191_v12, %v1162_v32  ;;  %v1246_v12 = vld [vmem:[#allocation4 + $0x78] sm:$0xff] }
 0x39c   : > { %v1213_v35 = vadd.f32 %v1197_v37, %v1165_v26  ;;  %v1339_v26 = vmul.f32 %v3290_v27, %v1243_v31 }
 0x39d   : > { %1227 = vst.msk [vmem:[#allocation3 + $0x60] sm:$0xff] %vm1214_vm1, %v1210_v15 }
 0x39e   : > { %1230 = vst.msk [vmem:[#allocation3 + $0x78] sm:$0xff] %vm1214_vm1, %v1213_v35  ;;  %v1195_v40 = vpop.xlane.xlu0 %1194 }
 0x39f   : > { %v1212_v22 = vadd.f32 %v1195_v40, %v1164_v62  ;;  %v1320_v15 = vpop.permute.xlu1 %1319 }
 0x3a1   : > { %1229 = vst.msk [vmem:[#allocation3 + $0x70] sm:$0xff] %vm1214_vm1, %v1212_v22  ;;  %v1341_v22 = vmul.f32 %v1320_v15, %v1245_v41 }
 0x3a6   : > { %v1325_v11 = vpop.permute.xlu0 %1324 }
 0x3a7   : > { %v1342_v40 = vmul.f32 %v1325_v11, %v1246_v12 }
 0x3bc   : > { %v2172_v44 = vpop.f32.mrb[0].mxu1 }
 0x3bd   : > { %v1505_v45 = vadd.f32 %v2172_v44, %v1328_v42  ;;  %v1425_v52 = vpop.f32.mrb[1].mxu1 }
 0x3be   : > { %v1504_v6 = vadd.f32 %v1425_v52, %v1327_v33 }
 0x3bf   : > { %1521 = vst [vmem:[#allocation4 + $0x8] sm:$0xff] %v1505_v45 }
 0x3c0   : > { %1520 = vst [vmem:[#allocation4] sm:$0xff] %v1504_v6 }
 0x3c5   : > { %v2175_v46 = vpop.f32.mrb[2].mxu1 }
 0x3c6   : > { %v1507_v36 = vadd.f32 %v2175_v46, %v1330_v29  ;;  %v1435_v49 = vpop.f32.mrb[3].mxu1 }
 0x3c7   : > { %v1506_v50 = vadd.f32 %v1435_v49, %v1329_v3 }
 0x3c8   : > { %1523 = vst [vmem:[#allocation4 + $0x18] sm:$0xff] %v1507_v36 }
 0x3c9   : > { %1522 = vst [vmem:[#allocation4 + $0x10] sm:$0xff] %v1506_v50 }
 0x3cd   : > { %v2178_v43 = vpop.f32.mrb[4].mxu1 }
 0x3ce   : > { %v1509_v51 = vadd.f32 %v2178_v43, %v1332_v59  ;;  %v1445_v8 = vpop.f32.mrb[5].mxu1 }
 0x3cf   : > { %v1508_v16 = vadd.f32 %v1445_v8, %v1331_v55 }
 0x3d0   : > { %1525 = vst [vmem:[#allocation4 + $0x28] sm:$0xff] %v1509_v51 }
 0x3d1   : > { %1524 = vst [vmem:[#allocation4 + $0x20] sm:$0xff] %v1508_v16 }
 0x3d5   : > { %v2181_v21 = vpop.f32.mrb[6].mxu1 }
 0x3d6   : > { %v1511_v2 = vadd.f32 %v2181_v21, %v1334_v54  ;;  %v1455_v53 = vpop.f32.mrb[7].mxu1 }
 0x3d7   : > { %v1510_v23 = vadd.f32 %v1455_v53, %v1333_v61 }
 0x3d8   : > { %1527 = vst [vmem:[#allocation4 + $0x38] sm:$0xff] %v1511_v2 }
 0x3d9   : > { %1526 = vst [vmem:[#allocation4 + $0x30] sm:$0xff] %v1510_v23  ;;  %v2184_v0 = vpop.f32.mrb[8].mxu1 }
 0x3da   : > { %v1513_v13 = vadd.f32 %v2184_v0, %v1336_v28  ;;  %v1465_v25 = vpop.f32.mrb[9].mxu1 }
 0x3db   : > { %v1512_v39 = vadd.f32 %v1465_v25, %v1335_v5 }
 0x3dc   : > { %1529 = vst [vmem:[#allocation4 + $0x48] sm:$0xff] %v1513_v13 }
 0x3dd   : > { %1528 = vst [vmem:[#allocation4 + $0x40] sm:$0xff] %v1512_v39  ;;  %v2187_v20 = vpop.f32.mrb[10].mxu1 }
 0x3de   : > { %v1515_v60 = vadd.f32 %v2187_v20, %v1338_v63  ;;  %v1475_v7 = vpop.f32.mrb[11].mxu1 }
 0x3df   : > { %v1514_v32 = vadd.f32 %v1475_v7, %v1337_v19 }
 0x3e0   : > { %1531 = vst [vmem:[#allocation4 + $0x58] sm:$0xff] %v1515_v60 }
 0x3e1   : > { %1530 = vst [vmem:[#allocation4 + $0x50] sm:$0xff] %v1514_v32  ;;  %v2190_v37 = vpop.f32.mrb[12].mxu1 }
 0x3e2   : > { %v1517_v35 = vadd.f32 %v2190_v37, %v1340_v4  ;;  %v1485_v62 = vpop.f32.mrb[13].mxu1 }
 0x3e3   : > { %v1516_v30 = vadd.f32 %v1485_v62, %v1339_v26 }
 0x3e4   : > { %1533 = vst [vmem:[#allocation4 + $0x68] sm:$0xff] %v1517_v35 }
 0x3e5   : > { %1532 = vst [vmem:[#allocation4 + $0x60] sm:$0xff] %v1516_v30  ;;  %v2193_v18 = vpop.f32.mrb[14].mxu1 }
 0x3e6   : > { %v1519_v1 = vadd.f32 %v2193_v18, %v1342_v40  ;;  %v1495_v42 = vpop.f32.mrb[15].mxu1 }
 0x3e7   : > { %v1518_v56 = vadd.f32 %v1495_v42, %v1341_v22 }
 0x3e8   : > { %1535 = vst [vmem:[#allocation4 + $0x78] sm:$0xff] %v1519_v1 }
 0x3e9   : > { %1534 = vst [vmem:[#allocation4 + $0x70] sm:$0xff] %v1518_v56 }
 0x3ea PF: > { %s3462_s18 = sld [smem:[#allocation9_spill]] }
 0x3f0   : > { %p2009_p10 = scmp.ne.s32.totalorder %s3462_s18, 1 }
 0x3f1   : > { %v1558_v27 = vld [vmem:[#allocation3 + $0x10] sm:$0xff] (!%p2009_p10)  ;;  %v1556_v33 = vld [vmem:[#allocation3] sm:$0xff] (!%p2009_p10)  ;;  %v1559_v44 = vld [vmem:[#allocation3 + $0x18] sm:$0xff] (!%p2009_p10)  ;;  %v2607_v45 = vmov (!%p2009_p10), 0  }
 0x3f2   : > { %1555 = sbr.rel (%p2009_p10) target bundleno = 1181 (0x49d), region = 158  ;;  %2451 = vset.pattern.permute.xlu1 (!%p2009_p10), %v2607_v45  ;;  %2450 = vset.pattern.permute.xlu0 (!%p2009_p10), %v2607_v45  ;;  %2452 = vrcp.f32 (!%p2009_p10), %v1558_v27  ;;  %v1557_v52 = vld [vmem:[#allocation3 + $0x8] sm:$0xff] (!%p2009_p10)  ;;  %v1560_v47 = vld [vmem:[#allocation3 + $0x20] sm:$0xff] (!%p2009_p10)  ;;  %v1563_v58 = vld [vmem:[#allocation3 + $0x38] sm:$0xff] (!%p2009_p10) }
 0x3f3   : > { %2454 = vrcp.f32 (!%p2009_p10), %v1556_v33  ;;  %v1561_v6 = vld [vmem:[#allocation3 + $0x28] sm:$0xff] (!%p2009_p10)  ;;  %v1562_v29 = vld [vmem:[#allocation3 + $0x30] sm:$0xff] (!%p2009_p10)  ;;  %v1564_v50 = vld [vmem:[#allocation3 + $0x40] sm:$0xff] (!%p2009_p10) }
 0x3f4   : > { %2456 = vrcp.f32 (!%p2009_p10), %v1559_v44  ;;  %v1565_v36 = vld [vmem:[#allocation3 + $0x48] sm:$0xff] (!%p2009_p10)  ;;  %v1567_v14 = vld [vmem:[#allocation3 + $0x58] sm:$0xff] (!%p2009_p10)  ;;  %v1566_v55 = vld [vmem:[#allocation3 + $0x50] sm:$0xff] (!%p2009_p10) }
 0x3f5   : > { %2458 = vrcp.f32 (!%p2009_p10), %v1557_v52  ;;  %v1569_v51 = vld [vmem:[#allocation3 + $0x68] sm:$0xff] (!%p2009_p10)  ;;  %v1568_v16 = vld [vmem:[#allocation3 + $0x60] sm:$0xff] (!%p2009_p10)  ;;  %v1571_v24 = vld [vmem:[#allocation3 + $0x78] sm:$0xff] (!%p2009_p10) }
 0x3f6   : > { %2460 = vrcp.f32 (!%p2009_p10), %v1561_v6  ;;  %v1570_v48 = vld [vmem:[#allocation3 + $0x70] sm:$0xff] (!%p2009_p10)  ;;  %v1588_v5 = vld [vmem:[#allocation4] sm:$0xff] (!%p2009_p10)  ;;  %v1591_v39 = vld [vmem:[#allocation4 + $0x18] sm:$0xff] (!%p2009_p10) }
 0x3f7   : > { %2462 = vrcp.f32 (!%p2009_p10), %v1560_v47  ;;  %v1590_v9 = vld [vmem:[#allocation4 + $0x10] sm:$0xff] (!%p2009_p10)  ;;  %v1589_v63 = vld [vmem:[#allocation4 + $0x8] sm:$0xff] (!%p2009_p10)  ;;  %v1592_v7 = vld [vmem:[#allocation4 + $0x20] sm:$0xff] (!%p2009_p10) }
 0x3f8   : > { %2464 = vrcp.f32 (!%p2009_p10), %v1563_v58  ;;  %v1593_v60 = vld [vmem:[#allocation4 + $0x28] sm:$0xff] (!%p2009_p10)  ;;  %v1595_v11 = vld [vmem:[#allocation4 + $0x38] sm:$0xff] (!%p2009_p10)  ;;  %v1594_v37 = vld [vmem:[#allocation4 + $0x30] sm:$0xff] (!%p2009_p10) }
 0x3f9   : > { %2466 = vrcp.f32 %v1562_v29  ;;  %v1597_v30 = vld [vmem:[#allocation4 + $0x48] sm:$0xff]  ;;  %v1596_v40 = vld [vmem:[#allocation4 + $0x40] sm:$0xff]  ;;  %v1599_v56 = vld [vmem:[#allocation4 + $0x58] sm:$0xff] }
 0x3fa   : > { %2468 = vrcp.f32 %v1565_v36  ;;  %v1598_v27 = vld [vmem:[#allocation4 + $0x50] sm:$0xff]  ;;  %v1601_v6 = vld [vmem:[#allocation4 + $0x68] sm:$0xff]  ;;  %v1600_v47 = vld [vmem:[#allocation4 + $0x60] sm:$0xff] }
 0x3fb   : > { %2470 = vrcp.f32 %v1564_v50  ;;  %v1603_v36 = vld [vmem:[#allocation4 + $0x78] sm:$0xff] }
 0x3fc   : > { %v2453_v3 = vpop.eup %2452  ;;  %2472 = vrcp.f32 %v1567_v14 }
 0x3fd   : > { %v2455_v46 = vpop.eup %2454  ;;  %1616 = vperm.xlu1 %2451, %v2453_v3   ;;  %2474 = vrcp.f32 %v1566_v55 }
 0x3fe   : > { %v2457_v49 = vpop.eup %2456  ;;  %1606 = vperm.xlu0 %2450, %v2455_v46   ;;  %2476 = vrcp.f32 %v1569_v51 }
 0x3ff   : > { %v2459_v17 = vpop.eup %2458  ;;  %2478 = vrcp.f32 %v1568_v16 }
 0x400   : > { %v2461_v59 = vpop.eup %2460  ;;  %2480 = vrcp.f32 %v1571_v24 }
 0x401   : > { %1621 = vperm.xlu1 %2451, %v2457_v49   ;;  %v2463_v43 = vpop.eup %2462  ;;  %2482 = vrcp.f32 %v1570_v48  ;;  %v1602_v49 = vld [vmem:[#allocation4 + $0x70] sm:$0xff] }
 0x402   : > { %1611 = vperm.xlu0 %2450, %v2459_v17   ;;  %v2465_v8 = vpop.eup %2464 }
 0x403   : > { %v2467_v34 = vpop.eup %2466 }
 0x404   : > { %v2469_v54 = vpop.eup %2468 }
 0x405   : > { %1631 = vperm.xlu1 %2451, %v2461_v59   ;;  %v2471_v61 = vpop.eup %2470 }
 0x406   : > { %1626 = vperm.xlu0 %2450, %v2463_v43   ;;  %v2473_v21 = vpop.eup %2472 }
 0x407   : > { %v2475_v57 = vpop.eup %2474 }
 0x408   : > { %v2477_v2 = vpop.eup %2476 }
 0x409   : > { %1641 = vperm.xlu1 %2451, %v2465_v8   ;;  %v2479_v53 = vpop.eup %2478 }
 0x40a   : > { %1636 = vperm.xlu0 %2450, %v2467_v34   ;;  %v2481_v23 = vpop.eup %2480 }
 0x40b   : > { %v2483_v28 = vpop.eup %2482 }
 0x40d   : > { %1651 = vperm.xlu1 %2451, %v2469_v54  }
 0x40e   : > { %1646 = vperm.xlu0 %2450, %v2471_v61  }
 0x411   : > { %1661 = vperm.xlu1 %2451, %v2473_v21  }
 0x412   : > { %1656 = vperm.xlu0 %2450, %v2475_v57  }
 0x415   : > { %1671 = vperm.xlu1 %2451, %v2477_v2  }
 0x416   : > { %1666 = vperm.xlu0 %2450, %v2479_v53  }
 0x419   : > { %1681 = vperm.xlu1 %2451, %v2481_v23  }
 0x41a   : > { %1676 = vperm.xlu0 %2450, %v2483_v28  }
 0x47c   : > { %v1617_v0 = vpop.permute.xlu1 %1616 }
 0x47d   : > { %v1686_v10 = vmul.f32 %v1617_v0, %v1590_v9  ;;  %v1607_v13 = vpop.permute.xlu0 %1606 }
 0x47e   : > { %v1684_v25 = vmul.f32 %v1607_v13, %v1588_v5 }
 0x47f   : > { %1702 = vst [vmem:[%s2884_s21 + $0x10] sm:$0xff] %v1686_v10 }
 0x480   : > { %1700 = vst [vmem:[%s2884_s21] sm:$0xff] %v1684_v25  ;;  %v1622_v38 = vpop.permute.xlu1 %1621 }
 0x481   : > { %v1687_v19 = vmul.f32 %v1622_v38, %v1591_v39  ;;  %v1612_v20 = vpop.permute.xlu0 %1611 }
 0x482   : > { %v1685_v31 = vmul.f32 %v1612_v20, %v1589_v63 }
 0x483   : > { %1703 = vst [vmem:[%s2884_s21 + $0x18] sm:$0xff] %v1687_v19 }
 0x484   : > { %1701 = vst [vmem:[%s2884_s21 + $0x8] sm:$0xff] %v1685_v31  ;;  %v1632_v32 = vpop.permute.xlu1 %1631 }
 0x485   : > { %v1689_v4 = vmul.f32 %v1632_v32, %v1593_v60  ;;  %v1627_v26 = vpop.permute.xlu0 %1626 }
 0x486   : > { %v1688_v12 = vmul.f32 %v1627_v26, %v1592_v7 }
 0x487   : > { %1705 = vst [vmem:[%s2884_s21 + $0x28] sm:$0xff] %v1689_v4 }
 0x488   : > { %1704 = vst [vmem:[%s2884_s21 + $0x20] sm:$0xff] %v1688_v12  ;;  %v1642_v41 = vpop.permute.xlu1 %1641 }
 0x489   : > { %v1691_v15 = vmul.f32 %v1642_v41, %v1595_v11  ;;  %v1637_v35 = vpop.permute.xlu0 %1636 }
 0x48a   : > { %v1690_v62 = vmul.f32 %v1637_v35, %v1594_v37 }
 0x48b   : > { %1707 = vst [vmem:[%s2884_s21 + $0x38] sm:$0xff] %v1691_v15 }
 0x48c   : > { %1706 = vst [vmem:[%s2884_s21 + $0x30] sm:$0xff] %v1690_v62  ;;  %v1652_v22 = vpop.permute.xlu1 %1651 }
 0x48d   : > { %v1693_v18 = vmul.f32 %v1652_v22, %v1597_v30  ;;  %v1647_v1 = vpop.permute.xlu0 %1646 }
 0x48e   : > { %v1692_v42 = vmul.f32 %v1647_v1, %v1596_v40 }
 0x48f   : > { %1709 = vst [vmem:[%s2884_s21 + $0x48] sm:$0xff] %v1693_v18 }
 0x490   : > { %1708 = vst [vmem:[%s2884_s21 + $0x40] sm:$0xff] %v1692_v42  ;;  %v1662_v33 = vpop.permute.xlu1 %1661 }
 0x491   : > { %v1695_v44 = vmul.f32 %v1662_v33, %v1599_v56  ;;  %v1657_v45 = vpop.permute.xlu0 %1656 }
 0x492   : > { %v1694_v52 = vmul.f32 %v1657_v45, %v1598_v27 }
 0x493   : > { %1711 = vst [vmem:[%s2884_s21 + $0x58] sm:$0xff] %v1695_v44 }
 0x494   : > { %1710 = vst [vmem:[%s2884_s21 + $0x50] sm:$0xff] %v1694_v52  ;;  %v1672_v58 = vpop.permute.xlu1 %1671 }
 0x495   : > { %v1697_v29 = vmul.f32 %v1672_v58, %v1601_v6  ;;  %v1667_v3 = vpop.permute.xlu0 %1666 }
 0x496   : > { %v1696_v46 = vmul.f32 %v1667_v3, %v1600_v47 }
 0x497   : > { %1713 = vst [vmem:[%s2884_s21 + $0x68] sm:$0xff] %v1697_v29 }
 0x498   : > { %1712 = vst [vmem:[%s2884_s21 + $0x60] sm:$0xff] %v1696_v46  ;;  %v1682_v50 = vpop.permute.xlu1 %1681 }
 0x499   : > { %v1699_v17 = vmul.f32 %v1682_v50, %v1603_v36  ;;  %v1677_v14 = vpop.permute.xlu0 %1676 }
 0x49a   : > { %v1698_v59 = vmul.f32 %v1677_v14, %v1602_v49 }
 0x49b   : > { %1715 = vst [vmem:[%s2884_s21 + $0x78] sm:$0xff] %v1699_v17 }
 0x49c   : > { %1714 = vst [vmem:[%s2884_s21 + $0x70] sm:$0xff] %v1698_v59 }
 0x49d PF: > { %1722 = sbr.rel (!%p2784_p6) target bundleno = 1200 (0x4b0), region = 162  ;;  %s3463_s30 = sld [smem:[#allocation10_spill]] (%p2784_p6)  ;;  %v1787_v55 = vld [vmem:[%s2884_s21] sm:$0xff] (%p2784_p6)  ;;  %v1789_v43 = vld [vmem:[%s2884_s21 + $0x8] sm:$0xff] (%p2784_p6)  ;;  %v1791_v51 = vld [vmem:[%s2884_s21 + $0x10] sm:$0xff] (%p2784_p6) }
 0x49e   : > { %s3464_s11 = sld [smem:[#allocation12_spill]] (%p2784_p6)  ;;  %s3465_s8 = sld [smem:[#allocation11_spill]] (%p2784_p6)  ;;  %v1793_v8 = vld [vmem:[%s2884_s21 + $0x18] sm:$0xff] (%p2784_p6)  ;;  %v1795_v16 = vld [vmem:[%s2884_s21 + $0x20] sm:$0xff] (%p2784_p6)  ;;  %v1797_v34 = vld [vmem:[%s2884_s21 + $0x28] sm:$0xff] (%p2784_p6) }
 0x49f   : > { %v1799_v24 = vld [vmem:[%s2884_s21 + $0x30] sm:$0xff] (%p2784_p6)  ;;  %v1801_v54 = vld [vmem:[%s2884_s21 + $0x38] sm:$0xff] (%p2784_p6)  ;;  %v1803_v48 = vld [vmem:[%s2884_s21 + $0x40] sm:$0xff] (%p2784_p6)  ;;  %s3466_s12 = sld [smem:[#allocation18_spill]] (%p2784_p6) }
 0x4a0   : > { %v1805_v61 = vld [vmem:[%s2884_s21 + $0x48] sm:$0xff] (%p2784_p6)  ;;  %v1807_v21 = vld [vmem:[%s2884_s21 + $0x50] sm:$0xff] (%p2784_p6)  ;;  %v1809_v57 = vld [vmem:[%s2884_s21 + $0x58] sm:$0xff] (%p2784_p6) }
 0x4a1   : > { %v1811_v2 = vld [vmem:[%s2884_s21 + $0x60] sm:$0xff] (%p2784_p6)  ;;  %v1813_v53 = vld [vmem:[%s2884_s21 + $0x68] sm:$0xff] (%p2784_p6) }
 0x4a2   : > { %v1817_v28 = vld [vmem:[%s2884_s21 + $0x78] sm:$0xff] (%p2784_p6) }
 0x4a3   : > { %s2017_s19 = sshll.u32 (%p2784_p6), %s3463_s30, 6  ;;  %v1815_v23 = vld [vmem:[%s2884_s21 + $0x70] sm:$0xff] (%p2784_p6) }
 0x4a4   : > { %s2013_s29 = sshll.u32 %s3464_s11, 7  ;;  %s1725_s10 = sadd.s32 %s3465_s8, %s2017_s19 }
 0x4a5   : > { %s1727_s6 = sadd.s32 %s2013_s29, %s1725_s10 }
 0x4a6   : > { %s2014_s5 = sshll.u32 %s1727_s6, 3 }
 0x4a7   : > { %s1729_s14 = scalar_lea.vmem %s3466_s12, %s2014_s5 }
 0x4a8   : > { %1788 = vst [vmem:[%s1729_s14] sm:$0xff] %v1787_v55  ;;  %1790 = vst [vmem:[%s1729_s14 + $0x20] sm:$0xff] %v1789_v43 }
 0x4a9   : > { %1792 = vst [vmem:[%s1729_s14 + $0x40] sm:$0xff] %v1791_v51  ;;  %1794 = vst [vmem:[%s1729_s14 + $0x60] sm:$0xff] %v1793_v8 }
 0x4aa   : > { %1796 = vst [vmem:[%s1729_s14 + $0x80] sm:$0xff] %v1795_v16  ;;  %1798 = vst [vmem:[%s1729_s14 + $0xa0] sm:$0xff] %v1797_v34 }
 0x4ab   : > { %1800 = vst [vmem:[%s1729_s14 + $0xc0] sm:$0xff] %v1799_v24  ;;  %1802 = vst [vmem:[%s1729_s14 + $0xe0] sm:$0xff] %v1801_v54 }
 0x4ac   : > { %1804 = vst [vmem:[%s1729_s14 + $0x100] sm:$0xff] %v1803_v48  ;;  %1806 = vst [vmem:[%s1729_s14 + $0x120] sm:$0xff] %v1805_v61 }
 0x4ad   : > { %1808 = vst [vmem:[%s1729_s14 + $0x140] sm:$0xff] %v1807_v21  ;;  %1810 = vst [vmem:[%s1729_s14 + $0x160] sm:$0xff] %v1809_v57 }
 0x4ae   : > { %1812 = vst [vmem:[%s1729_s14 + $0x180] sm:$0xff] %v1811_v2  ;;  %1814 = vst [vmem:[%s1729_s14 + $0x1a0] sm:$0xff] %v1813_v53 }
 0x4af   : > { %1816 = vst [vmem:[%s1729_s14 + $0x1c0] sm:$0xff] %v1815_v23  ;;  %1818 = vst [vmem:[%s1729_s14 + $0x1e0] sm:$0xff] %v1817_v28 }
 0x4b0 PF: > { %s13_s26 = sadd.s32 1, %s2602_s26   ;;  %s3468_s18 = sld [smem:[#allocation13_spill]] }
 0x4b1   : > { %p3382_p11 = scmp.ge.s32.totalorder %s13_s26, 34   ;;  %s3469_s22 = sld [smem:[#allocation14_spill]] }
 0x4b2   : > { %s3470_s27 = sld [smem:[#allocation15_spill]]  ;;  %s3471_s9 = sld [smem:[#allocation16_spill]] }
 0x4b3   : > { %s3472_s30 = sld [smem:[#allocation17_spill]]  ;;  %s3474_s12 = smov %s2550_s13 }
 0x4b4   : > { %s3475_s13 = smov %s2789_s3  ;;  %s3476_s14 = smov %s2558_s15 }
 0x4b5   : > { %s3477_s15 = smov %s2767_s28  ;;  %s3478_s16 = smov %s2566_s17 }
 0x4b6   : > { %s3479_s17 = smov %s2764_s4  ;;  %s3480_s19 = smov %s2590_s23 }
 0x4b7   : > { %s3481_s20 = smov %s2594_s24  ;;  %s3482_s21 = smov %s2598_s25 }
 0x4b8   : > { %s3483_s23 = smov %s3470_s27  ;;  %s3484_s24 = smov %s3471_s9 }
 0x4b9   : > { %s3485_s25 = smov %s3472_s30  ;;  %12 = sbr.rel (!%p3382_p11) target bundleno = 10 (0xa), region = 247 }

// kernel: causal_self_attention.3
= control target key start
LH: loop header
LB: loop body
LE: loop exit
PB: predicated region body
PF: predicated region fallthrough
CT: control target
= control target key end

     0   :  { %s2946_s0 = inlined_call_operand.hbm [shape: f32[512,512], index: 0, kind: input, shape index: {}]   ;;  %s2947_s1 = inlined_call_operand.hbm [shape: f32[1536,512], index: 1, kind: input, shape index: {}]   ;;  %s2948_s2 = inlined_call_operand.vmem [shape: f32[512,1536], index: 2, kind: output, shape index: {}]  }
   0x1   :  { %2957 = sst [smem:[#allocation13_spill]] %s2946_s0 }
   0x2   :  { %2958 = sst [smem:[#allocation14_spill]] %s2948_s2 }
   0x3   :  { %7 = vsyncpa [#allocation4], 0 }
   0x4   :  { %9 = vsyncpa [#allocation4 + $0x1], 0 }
   0x5   :  { %10 = vsyncpa [#allocation6], 0 }
   0x6   :  { %12 = vsyncpa [#allocation6 + $0x1], 0  ;;  %s2189_s9 = smov 0   ;;  %s2191_s10 = smov 0  }
   0x7   :  { %s2193_s11 = smov 0   ;;  %s2195_s12 = smov 0  }
   0x8   :  { %s2197_s13 = smov 0   ;;  %s2199_s14 = smov 0  }
   0x9   :  { %s2201_s15 = smov 0   ;;  %s2203_s16 = smov 0  }
   0xa   :  { %s2205_s17 = smov 0   ;;  %s2207_s18 = smov 0  }
   0xb   :  { %s2209_s19 = smov 0   ;;  %s2211_s20 = smov 0  }
   0xc   :  { %s2213_s21 = smov 0  }
   0xd LB: > { %s1660_s22 = sadd.s32 4294967295, %s2168_s21   ;;  %s37_s23 = sadd.s32 1, %s2164_s20  ;;  %s2168_s21 = sphi %s2213_s21, %s18_s21   ;;  %s2164_s20 = sphi %s2211_s20, %s2996_s20   ;;  %s2160_s19 = sphi %s2209_s19, %s2995_s19   ;;  %s2156_s18 = sphi %s2207_s18, %s2994_s18   ;;  %s2152_s17 = sphi %s2205_s17, %s2993_s17   ;;  %s2148_s16 = sphi %s2203_s16, %s2992_s16   ;;  %s2144_s15 = sphi %s2201_s15, %s2991_s15   ;;  %s2140_s14 = sphi %s2199_s14, %s2990_s14   ;;  %s2136_s13 = sphi %s2197_s13, %s2989_s13   ;;  %s2132_s12 = sphi %s2195_s12, %s2988_s12   ;;  %s2128_s11 = sphi %s2193_s11, %s2987_s11   ;;  %s2124_s10 = sphi %s2191_s10, %s2986_s10   ;;  %s2120_s9 = sphi %s2189_s9, %s2985_s9  }
   0xe   : > { %s46_s24 = sadd.s32 1, %s2148_s16  ;;  %p53_p0 = scmp.ne.s32.totalorder %s2148_s16, %s2144_s15 }
   0xf   : > { %p2950_p1 = scmp.eq.s32.totalorder %s2168_s21, 0  ;;  %p59_p2 = scmp.ne.s32.totalorder %s2144_s15, %s2140_s14 }
  0x10   : > { %p2259_p3 = scmp.eq.s32.totalorder %s1660_s22, 0  ;;  %p2263_p4 = scmp.eq.s32.totalorder %s1660_s22, 11 }
  0x11   : > { %p55_p5 = por %p2950_p1, %p53_p0  ;;  %p2949_p7 = scmp.lt.s32.totalorder %s2168_s21, 12 }
  0x12   : > { %s2960_s26 = scalar_select %p2263_p4, 1, 0 }
  0x13   : > { %p2271_p6 = por %p2259_p3, %p59_p2  ;;  %s139_s28 = sand.u32 1, %s2148_s16  }
  0x14   : > { %s1684_s29 = sshll.u32 %s2164_s20, 14  ;;  %s1664_s30 = sshll.u32 %s139_s28, 10 }
  0x15   : > { %s2961_s27 = scalar_select %p2271_p6, 1, 0 }
  0x16   : > { %s2962_s0 = sld [smem:[#allocation13_spill]]  ;;  %s143_s6 = scalar_lea.vmem [#allocation3], %s1664_s30 }
  0x17   : > { %s153_s7 = sshll.u32 %s143_s6, 4  ;;  %p2285_p8 = pnand %p2949_p7, %p55_p5  ;;  %s2289_s7 = int_to_ptr.vmem [resolvable:$true] %s153_s7 }
  0x18   : > { %s2291_s14 = scalar_lea.sflag [#allocation4], %s139_s28 }
  0x19   : > { %p2000_p10 = pneg %p2285_p8 }
  0x1c   : > { %s2281_s5 = scalar_lea.hbm %s2962_s0, %s1684_s29  ;;  %s2003_s3 = scalar_lea.hbm %s2962_s0, 32768 }
  0x1d   : > { %s1998_s22 = scalar_lea.hbm %s2281_s5, 16384  ;;  %p2004_p13 = scmp.lt.u32.totalorder %s2281_s5, %s2962_s0 }
  0x1e   : > { %p1999_p9 = scmp.ne.s32.totalorder %s2281_s5, %s1998_s22  ;;  %p2005_p0 = scmp.lt.u32.totalorder %s2003_s3, %s1998_s22 }
  0x1f   : > { %p2007_p5 = scmp.lt.u32.totalorder %s1998_s22, %s2281_s5 }
  0x20   : > { %p2001_p11 = pnand %p2000_p10, %p1999_p9  ;;  %p2006_p2 = por %p2005_p0, %p2004_p13 }
  0x22   : > { %p2002_p12 = pneg %p2001_p11  ;;  %p2008_p7 = por %p2007_p5, %p2006_p2 }
  0x24   : > { %p2009_p1 = pnand %p2008_p7, %p2002_p12 }
  0x26   : > { %2012 = shalt.err (!%p2009_p1)
}
  0x27   : > { %s2013_s28 = scalar_lea.vmem %s2289_s7, 16384  ;;  %s2170_s29 = smov [#allocation3]  }
  0x28   : > { %p2014_p9 = scmp.ne.s32.totalorder %s2289_s7, %s2013_s28  ;;  %s2018_s30 = sshll.u32 %s2170_s29, 4  ;;  %s2019_s30 = int_to_ptr.vmem [resolvable:$false] %s2018_s30 }
  0x29   : > { %s2020_s4 = scalar_lea.vmem %s2019_s30, 32768  ;;  %p2021_p4 = scmp.lt.s32.totalorder %s2289_s7, %s2019_s30 }
  0x2a   : > { %p2016_p11 = pnand %p2014_p9, %p2000_p10  ;;  %p2022_p13 = scmp.lt.s32.totalorder %s2020_s4, %s2013_s28 }
  0x2c   : > { %p2017_p6 = pneg %p2016_p11  ;;  %p2023_p0 = por %p2022_p13, %p2021_p4 }
  0x2e   : > { %p2024_p2 = pnand %p2023_p0, %p2017_p6 }
  0x30   : > { %2027 = shalt.err (!%p2024_p2)
}
  0x31   : > { %s2952_s22 = smov 512   ;;  %s2953_s3 = smov 32  }
  0x32   : > { %1887 = dma.hbm_to_vmem [thread:$0]  (!%p2285_p8), %s2281_s5, 16384, %s2289_s7, %s2291_s14, %s2952_s22, %s2952_s22, %s2953_s3  }
  0x33   : > { %p1672_p1 = scmp.ge.s32.totalorder %s2168_s21, 1  ;;  %p185_p4 = scmp.lt.s32.totalorder %s2168_s21, 13 }
  0x34   : > { %s33_s28 = sadd.s32 1, %s2160_s19  ;;  %s74_s29 = sadd.s32 1, %s2136_s13 }
  0x35   : > { %p2324_p6 = pnand %p1672_p1, %p185_p4  ;;  %p35_p7 = scmp.ge.s32.totalorder %s33_s28, 6 }
  0x36   : > { %p81_p10 = scmp.ne.s32.totalorder %s2136_s13, %s2132_s12  ;;  %p87_p12 = scmp.ne.s32.totalorder %s2132_s12, %s2128_s11 }
  0x37   : > { %s2998_s28 = smov (%p35_p7, %s33_s28), 0  ;;  %s3000_s23 = smov (!%p35_p7, %s37_s23), %s2164_s20 }
  0x38   : > { %2965 = sst [smem:[#allocation10_spill]] %s2998_s28  ;;  %s69_s5 = ssub.s32 %s2160_s19, %s2998_s28 }
  0x39   : > { %p2966_p8 = scmp.eq.s32.totalorder %s2168_s21, 0  ;;  %p39_p9 = scmp.ge.s32.totalorder %s3000_s23, 2 }
  0x3a   : > { %p72_p11 = scmp.eq.s32.totalorder %s69_s5, 0  ;;  %p2349_p13 = por %p87_p12, %p2259_p3 }
  0x3b   : > { %p2343_p5 = por %p81_p10, %p2966_p8  ;;  %s102_s8 = sadd.s32 1, %s2124_s10 }
  0x3c   : > { %s2968_s11 = scalar_select %p2349_p13, 1, 0 }
  0x3d   : > { %s3002_s23 = smov (%p39_p9, %s3000_s23), 0  ;;  %p112_p0 = scmp.ne.s32.totalorder %s2124_s10, %s2120_s9 }
  0x3e   : > { %2969 = sst [smem:[#allocation11_spill]] %s3002_s23  ;;  %s41_s30 = ssub.s32 %s2164_s20, %s3002_s23 }
  0x3f   : > { %s2357_s14 = scalar_select %p72_p11, %s2136_s13, %s74_s29  }
  0x40   : > { %p44_p2 = scmp.eq.s32.totalorder %s41_s30, 0  ;;  %s99_s4 = sor.u32 %s69_s5, %s41_s30 }
  0x41   : > { %2970 = sst [smem:[#allocation12_spill]] %s2357_s14  ;;  %p100_p1 = scmp.eq.s32.totalorder %s99_s4, 0 }
  0x42   : > { %p2971_p4 = scmp.ne.s32.totalorder %s2960_s26, 0  ;;  %s163_s0 = sand.u32 1, %s2136_s13  }
  0x43   : > { %s2372_s22 = scalar_select %p44_p2, %s2148_s16, %s46_s24  }
  0x44   : > { %p2365_p7 = por %p2971_p4, %p112_p0  ;;  %s1686_s28 = sshll.u32 %s2160_s19, 14 }
  0x45   : > { %s2375_s3 = scalar_select %p100_p1, %s2124_s10, %s102_s8  }
  0x46   : > { %s2972_s25 = scalar_select %p2365_p7, 1, 0 }
  0x47   : > { %s1668_s2 = sshll.u32 %s163_s0, 10  ;;  %s2382_s23 = scalar_lea.hbm %s2947_s1, %s1686_s28 }
  0x48   : > { %s167_s26 = scalar_lea.vmem [#allocation5], %s1668_s2  ;;  %p2973_p3 = scmp.lt.s32.totalorder %s2168_s21, 12 }
  0x49   : > { %s177_s5 = sshll.u32 %s167_s26, 4  ;;  %s2394_s8 = scalar_lea.sflag [#allocation6], %s163_s0  ;;  %s2392_s5 = int_to_ptr.vmem [resolvable:$true] %s177_s5 }
  0x4a   : > { %p2388_p10 = pnand %p2973_p3, %p2343_p5  ;;  %s2028_s28 = scalar_lea.hbm %s2382_s23, 16384 }
  0x4b   : > { %p2029_p12 = scmp.ne.s32.totalorder %s2382_s23, %s2028_s28  ;;  %s2033_s14 = scalar_lea.hbm %s2947_s1, 98304 }
  0x4c   : > { %p2030_p8 = pneg %p2388_p10  ;;  %p2034_p5 = scmp.lt.u32.totalorder %s2382_s23, %s2947_s1 }
  0x4d   : > { %p2035_p0 = scmp.lt.u32.totalorder %s2033_s14, %s2028_s28  ;;  %p2037_p1 = scmp.lt.u32.totalorder %s2028_s28, %s2382_s23 }
  0x4e   : > { %p2031_p9 = pnand %p2030_p8, %p2029_p12 }
  0x4f   : > { %p2036_p2 = por %p2035_p0, %p2034_p5 }
  0x50   : > { %p2032_p11 = pneg %p2031_p9 }
  0x51   : > { %p2038_p4 = por %p2037_p1, %p2036_p2 }
  0x53   : > { %p2039_p3 = pnand %p2038_p4, %p2032_p11 }
  0x55   : > { %2042 = shalt.err (!%p2039_p3)
}
  0x56   : > { %s2043_s0 = scalar_lea.vmem %s2392_s5, 16384  ;;  %s2173_s29 = smov [#allocation5]  }
  0x57   : > { %p2044_p12 = scmp.ne.s32.totalorder %s2392_s5, %s2043_s0  ;;  %s2048_s26 = sshll.u32 %s2173_s29, 4  ;;  %s2049_s26 = int_to_ptr.vmem [resolvable:$false] %s2048_s26 }
  0x58   : > { %s2050_s2 = scalar_lea.vmem %s2049_s26, 32768  ;;  %p2051_p13 = scmp.lt.s32.totalorder %s2392_s5, %s2049_s26 }
  0x59   : > { %p2046_p9 = pnand %p2044_p12, %p2030_p8  ;;  %p2052_p5 = scmp.lt.s32.totalorder %s2050_s2, %s2043_s0 }
  0x5b   : > { %p2047_p7 = pneg %p2046_p9  ;;  %p2053_p0 = por %p2052_p5, %p2051_p13 }
  0x5d   : > { %p2054_p2 = pnand %p2053_p0, %p2047_p7 }
  0x5f   : > { %2057 = shalt.err (!%p2054_p2)
}
  0x60   : > { %s2975_s28 = smov 32   ;;  %s2976_s7 = smov 512  }
  0x61   : > { %1890 = dma.hbm_to_vmem [thread:$0]  (!%p2388_p10), %s2382_s23, 16384, %s2392_s5, %s2394_s8, %s2976_s7, %s2976_s7, %s2975_s28  }
  0x62   : > { %189 = sbr.rel (%p2324_p6) target bundleno = 591 (0x24f), region = 28  ;;  %s191_s14 = sand.u32 (!%p2324_p6), 1, %s2144_s15  }
  0x63   : > { %s1673_s30 = sshll.u32 (!%p2324_p6), %s191_s14, 10  ;;  %s192_s4 = scalar_lea.sflag (!%p2324_p6), [#allocation4], %s191_s14 }
  0x64   : > { %s2428_s0 = scalar_lea.vmem (!%p2324_p6), [#allocation3], %s1673_s30  ;;  %p2977_p13 = scmp.ne.s32.totalorder (!%p2324_p6), %s2961_s27, 0 }
  0x69   : > { %2111 = dma.done.wait (%p2977_p13), %s192_s4, 16384  }
  0x6a   : > { %2113 = vsyncadd (%p2977_p13), %s192_s4, 4294950912  ;;  %s200_s24 = sand.u32 1, %s2132_s12   ;;  %p2978_p6 = scmp.ne.s32.totalorder %s2968_s11, 0 }
  0x6b   : > { %s1674_s29 = sshll.u32 %s200_s24, 10  ;;  %s201_s23 = scalar_lea.sflag [#allocation6], %s200_s24 }
  0x6c   : > { %s2435_s5 = scalar_lea.vmem [#allocation5], %s1674_s29 }
  0x6d   : > { %2115 = dma.done.wait (%p2978_p6), %s201_s23, 16384  }
  0x6e   : > { %2117 = vsyncadd (%p2978_p6), %s201_s23, 4294950912  ;;  %v496_v0 = vld [vmem:[%s2435_s5 + $0x8] sm:$0xff]  ;;  %v498_v2 = vld [vmem:[%s2435_s5 + $0x18] sm:$0xff]  ;;  %s226_s27 = sand.u32 1, %s2120_s9   ;;  %p2979_p7 = scmp.ne.s32.totalorder %s2972_s25, 0 }
  0x6f   : > { %v500_v1 = vld [vmem:[%s2435_s5 + $0x28] sm:$0xff]  ;;  %v502_v4 = vld [vmem:[%s2435_s5 + $0x38] sm:$0xff]  ;;  %v495_v5 = vld [vmem:[%s2435_s5] sm:$0xff]  ;;  %s1675_s6 = sshll.u32 %s226_s27, 9  ;;  %s1678_s9 = sshll.u32 (%p2979_p7), %s2152_s17, 1 }
  0x70   : > { %v1687_v3 = vpack.c.bf16 %v500_v1, %v496_v0  ;;  %v499_v6 = vld [vmem:[%s2435_s5 + $0x20] sm:$0xff]  ;;  %v1751_v7 = vpack.c.bf16 %v502_v4, %v498_v2  ;;  %v497_v9 = vld [vmem:[%s2435_s5 + $0x10] sm:$0xff]  ;;  %v504_v11 = vld [vmem:[%s2435_s5 + $0x48] sm:$0xff]  ;;  %s2698_s11 = scalar_lea.vmem [#allocation7], %s1675_s6  ;;  %s1879_s8 = smul.u32 (%p2979_p7), 384, %s2156_s18 }
  0x71   : > { %v1689_v8 = vpack.c.bf16 %v499_v6, %v495_v5  ;;  %v501_v10 = vld [vmem:[%s2435_s5 + $0x30] sm:$0xff]  ;;  %v508_v13 = vld [vmem:[%s2435_s5 + $0x68] sm:$0xff]  ;;  %v506_v14 = vld [vmem:[%s2435_s5 + $0x58] sm:$0xff]  ;;  %s2980_s18 = sld [smem:[#allocation14_spill]] (%p2979_p7) }
  0x72   : > { %1688 = vmatprep.subr.bf16.mxu1 %v1687_v3  ;;  %v1753_v12 = vpack.c.bf16 %v501_v10, %v497_v9  ;;  %v510_v15 = vld [vmem:[%s2435_s5 + $0x78] sm:$0xff]  ;;  %1752 = vmatprep.subr.bf16.mxu0 %v1751_v7  ;;  %v1691_v16 = vpack.c.bf16 %v508_v13, %v504_v11  ;;  %v503_v18 = vld [vmem:[%s2435_s5 + $0x40] sm:$0xff]  ;;  %v505_v20 = vld [vmem:[%s2435_s5 + $0x50] sm:$0xff]  ;;  %s1406_s25 = sadd.s32 (%p2979_p7), %s1879_s8, %s1678_s9 }
  0x73   : > { %1690 = vmatpush1.bf16.xpose.msra.mxu1 %v1689_v8  ;;  %v1755_v17 = vpack.c.bf16 %v510_v15, %v506_v14  ;;  %v507_v19 = vld [vmem:[%s2435_s5 + $0x60] sm:$0xff]  ;;  %v509_v21 = vld [vmem:[%s2435_s5 + $0x70] sm:$0xff]  ;;  %v512_v22 = vld [vmem:[%s2435_s5 + $0x88] sm:$0xff]  ;;  %s1680_s26 = sshll.u32 (%p2979_p7), %s1406_s25, 3 }
  0x74   : > { %1754 = vmatpush1.bf16.xpose.msra.mxu0 %v1753_v12  ;;  %1692 = vmatprep.subr.bf16.mxu1 %v1691_v16  ;;  %v516_v23 = vld [vmem:[%s2435_s5 + $0xa8] sm:$0xff]  ;;  %v514_v24 = vld [vmem:[%s2435_s5 + $0x98] sm:$0xff]  ;;  %v1693_v26 = vpack.c.bf16 %v507_v19, %v503_v18  ;;  %v1757_v27 = vpack.c.bf16 %v509_v21, %v505_v20  ;;  %v511_v30 = vld [vmem:[%s2435_s5 + $0x80] sm:$0xff] }
  0x75   : > { %1756 = vmatprep.subr.bf16.mxu0 %v1755_v17  ;;  %v518_v25 = vld [vmem:[%s2435_s5 + $0xb8] sm:$0xff]  ;;  %v1695_v28 = vpack.c.bf16 %v516_v23, %v512_v22  ;;  %v515_v31 = vld [vmem:[%s2435_s5 + $0xa0] sm:$0xff]  ;;  %v513_v32 = vld [vmem:[%s2435_s5 + $0x90] sm:$0xff] }
  0x76   : > { %v1759_v29 = vpack.c.bf16 %v518_v25, %v514_v24  ;;  %v517_v33 = vld [vmem:[%s2435_s5 + $0xb0] sm:$0xff]  ;;  %v520_v34 = vld [vmem:[%s2435_s5 + $0xc8] sm:$0xff]  ;;  %v522_v36 = vld [vmem:[%s2435_s5 + $0xd8] sm:$0xff]  ;;  %v1697_v38 = vpack.c.bf16 %v515_v31, %v511_v30 }
  0x77   : > { %v524_v35 = vld [vmem:[%s2435_s5 + $0xe8] sm:$0xff]  ;;  %v526_v37 = vld [vmem:[%s2435_s5 + $0xf8] sm:$0xff]  ;;  %v1761_v39 = vpack.c.bf16 %v517_v33, %v513_v32  ;;  %v519_v42 = vld [vmem:[%s2435_s5 + $0xc0] sm:$0xff]  ;;  %s2783_s28 = scalar_lea.vmem (%p2979_p7), %s2980_s18, %s1680_s26 }
  0x78   : > { %v1699_v40 = vpack.c.bf16 %v524_v35, %v520_v34  ;;  %v1763_v41 = vpack.c.bf16 %v526_v37, %v522_v36  ;;  %v523_v43 = vld [vmem:[%s2435_s5 + $0xe0] sm:$0xff]  ;;  %v521_v44 = vld [vmem:[%s2435_s5 + $0xd0] sm:$0xff]  ;;  %v528_v46 = vld [vmem:[%s2435_s5 + $0x108] sm:$0xff] }
  0x79   : > { %v525_v45 = vld [vmem:[%s2435_s5 + $0xf0] sm:$0xff]  ;;  %v532_v47 = vld [vmem:[%s2435_s5 + $0x128] sm:$0xff]  ;;  %v530_v48 = vld [vmem:[%s2435_s5 + $0x118] sm:$0xff]  ;;  %v1701_v50 = vpack.c.bf16 %v523_v43, %v519_v42 }
  0x7a   : > { %v534_v49 = vld [vmem:[%s2435_s5 + $0x138] sm:$0xff]  ;;  %v1765_v51 = vpack.c.bf16 %v525_v45, %v521_v44  ;;  %v1703_v52 = vpack.c.bf16 %v532_v47, %v528_v46  ;;  %v527_v54 = vld [vmem:[%s2435_s5 + $0x100] sm:$0xff]  ;;  %v529_v56 = vld [vmem:[%s2435_s5 + $0x110] sm:$0xff] }
  0x7b   : > { %1694 = vmatpush1.bf16.xpose.msra.mxu1 %v1693_v26  ;;  %v1767_v53 = vpack.c.bf16 %v534_v49, %v530_v48  ;;  %v531_v55 = vld [vmem:[%s2435_s5 + $0x120] sm:$0xff]  ;;  %v533_v57 = vld [vmem:[%s2435_s5 + $0x130] sm:$0xff]  ;;  %v536_v58 = vld [vmem:[%s2435_s5 + $0x148] sm:$0xff] }
  0x7c   : > { %1758 = vmatpush1.bf16.xpose.msra.mxu0 %v1757_v27  ;;  %1696 = vmatprep.subr.bf16.mxu1 %v1695_v28  ;;  %v540_v59 = vld [vmem:[%s2435_s5 + $0x168] sm:$0xff]  ;;  %v538_v60 = vld [vmem:[%s2435_s5 + $0x158] sm:$0xff]  ;;  %v1705_v62 = vpack.c.bf16 %v531_v55, %v527_v54  ;;  %v1769_v63 = vpack.c.bf16 %v533_v57, %v529_v56  ;;  %v535_v2 = vld [vmem:[%s2435_s5 + $0x140] sm:$0xff] }
  0x7d   : > { %1760 = vmatprep.subr.bf16.mxu0 %v1759_v29  ;;  %v542_v61 = vld [vmem:[%s2435_s5 + $0x178] sm:$0xff]  ;;  %v1707_v0 = vpack.c.bf16 %v540_v59, %v536_v58  ;;  %v539_v3 = vld [vmem:[%s2435_s5 + $0x160] sm:$0xff]  ;;  %v537_v4 = vld [vmem:[%s2435_s5 + $0x150] sm:$0xff] }
  0x7e   : > { %v1771_v1 = vpack.c.bf16 %v542_v61, %v538_v60  ;;  %v541_v5 = vld [vmem:[%s2435_s5 + $0x170] sm:$0xff]  ;;  %v544_v6 = vld [vmem:[%s2435_s5 + $0x188] sm:$0xff]  ;;  %v546_v8 = vld [vmem:[%s2435_s5 + $0x198] sm:$0xff]  ;;  %v1709_v10 = vpack.c.bf16 %v539_v3, %v535_v2 }
  0x7f   : > { %v548_v7 = vld [vmem:[%s2435_s5 + $0x1a8] sm:$0xff]  ;;  %v550_v9 = vld [vmem:[%s2435_s5 + $0x1b8] sm:$0xff]  ;;  %v1773_v11 = vpack.c.bf16 %v541_v5, %v537_v4  ;;  %v543_v16 = vld [vmem:[%s2435_s5 + $0x180] sm:$0xff] }
  0x80   : > { %v1711_v12 = vpack.c.bf16 %v548_v7, %v544_v6  ;;  %v1775_v13 = vpack.c.bf16 %v550_v9, %v546_v8  ;;  %v368_v14 = vld [vmem:[%s2428_s0 + $0x8] sm:$0xff]  ;;  %v370_v15 = vld [vmem:[%s2428_s0 + $0x18] sm:$0xff]  ;;  %v547_v17 = vld [vmem:[%s2435_s5 + $0x1a0] sm:$0xff] }
  0x81   : > { %687 = vmatprep.mubr.f32.mxu1 %v368_v14  ;;  %944 = vmatprep.mubr.f32.mxu0 %v370_v15  ;;  %v545_v18 = vld [vmem:[%s2435_s5 + $0x190] sm:$0xff]  ;;  %v552_v20 = vld [vmem:[%s2435_s5 + $0x1c8] sm:$0xff]  ;;  %v554_v22 = vld [vmem:[%s2435_s5 + $0x1d8] sm:$0xff]  ;;  %v1713_v24 = vpack.c.bf16 %v547_v17, %v543_v16 }
  0x82   : > { %v549_v19 = vld [vmem:[%s2435_s5 + $0x1b0] sm:$0xff]  ;;  %v556_v21 = vld [vmem:[%s2435_s5 + $0x1e8] sm:$0xff]  ;;  %v558_v23 = vld [vmem:[%s2435_s5 + $0x1f8] sm:$0xff] }
  0x83   : > { %1698 = vmatpush1.bf16.xpose.msra.mxu1 %v1697_v38  ;;  %v1777_v25 = vpack.c.bf16 %v549_v19, %v545_v18  ;;  %v1715_v26 = vpack.c.bf16 %v556_v21, %v552_v20  ;;  %v1779_v27 = vpack.c.bf16 %v558_v23, %v554_v22  ;;  %v551_v28 = vld [vmem:[%s2435_s5 + $0x1c0] sm:$0xff]  ;;  %v553_v30 = vld [vmem:[%s2435_s5 + $0x1d0] sm:$0xff]  ;;  %v560_v32 = vld [vmem:[%s2435_s5 + $0x208] sm:$0xff] }
  0x84   : > { %1762 = vmatpush1.bf16.xpose.msra.mxu0 %v1761_v39  ;;  %1700 = vmatprep.subr.bf16.mxu1 %v1699_v40  ;;  %v555_v29 = vld [vmem:[%s2435_s5 + $0x1e0] sm:$0xff]  ;;  %v557_v31 = vld [vmem:[%s2435_s5 + $0x1f0] sm:$0xff]  ;;  %v564_v33 = vld [vmem:[%s2435_s5 + $0x228] sm:$0xff] }
  0x85   : > { %1764 = vmatprep.subr.bf16.mxu0 %v1763_v41  ;;  %v562_v34 = vld [vmem:[%s2435_s5 + $0x218] sm:$0xff]  ;;  %v1717_v36 = vpack.c.bf16 %v555_v29, %v551_v28  ;;  %v1781_v37 = vpack.c.bf16 %v557_v31, %v553_v30  ;;  %v1719_v38 = vpack.c.bf16 %v564_v33, %v560_v32  ;;  %v559_v40 = vld [vmem:[%s2435_s5 + $0x200] sm:$0xff]  ;;  %v561_v42 = vld [vmem:[%s2435_s5 + $0x210] sm:$0xff] }
  0x86   : > { %v566_v35 = vld [vmem:[%s2435_s5 + $0x238] sm:$0xff]  ;;  %v563_v41 = vld [vmem:[%s2435_s5 + $0x220] sm:$0xff]  ;;  %v565_v43 = vld [vmem:[%s2435_s5 + $0x230] sm:$0xff] }
  0x87   : > { %v1783_v39 = vpack.c.bf16 %v566_v35, %v562_v34  ;;  %v568_v44 = vld [vmem:[%s2435_s5 + $0x248] sm:$0xff]  ;;  %v570_v46 = vld [vmem:[%s2435_s5 + $0x258] sm:$0xff]  ;;  %v1721_v48 = vpack.c.bf16 %v563_v41, %v559_v40  ;;  %v1785_v49 = vpack.c.bf16 %v565_v43, %v561_v42  ;;  %v569_v54 = vld [vmem:[%s2435_s5 + $0x250] sm:$0xff] }
  0x88   : > { %v572_v45 = vld [vmem:[%s2435_s5 + $0x268] sm:$0xff]  ;;  %v574_v47 = vld [vmem:[%s2435_s5 + $0x278] sm:$0xff]  ;;  %v573_v55 = vld [vmem:[%s2435_s5 + $0x270] sm:$0xff] }
  0x89   : > { %v576_v56 = vld [vmem:[%s2435_s5 + $0x288] sm:$0xff]  ;;  %v578_v58 = vld [vmem:[%s2435_s5 + $0x298] sm:$0xff]  ;;  %v1789_v61 = vpack.c.bf16 %v573_v55, %v569_v54  ;;  %v577_v2 = vld [vmem:[%s2435_s5 + $0x290] sm:$0xff] }
  0x8a   : > { %v580_v57 = vld [vmem:[%s2435_s5 + $0x2a8] sm:$0xff]  ;;  %v582_v59 = vld [vmem:[%s2435_s5 + $0x2b8] sm:$0xff]  ;;  %v581_v3 = vld [vmem:[%s2435_s5 + $0x2b0] sm:$0xff] }
  0x8b   : > { %1702 = vmatpush1.bf16.xpose.msra.mxu1 %v1701_v50  ;;  %v1723_v50 = vpack.c.bf16 %v572_v45, %v568_v44  ;;  %v584_v4 = vld [vmem:[%s2435_s5 + $0x2c8] sm:$0xff]  ;;  %v586_v6 = vld [vmem:[%s2435_s5 + $0x2d8] sm:$0xff]  ;;  %v1793_v9 = vpack.c.bf16 %v581_v3, %v577_v2  ;;  %v585_v14 = vld [vmem:[%s2435_s5 + $0x2d0] sm:$0xff] }
  0x8c   : > { %1766 = vmatpush1.bf16.xpose.msra.mxu0 %v1765_v51  ;;  %1704 = vmatprep.subr.bf16.mxu1 %v1703_v52  ;;  %v1787_v51 = vpack.c.bf16 %v574_v47, %v570_v46  ;;  %v567_v52 = vld [vmem:[%s2435_s5 + $0x240] sm:$0xff]  ;;  %v588_v5 = vld [vmem:[%s2435_s5 + $0x2e8] sm:$0xff]  ;;  %v590_v7 = vld [vmem:[%s2435_s5 + $0x2f8] sm:$0xff] }
  0x8d   : > { %1768 = vmatprep.subr.bf16.mxu0 %v1767_v53  ;;  %v571_v53 = vld [vmem:[%s2435_s5 + $0x260] sm:$0xff]  ;;  %v589_v15 = vld [vmem:[%s2435_s5 + $0x2f0] sm:$0xff]  ;;  %v592_v16 = vld [vmem:[%s2435_s5 + $0x308] sm:$0xff] }
  0x8e   : > { %v1725_v60 = vpack.c.bf16 %v571_v53, %v567_v52  ;;  %v596_v17 = vld [vmem:[%s2435_s5 + $0x328] sm:$0xff]  ;;  %v594_v18 = vld [vmem:[%s2435_s5 + $0x318] sm:$0xff]  ;;  %v1797_v21 = vpack.c.bf16 %v589_v15, %v585_v14  ;;  %v367_v2 = vld [vmem:[%s2428_s0] sm:$0xff] }
  0x8f   : > { %v598_v19 = vld [vmem:[%s2435_s5 + $0x338] sm:$0xff]  ;;  %v1735_v22 = vpack.c.bf16 %v596_v17, %v592_v16  ;;  %v600_v28 = vld [vmem:[%s2435_s5 + $0x348] sm:$0xff]  ;;  %v369_v3 = vld [vmem:[%s2428_s0 + $0x10] sm:$0xff] }
  0x90   : > { %v1799_v23 = vpack.c.bf16 %v598_v19, %v594_v18  ;;  %v604_v29 = vld [vmem:[%s2435_s5 + $0x368] sm:$0xff]  ;;  %v602_v30 = vld [vmem:[%s2435_s5 + $0x358] sm:$0xff]  ;;  %v379_v14 = vld [vmem:[%s2428_s0 + $0x60] sm:$0xff] }
  0x91   : > { %v606_v31 = vld [vmem:[%s2435_s5 + $0x378] sm:$0xff]  ;;  %v1739_v34 = vpack.c.bf16 %v604_v29, %v600_v28  ;;  %v608_v40 = vld [vmem:[%s2435_s5 + $0x388] sm:$0xff]  ;;  %v381_v15 = vld [vmem:[%s2428_s0 + $0x70] sm:$0xff] }
  0x92   : > { %v1803_v35 = vpack.c.bf16 %v606_v31, %v602_v30  ;;  %v612_v41 = vld [vmem:[%s2435_s5 + $0x3a8] sm:$0xff]  ;;  %v610_v42 = vld [vmem:[%s2435_s5 + $0x398] sm:$0xff]  ;;  %v383_v18 = vld [vmem:[%s2428_s0 + $0x80] sm:$0xff] }
  0x93   : > { %1706 = vmatpush1.bf16.xpose.msra.mxu1 %v1705_v62  ;;  %v1727_v62 = vpack.c.bf16 %v580_v57, %v576_v56  ;;  %v614_v43 = vld [vmem:[%s2435_s5 + $0x3b8] sm:$0xff]  ;;  %v1743_v46 = vpack.c.bf16 %v612_v41, %v608_v40  ;;  %v616_v52 = vld [vmem:[%s2435_s5 + $0x3c8] sm:$0xff]  ;;  %v385_v19 = vld [vmem:[%s2428_s0 + $0x90] sm:$0xff] }
  0x94   : > { %1770 = vmatpush1.bf16.xpose.msra.mxu0 %v1769_v63  ;;  %1708 = vmatprep.subr.bf16.mxu1 %v1707_v0  ;;  %v1791_v63 = vpack.c.bf16 %v582_v59, %v578_v58  ;;  %v575_v0 = vld [vmem:[%s2435_s5 + $0x280] sm:$0xff]  ;;  %v1807_v47 = vpack.c.bf16 %v614_v43, %v610_v42  ;;  %v620_v53 = vld [vmem:[%s2435_s5 + $0x3e8] sm:$0xff]  ;;  %v618_v54 = vld [vmem:[%s2435_s5 + $0x3d8] sm:$0xff] }
  0x95   : > { %1772 = vmatprep.subr.bf16.mxu0 %v1771_v1  ;;  %v579_v1 = vld [vmem:[%s2435_s5 + $0x2a0] sm:$0xff]  ;;  %v622_v55 = vld [vmem:[%s2435_s5 + $0x3f8] sm:$0xff]  ;;  %v1747_v58 = vpack.c.bf16 %v620_v53, %v616_v52  ;;  %v384_v16 = vld [vmem:[%s2428_s0 + $0x88] sm:$0xff] }
  0x96   : > { %v1729_v8 = vpack.c.bf16 %v579_v1, %v575_v0  ;;  %v1811_v59 = vpack.c.bf16 %v622_v55, %v618_v54  ;;  %v386_v17 = vld [vmem:[%s2428_s0 + $0x98] sm:$0xff]  ;;  %v396_v28 = vld [vmem:[%s2428_s0 + $0xe8] sm:$0xff]  ;;  %v395_v30 = vld [vmem:[%s2428_s0 + $0xe0] sm:$0xff] }
  0x97   : > { %v398_v29 = vld [vmem:[%s2428_s0 + $0xf8] sm:$0xff]  ;;  %v397_v31 = vld [vmem:[%s2428_s0 + $0xf0] sm:$0xff]  ;;  %v408_v40 = vld [vmem:[%s2428_s0 + $0x148] sm:$0xff] }
  0x98   : > { %v410_v41 = vld [vmem:[%s2428_s0 + $0x158] sm:$0xff]  ;;  %v407_v42 = vld [vmem:[%s2428_s0 + $0x140] sm:$0xff]  ;;  %v409_v43 = vld [vmem:[%s2428_s0 + $0x150] sm:$0xff] }
  0x99   : > { %v420_v52 = vld [vmem:[%s2428_s0 + $0x1a8] sm:$0xff]  ;;  %v422_v53 = vld [vmem:[%s2428_s0 + $0x1b8] sm:$0xff]  ;;  %v419_v54 = vld [vmem:[%s2428_s0 + $0x1a0] sm:$0xff] }
  0x9a   : > { %v421_v55 = vld [vmem:[%s2428_s0 + $0x1b0] sm:$0xff] }
  0x9b   : > { %1710 = vmatpush1.bf16.xpose.msra.mxu1 %v1709_v10  ;;  %v1731_v10 = vpack.c.bf16 %v588_v5, %v584_v4  ;;  %v372_v4 = vld [vmem:[%s2428_s0 + $0x28] sm:$0xff]  ;;  %v374_v5 = vld [vmem:[%s2428_s0 + $0x38] sm:$0xff] }
  0x9c   : > { %1774 = vmatpush1.bf16.xpose.msra.mxu0 %v1773_v11  ;;  %1712 = vmatprep.subr.bf16.mxu1 %v1711_v12  ;;  %v1795_v11 = vpack.c.bf16 %v590_v7, %v586_v6  ;;  %v583_v12 = vld [vmem:[%s2435_s5 + $0x2c0] sm:$0xff]  ;;  %v373_v7 = vld [vmem:[%s2428_s0 + $0x30] sm:$0xff] }
  0x9d   : > { %1776 = vmatprep.subr.bf16.mxu0 %v1775_v13  ;;  %v587_v13 = vld [vmem:[%s2435_s5 + $0x2e0] sm:$0xff] }
  0x9e   : > { %v1733_v20 = vpack.c.bf16 %v587_v13, %v583_v12  ;;  %v371_v6 = vld [vmem:[%s2428_s0 + $0x20] sm:$0xff]  ;;  %v380_v12 = vld [vmem:[%s2428_s0 + $0x68] sm:$0xff]  ;;  %v382_v13 = vld [vmem:[%s2428_s0 + $0x78] sm:$0xff] }
  0xa3   : > { %1714 = vmatpush1.bf16.xpose.msra.mxu1 %v1713_v24  ;;  %v591_v24 = vld [vmem:[%s2435_s5 + $0x300] sm:$0xff] }
  0xa4   : > { %1778 = vmatpush1.bf16.xpose.msra.mxu0 %v1777_v25  ;;  %1716 = vmatprep.subr.bf16.mxu1 %v1715_v26  ;;  %v595_v25 = vld [vmem:[%s2435_s5 + $0x320] sm:$0xff]  ;;  %v593_v26 = vld [vmem:[%s2435_s5 + $0x310] sm:$0xff] }
  0xa5   : > { %1780 = vmatprep.subr.bf16.mxu0 %v1779_v27  ;;  %v597_v27 = vld [vmem:[%s2435_s5 + $0x330] sm:$0xff]  ;;  %v1737_v32 = vpack.c.bf16 %v595_v25, %v591_v24  ;;  %v392_v24 = vld [vmem:[%s2428_s0 + $0xc8] sm:$0xff]  ;;  %v394_v25 = vld [vmem:[%s2428_s0 + $0xd8] sm:$0xff] }
  0xa6   : > { %v1801_v33 = vpack.c.bf16 %v597_v27, %v593_v26  ;;  %v391_v26 = vld [vmem:[%s2428_s0 + $0xc0] sm:$0xff]  ;;  %v393_v27 = vld [vmem:[%s2428_s0 + $0xd0] sm:$0xff] }
  0xab   : > { %1718 = vmatpush1.bf16.xpose.msra.mxu1 %v1717_v36  ;;  %v599_v36 = vld [vmem:[%s2435_s5 + $0x340] sm:$0xff] }
  0xac   : > { %1782 = vmatpush1.bf16.xpose.msra.mxu0 %v1781_v37  ;;  %1720 = vmatprep.subr.bf16.mxu1 %v1719_v38  ;;  %v603_v37 = vld [vmem:[%s2435_s5 + $0x360] sm:$0xff]  ;;  %v601_v38 = vld [vmem:[%s2435_s5 + $0x350] sm:$0xff] }
  0xad   : > { %1784 = vmatprep.subr.bf16.mxu0 %v1783_v39  ;;  %v605_v39 = vld [vmem:[%s2435_s5 + $0x370] sm:$0xff]  ;;  %v1741_v44 = vpack.c.bf16 %v603_v37, %v599_v36  ;;  %v404_v36 = vld [vmem:[%s2428_s0 + $0x128] sm:$0xff]  ;;  %v406_v37 = vld [vmem:[%s2428_s0 + $0x138] sm:$0xff] }
  0xae   : > { %v1805_v45 = vpack.c.bf16 %v605_v39, %v601_v38  ;;  %v403_v38 = vld [vmem:[%s2428_s0 + $0x120] sm:$0xff]  ;;  %v405_v39 = vld [vmem:[%s2428_s0 + $0x130] sm:$0xff] }
  0xb3   : > { %1722 = vmatpush1.bf16.xpose.msra.mxu1 %v1721_v48  ;;  %v607_v48 = vld [vmem:[%s2435_s5 + $0x380] sm:$0xff] }
  0xb4   : > { %1786 = vmatpush1.bf16.xpose.msra.mxu0 %v1785_v49  ;;  %1724 = vmatprep.subr.bf16.mxu1 %v1723_v50  ;;  %v611_v49 = vld [vmem:[%s2435_s5 + $0x3a0] sm:$0xff]  ;;  %v609_v50 = vld [vmem:[%s2435_s5 + $0x390] sm:$0xff] }
  0xb5   : > { %1788 = vmatprep.subr.bf16.mxu0 %v1787_v51  ;;  %v613_v51 = vld [vmem:[%s2435_s5 + $0x3b0] sm:$0xff]  ;;  %v1745_v56 = vpack.c.bf16 %v611_v49, %v607_v48  ;;  %v416_v48 = vld [vmem:[%s2428_s0 + $0x188] sm:$0xff]  ;;  %v418_v49 = vld [vmem:[%s2428_s0 + $0x198] sm:$0xff] }
  0xb6   : > { %v1809_v57 = vpack.c.bf16 %v613_v51, %v609_v50  ;;  %v415_v50 = vld [vmem:[%s2428_s0 + $0x180] sm:$0xff]  ;;  %v417_v51 = vld [vmem:[%s2428_s0 + $0x190] sm:$0xff] }
  0xbb   : > { %1726 = vmatpush1.bf16.xpose.msra.mxu1 %v1725_v60  ;;  %v615_v60 = vld [vmem:[%s2435_s5 + $0x3c0] sm:$0xff] }
  0xbc   : > { %1790 = vmatpush1.bf16.xpose.msra.mxu0 %v1789_v61  ;;  %1728 = vmatprep.subr.bf16.mxu1 %v1727_v62  ;;  %v619_v61 = vld [vmem:[%s2435_s5 + $0x3e0] sm:$0xff]  ;;  %v617_v62 = vld [vmem:[%s2435_s5 + $0x3d0] sm:$0xff] }
  0xbd   : > { %1792 = vmatprep.subr.bf16.mxu0 %v1791_v63  ;;  %v621_v63 = vld [vmem:[%s2435_s5 + $0x3f0] sm:$0xff]  ;;  %v1749_v0 = vpack.c.bf16 %v619_v61, %v615_v60  ;;  %v428_v60 = vld [vmem:[%s2428_s0 + $0x1e8] sm:$0xff]  ;;  %v430_v61 = vld [vmem:[%s2428_s0 + $0x1f8] sm:$0xff] }
  0xbe   : > { %v1813_v1 = vpack.c.bf16 %v621_v63, %v617_v62  ;;  %v427_v62 = vld [vmem:[%s2428_s0 + $0x1e0] sm:$0xff]  ;;  %v429_v63 = vld [vmem:[%s2428_s0 + $0x1f0] sm:$0xff] }
  0xc3   : > { %1730 = vmatpush1.bf16.xpose.msra.mxu1 %v1729_v8  ;;  %v376_v8 = vld [vmem:[%s2428_s0 + $0x48] sm:$0xff] }
  0xc4   : > { %1794 = vmatpush1.bf16.xpose.msra.mxu0 %v1793_v9  ;;  %1732 = vmatprep.subr.bf16.mxu1 %v1731_v10  ;;  %v378_v9 = vld [vmem:[%s2428_s0 + $0x58] sm:$0xff]  ;;  %v375_v10 = vld [vmem:[%s2428_s0 + $0x40] sm:$0xff] }
  0xc5   : > { %1796 = vmatprep.subr.bf16.mxu0 %v1795_v11  ;;  %v377_v11 = vld [vmem:[%s2428_s0 + $0x50] sm:$0xff] }
  0xcb   : > { %1734 = vmatpush1.bf16.xpose.msra.mxu1 %v1733_v20  ;;  %v388_v20 = vld [vmem:[%s2428_s0 + $0xa8] sm:$0xff] }
  0xcc   : > { %1798 = vmatpush1.bf16.xpose.msra.mxu0 %v1797_v21  ;;  %1736 = vmatprep.subr.bf16.mxu1 %v1735_v22  ;;  %v390_v21 = vld [vmem:[%s2428_s0 + $0xb8] sm:$0xff]  ;;  %v387_v22 = vld [vmem:[%s2428_s0 + $0xa0] sm:$0xff] }
  0xcd   : > { %1800 = vmatprep.subr.bf16.mxu0 %v1799_v23  ;;  %v389_v23 = vld [vmem:[%s2428_s0 + $0xb0] sm:$0xff] }
  0xd3   : > { %1738 = vmatpush1.bf16.xpose.msra.mxu1 %v1737_v32  ;;  %v400_v32 = vld [vmem:[%s2428_s0 + $0x108] sm:$0xff] }
  0xd4   : > { %1802 = vmatpush1.bf16.xpose.msra.mxu0 %v1801_v33  ;;  %1740 = vmatprep.subr.bf16.mxu1 %v1739_v34  ;;  %v402_v33 = vld [vmem:[%s2428_s0 + $0x118] sm:$0xff]  ;;  %v399_v34 = vld [vmem:[%s2428_s0 + $0x100] sm:$0xff] }
  0xd5   : > { %1804 = vmatprep.subr.bf16.mxu0 %v1803_v35  ;;  %v401_v35 = vld [vmem:[%s2428_s0 + $0x110] sm:$0xff] }
  0xdb   : > { %1742 = vmatpush1.bf16.xpose.msra.mxu1 %v1741_v44  ;;  %v412_v44 = vld [vmem:[%s2428_s0 + $0x168] sm:$0xff] }
  0xdc   : > { %1806 = vmatpush1.bf16.xpose.msra.mxu0 %v1805_v45  ;;  %1744 = vmatprep.subr.bf16.mxu1 %v1743_v46  ;;  %v414_v45 = vld [vmem:[%s2428_s0 + $0x178] sm:$0xff]  ;;  %v411_v46 = vld [vmem:[%s2428_s0 + $0x160] sm:$0xff] }
  0xdd   : > { %1808 = vmatprep.subr.bf16.mxu0 %v1807_v47  ;;  %v413_v47 = vld [vmem:[%s2428_s0 + $0x170] sm:$0xff] }
  0xe3   : > { %1746 = vmatpush1.bf16.xpose.msra.mxu1 %v1745_v56  ;;  %v424_v56 = vld [vmem:[%s2428_s0 + $0x1c8] sm:$0xff] }
  0xe4   : > { %1810 = vmatpush1.bf16.xpose.msra.mxu0 %v1809_v57  ;;  %1748 = vmatprep.subr.bf16.mxu1 %v1747_v58  ;;  %v426_v57 = vld [vmem:[%s2428_s0 + $0x1d8] sm:$0xff]  ;;  %v423_v58 = vld [vmem:[%s2428_s0 + $0x1c0] sm:$0xff] }
  0xe5   : > { %1812 = vmatprep.subr.bf16.mxu0 %v1811_v59  ;;  %v425_v59 = vld [vmem:[%s2428_s0 + $0x1d0] sm:$0xff] }
  0xeb   : > { %1750 = vmatpush1.bf16.xpose.msra.mxu1 %v1749_v0  ;;  %v432_v0 = vld [vmem:[%s2428_s0 + $0x208] sm:$0xff] }
  0xec   : > { %1814 = vmatpush1.bf16.xpose.msra.mxu0 %v1813_v1  ;;  %v434_v1 = vld [vmem:[%s2428_s0 + $0x218] sm:$0xff] }
  0xf2   : > { %688 = vmatmul.mubr.f32.vlgmr.msra.gmra.mrb[0].mxu1 %v367_v2  ;;  %v431_v2 = vld [vmem:[%s2428_s0 + $0x200] sm:$0xff] }
  0xf3   : > { %945 = vmatmul.mubr.f32.vlgmr.msra.gmra.mrb[0].mxu0 %v369_v3  ;;  %693 = vmatprep.mubr.f32.mxu1 %v372_v4  ;;  %v433_v3 = vld [vmem:[%s2428_s0 + $0x210] sm:$0xff]  ;;  %v436_v4 = vld [vmem:[%s2428_s0 + $0x228] sm:$0xff] }
  0xf4   : > { %950 = vmatprep.mubr.f32.mxu0 %v374_v5  ;;  %v438_v5 = vld [vmem:[%s2428_s0 + $0x238] sm:$0xff] }
  0xf6   : > { %694 = vmatmul.mubr.f32.gmra.mrb[2].mxu1 %v371_v6  ;;  %v435_v6 = vld [vmem:[%s2428_s0 + $0x220] sm:$0xff] }
  0xf7   : > { %951 = vmatmul.mubr.f32.gmra.mrb[2].mxu0 %v373_v7  ;;  %699 = vmatprep.mubr.f32.mxu1 %v376_v8  ;;  %v437_v7 = vld [vmem:[%s2428_s0 + $0x230] sm:$0xff]  ;;  %v440_v8 = vld [vmem:[%s2428_s0 + $0x248] sm:$0xff] }
  0xf8   : > { %956 = vmatprep.mubr.f32.mxu0 %v378_v9  ;;  %v442_v9 = vld [vmem:[%s2428_s0 + $0x258] sm:$0xff] }
  0xfa   : > { %700 = vmatmul.mubr.f32.gmra.mrb[4].mxu1 %v375_v10  ;;  %v439_v10 = vld [vmem:[%s2428_s0 + $0x240] sm:$0xff] }
  0xfb   : > { %957 = vmatmul.mubr.f32.gmra.mrb[4].mxu0 %v377_v11  ;;  %705 = vmatprep.mubr.f32.mxu1 %v380_v12  ;;  %v441_v11 = vld [vmem:[%s2428_s0 + $0x250] sm:$0xff]  ;;  %v444_v12 = vld [vmem:[%s2428_s0 + $0x268] sm:$0xff] }
  0xfc   : > { %962 = vmatprep.mubr.f32.mxu0 %v382_v13  ;;  %v446_v13 = vld [vmem:[%s2428_s0 + $0x278] sm:$0xff] }
  0xfe   : > { %706 = vmatmul.mubr.f32.gmra.mrb[6].mxu1 %v379_v14  ;;  %v443_v14 = vld [vmem:[%s2428_s0 + $0x260] sm:$0xff] }
  0xff   : > { %963 = vmatmul.mubr.f32.gmra.mrb[6].mxu0 %v381_v15  ;;  %711 = vmatprep.mubr.f32.mxu1 %v384_v16  ;;  %v445_v15 = vld [vmem:[%s2428_s0 + $0x270] sm:$0xff]  ;;  %v448_v16 = vld [vmem:[%s2428_s0 + $0x288] sm:$0xff] }
 0x100   : > { %968 = vmatprep.mubr.f32.mxu0 %v386_v17  ;;  %v450_v17 = vld [vmem:[%s2428_s0 + $0x298] sm:$0xff] }
 0x102   : > { %712 = vmatmul.mubr.f32.gmra.mrb[8].mxu1 %v383_v18  ;;  %v447_v18 = vld [vmem:[%s2428_s0 + $0x280] sm:$0xff] }
 0x103   : > { %969 = vmatmul.mubr.f32.gmra.mrb[8].mxu0 %v385_v19  ;;  %717 = vmatprep.mubr.f32.mxu1 %v388_v20  ;;  %v449_v19 = vld [vmem:[%s2428_s0 + $0x290] sm:$0xff]  ;;  %v452_v20 = vld [vmem:[%s2428_s0 + $0x2a8] sm:$0xff] }
 0x104   : > { %974 = vmatprep.mubr.f32.mxu0 %v390_v21  ;;  %v454_v21 = vld [vmem:[%s2428_s0 + $0x2b8] sm:$0xff] }
 0x106   : > { %718 = vmatmul.mubr.f32.gmra.mrb[10].mxu1 %v387_v22  ;;  %v451_v22 = vld [vmem:[%s2428_s0 + $0x2a0] sm:$0xff] }
 0x107   : > { %975 = vmatmul.mubr.f32.gmra.mrb[10].mxu0 %v389_v23  ;;  %723 = vmatprep.mubr.f32.mxu1 %v392_v24  ;;  %v453_v23 = vld [vmem:[%s2428_s0 + $0x2b0] sm:$0xff]  ;;  %v456_v24 = vld [vmem:[%s2428_s0 + $0x2c8] sm:$0xff] }
 0x108   : > { %980 = vmatprep.mubr.f32.mxu0 %v394_v25  ;;  %v458_v25 = vld [vmem:[%s2428_s0 + $0x2d8] sm:$0xff] }
 0x10a   : > { %724 = vmatmul.mubr.f32.gmra.mrb[12].mxu1 %v391_v26  ;;  %v455_v26 = vld [vmem:[%s2428_s0 + $0x2c0] sm:$0xff] }
 0x10b   : > { %981 = vmatmul.mubr.f32.gmra.mrb[12].mxu0 %v393_v27  ;;  %729 = vmatprep.mubr.f32.mxu1 %v396_v28  ;;  %v457_v27 = vld [vmem:[%s2428_s0 + $0x2d0] sm:$0xff]  ;;  %v460_v28 = vld [vmem:[%s2428_s0 + $0x2e8] sm:$0xff] }
 0x10c   : > { %986 = vmatprep.mubr.f32.mxu0 %v398_v29  ;;  %v462_v29 = vld [vmem:[%s2428_s0 + $0x2f8] sm:$0xff] }
 0x10e   : > { %730 = vmatmul.mubr.f32.gmra.mrb[14].mxu1 %v395_v30  ;;  %v459_v30 = vld [vmem:[%s2428_s0 + $0x2e0] sm:$0xff] }
 0x10f   : > { %987 = vmatmul.mubr.f32.gmra.mrb[14].mxu0 %v397_v31  ;;  %735 = vmatprep.mubr.f32.mxu1 %v400_v32  ;;  %v461_v31 = vld [vmem:[%s2428_s0 + $0x2f0] sm:$0xff]  ;;  %v464_v32 = vld [vmem:[%s2428_s0 + $0x308] sm:$0xff] }
 0x110   : > { %992 = vmatprep.mubr.f32.mxu0 %v402_v33  ;;  %v466_v33 = vld [vmem:[%s2428_s0 + $0x318] sm:$0xff] }
 0x112   : > { %736 = vmatmul.mubr.f32.gmra.mrb[16].mxu1 %v399_v34  ;;  %v463_v34 = vld [vmem:[%s2428_s0 + $0x300] sm:$0xff] }
 0x113   : > { %993 = vmatmul.mubr.f32.gmra.mrb[16].mxu0 %v401_v35  ;;  %741 = vmatprep.mubr.f32.mxu1 %v404_v36  ;;  %v465_v35 = vld [vmem:[%s2428_s0 + $0x310] sm:$0xff]  ;;  %v468_v36 = vld [vmem:[%s2428_s0 + $0x328] sm:$0xff] }
 0x114   : > { %998 = vmatprep.mubr.f32.mxu0 %v406_v37  ;;  %v470_v37 = vld [vmem:[%s2428_s0 + $0x338] sm:$0xff] }
 0x116   : > { %742 = vmatmul.mubr.f32.gmra.mrb[18].mxu1 %v403_v38  ;;  %v467_v38 = vld [vmem:[%s2428_s0 + $0x320] sm:$0xff] }
 0x117   : > { %999 = vmatmul.mubr.f32.gmra.mrb[18].mxu0 %v405_v39  ;;  %747 = vmatprep.mubr.f32.mxu1 %v408_v40  ;;  %v469_v39 = vld [vmem:[%s2428_s0 + $0x330] sm:$0xff]  ;;  %v472_v40 = vld [vmem:[%s2428_s0 + $0x348] sm:$0xff] }
 0x118   : > { %1004 = vmatprep.mubr.f32.mxu0 %v410_v41  ;;  %v474_v41 = vld [vmem:[%s2428_s0 + $0x358] sm:$0xff] }
 0x11a   : > { %748 = vmatmul.mubr.f32.gmra.mrb[20].mxu1 %v407_v42  ;;  %v471_v42 = vld [vmem:[%s2428_s0 + $0x340] sm:$0xff] }
 0x11b   : > { %1005 = vmatmul.mubr.f32.gmra.mrb[20].mxu0 %v409_v43  ;;  %753 = vmatprep.mubr.f32.mxu1 %v412_v44  ;;  %v473_v43 = vld [vmem:[%s2428_s0 + $0x350] sm:$0xff]  ;;  %v476_v44 = vld [vmem:[%s2428_s0 + $0x368] sm:$0xff] }
 0x11c   : > { %1010 = vmatprep.mubr.f32.mxu0 %v414_v45  ;;  %v478_v45 = vld [vmem:[%s2428_s0 + $0x378] sm:$0xff] }
 0x11e   : > { %754 = vmatmul.mubr.f32.gmra.mrb[22].mxu1 %v411_v46  ;;  %v475_v46 = vld [vmem:[%s2428_s0 + $0x360] sm:$0xff] }
 0x11f   : > { %1011 = vmatmul.mubr.f32.gmra.mrb[22].mxu0 %v413_v47  ;;  %759 = vmatprep.mubr.f32.mxu1 %v416_v48  ;;  %v477_v47 = vld [vmem:[%s2428_s0 + $0x370] sm:$0xff]  ;;  %v480_v48 = vld [vmem:[%s2428_s0 + $0x388] sm:$0xff] }
 0x120   : > { %1016 = vmatprep.mubr.f32.mxu0 %v418_v49  ;;  %v482_v49 = vld [vmem:[%s2428_s0 + $0x398] sm:$0xff] }
 0x122   : > { %760 = vmatmul.mubr.f32.gmra.mrb[24].mxu1 %v415_v50  ;;  %v479_v50 = vld [vmem:[%s2428_s0 + $0x380] sm:$0xff] }
 0x123   : > { %1017 = vmatmul.mubr.f32.gmra.mrb[24].mxu0 %v417_v51  ;;  %765 = vmatprep.mubr.f32.mxu1 %v420_v52  ;;  %v481_v51 = vld [vmem:[%s2428_s0 + $0x390] sm:$0xff]  ;;  %v484_v52 = vld [vmem:[%s2428_s0 + $0x3a8] sm:$0xff] }
 0x124   : > { %1022 = vmatprep.mubr.f32.mxu0 %v422_v53  ;;  %v486_v53 = vld [vmem:[%s2428_s0 + $0x3b8] sm:$0xff] }
 0x126   : > { %766 = vmatmul.mubr.f32.gmra.mrb[26].mxu1 %v419_v54  ;;  %v483_v54 = vld [vmem:[%s2428_s0 + $0x3a0] sm:$0xff] }
 0x127   : > { %1023 = vmatmul.mubr.f32.gmra.mrb[26].mxu0 %v421_v55  ;;  %771 = vmatprep.mubr.f32.mxu1 %v424_v56  ;;  %v485_v55 = vld [vmem:[%s2428_s0 + $0x3b0] sm:$0xff]  ;;  %v488_v56 = vld [vmem:[%s2428_s0 + $0x3c8] sm:$0xff] }
 0x128   : > { %1028 = vmatprep.mubr.f32.mxu0 %v426_v57  ;;  %v490_v57 = vld [vmem:[%s2428_s0 + $0x3d8] sm:$0xff] }
 0x12a   : > { %772 = vmatmul.mubr.f32.gmra.mrb[28].mxu1 %v423_v58  ;;  %v487_v58 = vld [vmem:[%s2428_s0 + $0x3c0] sm:$0xff] }
 0x12b   : > { %1029 = vmatmul.mubr.f32.gmra.mrb[28].mxu0 %v425_v59  ;;  %777 = vmatprep.mubr.f32.mxu1 %v428_v60  ;;  %v489_v59 = vld [vmem:[%s2428_s0 + $0x3d0] sm:$0xff]  ;;  %v492_v60 = vld [vmem:[%s2428_s0 + $0x3e8] sm:$0xff] }
 0x12c   : > { %1034 = vmatprep.mubr.f32.mxu0 %v430_v61  ;;  %v494_v61 = vld [vmem:[%s2428_s0 + $0x3f8] sm:$0xff] }
 0x12e   : > { %778 = vmatmul.mubr.f32.gmra.mrb[30].mxu1 %v427_v62  ;;  %v491_v62 = vld [vmem:[%s2428_s0 + $0x3e0] sm:$0xff] }
 0x12f   : > { %1035 = vmatmul.mubr.f32.gmra.mrb[30].mxu0 %v429_v63  ;;  %783 = vmatprep.mubr.f32.mxu1 %v432_v0  ;;  %v493_v63 = vld [vmem:[%s2428_s0 + $0x3f0] sm:$0xff] }
 0x130   : > { %1040 = vmatprep.mubr.f32.mxu0 %v434_v1 }
 0x132   : > { %784 = vmatmul.mubr.f32.gmra.mrb[32].mxu1 %v431_v2 }
 0x133   : > { %1041 = vmatmul.mubr.f32.gmra.mrb[32].mxu0 %v433_v3  ;;  %789 = vmatprep.mubr.f32.mxu1 %v436_v4 }
 0x134   : > { %1046 = vmatprep.mubr.f32.mxu0 %v438_v5 }
 0x136   : > { %790 = vmatmul.mubr.f32.gmra.mrb[34].mxu1 %v435_v6 }
 0x137   : > { %1047 = vmatmul.mubr.f32.gmra.mrb[34].mxu0 %v437_v7  ;;  %795 = vmatprep.mubr.f32.mxu1 %v440_v8 }
 0x138   : > { %1052 = vmatprep.mubr.f32.mxu0 %v442_v9 }
 0x13a   : > { %796 = vmatmul.mubr.f32.gmra.mrb[36].mxu1 %v439_v10 }
 0x13b   : > { %1053 = vmatmul.mubr.f32.gmra.mrb[36].mxu0 %v441_v11  ;;  %801 = vmatprep.mubr.f32.mxu1 %v444_v12 }
 0x13c   : > { %1058 = vmatprep.mubr.f32.mxu0 %v446_v13 }
 0x13e   : > { %802 = vmatmul.mubr.f32.gmra.mrb[38].mxu1 %v443_v14 }
 0x13f   : > { %1059 = vmatmul.mubr.f32.gmra.mrb[38].mxu0 %v445_v15  ;;  %807 = vmatprep.mubr.f32.mxu1 %v448_v16 }
 0x140   : > { %1064 = vmatprep.mubr.f32.mxu0 %v450_v17 }
 0x142   : > { %808 = vmatmul.mubr.f32.gmra.mrb[40].mxu1 %v447_v18 }
 0x143   : > { %1065 = vmatmul.mubr.f32.gmra.mrb[40].mxu0 %v449_v19  ;;  %813 = vmatprep.mubr.f32.mxu1 %v452_v20 }
 0x144   : > { %1070 = vmatprep.mubr.f32.mxu0 %v454_v21 }
 0x146   : > { %814 = vmatmul.mubr.f32.gmra.mrb[42].mxu1 %v451_v22 }
 0x147   : > { %1071 = vmatmul.mubr.f32.gmra.mrb[42].mxu0 %v453_v23  ;;  %819 = vmatprep.mubr.f32.mxu1 %v456_v24 }
 0x148   : > { %1076 = vmatprep.mubr.f32.mxu0 %v458_v25 }
 0x14a   : > { %820 = vmatmul.mubr.f32.gmra.mrb[44].mxu1 %v455_v26 }
 0x14b   : > { %1077 = vmatmul.mubr.f32.gmra.mrb[44].mxu0 %v457_v27  ;;  %825 = vmatprep.mubr.f32.mxu1 %v460_v28 }
 0x14c   : > { %1082 = vmatprep.mubr.f32.mxu0 %v462_v29 }
 0x14e   : > { %826 = vmatmul.mubr.f32.gmra.mrb[46].mxu1 %v459_v30 }
 0x14f   : > { %1083 = vmatmul.mubr.f32.gmra.mrb[46].mxu0 %v461_v31  ;;  %831 = vmatprep.mubr.f32.mxu1 %v464_v32 }
 0x150   : > { %1088 = vmatprep.mubr.f32.mxu0 %v466_v33 }
 0x152   : > { %832 = vmatmul.mubr.f32.gmra.mrb[48].mxu1 %v463_v34 }
 0x153   : > { %1089 = vmatmul.mubr.f32.gmra.mrb[48].mxu0 %v465_v35  ;;  %837 = vmatprep.mubr.f32.mxu1 %v468_v36 }
 0x154   : > { %1094 = vmatprep.mubr.f32.mxu0 %v470_v37 }
 0x156   : > { %838 = vmatmul.mubr.f32.gmra.mrb[50].mxu1 %v467_v38 }
 0x157   : > { %1095 = vmatmul.mubr.f32.gmra.mrb[50].mxu0 %v469_v39  ;;  %843 = vmatprep.mubr.f32.mxu1 %v472_v40 }
 0x158   : > { %1100 = vmatprep.mubr.f32.mxu0 %v474_v41 }
 0x15a   : > { %844 = vmatmul.mubr.f32.gmra.mrb[52].mxu1 %v471_v42 }
 0x15b   : > { %1101 = vmatmul.mubr.f32.gmra.mrb[52].mxu0 %v473_v43  ;;  %849 = vmatprep.mubr.f32.mxu1 %v476_v44 }
 0x15c   : > { %1106 = vmatprep.mubr.f32.mxu0 %v478_v45 }
 0x15e   : > { %850 = vmatmul.mubr.f32.gmra.mrb[54].mxu1 %v475_v46 }
 0x15f   : > { %1107 = vmatmul.mubr.f32.gmra.mrb[54].mxu0 %v477_v47  ;;  %855 = vmatprep.mubr.f32.mxu1 %v480_v48 }
 0x160   : > { %1112 = vmatprep.mubr.f32.mxu0 %v482_v49 }
 0x162   : > { %856 = vmatmul.mubr.f32.gmra.mrb[56].mxu1 %v479_v50 }
 0x163   : > { %1113 = vmatmul.mubr.f32.gmra.mrb[56].mxu0 %v481_v51  ;;  %861 = vmatprep.mubr.f32.mxu1 %v484_v52 }
 0x164   : > { %1118 = vmatprep.mubr.f32.mxu0 %v486_v53 }
 0x166   : > { %862 = vmatmul.mubr.f32.gmra.mrb[58].mxu1 %v483_v54 }
 0x167   : > { %1119 = vmatmul.mubr.f32.gmra.mrb[58].mxu0 %v485_v55  ;;  %867 = vmatprep.mubr.f32.mxu1 %v488_v56 }
 0x168   : > { %1124 = vmatprep.mubr.f32.mxu0 %v490_v57 }
 0x16a   : > { %868 = vmatmul.mubr.f32.gmra.mrb[60].mxu1 %v487_v58 }
 0x16b   : > { %1125 = vmatmul.mubr.f32.gmra.mrb[60].mxu0 %v489_v59  ;;  %873 = vmatprep.mubr.f32.mxu1 %v492_v60 }
 0x16c   : > { %1130 = vmatprep.mubr.f32.mxu0 %v494_v61 }
 0x16e   : > { %874 = vmatmul.mubr.f32.gmra.mrb[62].mxu1 %v491_v62 }
 0x16f   : > { %1131 = vmatmul.mubr.f32.gmra.mrb[62].mxu0 %v493_v63 }
 0x1c5   : > { %v689_v0 = vpop.f32.mrb[0].mxu1 }
 0x1c6   : > { %v946_v1 = vpop.f32.mrb[0].mxu0  ;;  %v691_v2 = vpop.f32.mrb[1].mxu1 }
 0x1c7   : > { %v947_v3 = vadd.f32 %v946_v1, %v689_v0  ;;  %v948_v4 = vpop.f32.mrb[1].mxu0 }
 0x1c8   : > { %v949_v5 = vadd.f32 %v948_v4, %v691_v2 }
 0x1c9   : > { %1332 = vst [vmem:[%s2698_s11] sm:$0xff] %v947_v3  ;;  %v695_v6 = vpop.f32.mrb[2].mxu1 }
 0x1ca   : > { %1333 = vst [vmem:[%s2698_s11 + $0x8] sm:$0xff] %v949_v5  ;;  %v952_v7 = vpop.f32.mrb[2].mxu0  ;;  %v697_v8 = vpop.f32.mrb[3].mxu1 }
 0x1cb   : > { %v953_v9 = vadd.f32 %v952_v7, %v695_v6  ;;  %v954_v10 = vpop.f32.mrb[3].mxu0 }
 0x1cc   : > { %v955_v11 = vadd.f32 %v954_v10, %v697_v8 }
 0x1cd   : > { %1334 = vst [vmem:[%s2698_s11 + $0x10] sm:$0xff] %v953_v9  ;;  %v701_v12 = vpop.f32.mrb[4].mxu1 }
 0x1ce   : > { %1335 = vst [vmem:[%s2698_s11 + $0x18] sm:$0xff] %v955_v11  ;;  %v958_v13 = vpop.f32.mrb[4].mxu0  ;;  %v703_v14 = vpop.f32.mrb[5].mxu1 }
 0x1cf   : > { %v959_v15 = vadd.f32 %v958_v13, %v701_v12  ;;  %v960_v16 = vpop.f32.mrb[5].mxu0 }
 0x1d0   : > { %v961_v17 = vadd.f32 %v960_v16, %v703_v14 }
 0x1d1   : > { %1336 = vst [vmem:[%s2698_s11 + $0x20] sm:$0xff] %v959_v15  ;;  %v707_v18 = vpop.f32.mrb[6].mxu1 }
 0x1d2   : > { %1337 = vst [vmem:[%s2698_s11 + $0x28] sm:$0xff] %v961_v17  ;;  %v964_v19 = vpop.f32.mrb[6].mxu0  ;;  %v709_v20 = vpop.f32.mrb[7].mxu1 }
 0x1d3   : > { %v965_v21 = vadd.f32 %v964_v19, %v707_v18  ;;  %v966_v22 = vpop.f32.mrb[7].mxu0 }
 0x1d4   : > { %v967_v23 = vadd.f32 %v966_v22, %v709_v20 }
 0x1d5   : > { %1338 = vst [vmem:[%s2698_s11 + $0x30] sm:$0xff] %v965_v21  ;;  %v713_v24 = vpop.f32.mrb[8].mxu1 }
 0x1d6   : > { %1339 = vst [vmem:[%s2698_s11 + $0x38] sm:$0xff] %v967_v23  ;;  %v970_v25 = vpop.f32.mrb[8].mxu0  ;;  %v715_v26 = vpop.f32.mrb[9].mxu1 }
 0x1d7   : > { %v971_v27 = vadd.f32 %v970_v25, %v713_v24  ;;  %v972_v28 = vpop.f32.mrb[9].mxu0 }
 0x1d8   : > { %v973_v29 = vadd.f32 %v972_v28, %v715_v26 }
 0x1d9   : > { %1340 = vst [vmem:[%s2698_s11 + $0x40] sm:$0xff] %v971_v27  ;;  %v719_v30 = vpop.f32.mrb[10].mxu1 }
 0x1da   : > { %1341 = vst [vmem:[%s2698_s11 + $0x48] sm:$0xff] %v973_v29  ;;  %v976_v31 = vpop.f32.mrb[10].mxu0  ;;  %v721_v32 = vpop.f32.mrb[11].mxu1 }
 0x1db   : > { %v977_v33 = vadd.f32 %v976_v31, %v719_v30  ;;  %v978_v34 = vpop.f32.mrb[11].mxu0 }
 0x1dc   : > { %v979_v35 = vadd.f32 %v978_v34, %v721_v32 }
 0x1dd   : > { %1342 = vst [vmem:[%s2698_s11 + $0x50] sm:$0xff] %v977_v33  ;;  %v725_v36 = vpop.f32.mrb[12].mxu1 }
 0x1de   : > { %1343 = vst [vmem:[%s2698_s11 + $0x58] sm:$0xff] %v979_v35  ;;  %v982_v37 = vpop.f32.mrb[12].mxu0  ;;  %v727_v38 = vpop.f32.mrb[13].mxu1 }
 0x1df   : > { %v983_v39 = vadd.f32 %v982_v37, %v725_v36  ;;  %v984_v40 = vpop.f32.mrb[13].mxu0 }
 0x1e0   : > { %v985_v41 = vadd.f32 %v984_v40, %v727_v38 }
 0x1e1   : > { %1344 = vst [vmem:[%s2698_s11 + $0x60] sm:$0xff] %v983_v39  ;;  %v731_v42 = vpop.f32.mrb[14].mxu1 }
 0x1e2   : > { %1345 = vst [vmem:[%s2698_s11 + $0x68] sm:$0xff] %v985_v41  ;;  %v988_v43 = vpop.f32.mrb[14].mxu0  ;;  %v733_v44 = vpop.f32.mrb[15].mxu1 }
 0x1e3   : > { %v989_v45 = vadd.f32 %v988_v43, %v731_v42  ;;  %v990_v46 = vpop.f32.mrb[15].mxu0 }
 0x1e4   : > { %v991_v47 = vadd.f32 %v990_v46, %v733_v44 }
 0x1e5   : > { %1346 = vst [vmem:[%s2698_s11 + $0x70] sm:$0xff] %v989_v45  ;;  %v737_v48 = vpop.f32.mrb[16].mxu1 }
 0x1e6   : > { %1347 = vst [vmem:[%s2698_s11 + $0x78] sm:$0xff] %v991_v47  ;;  %v994_v49 = vpop.f32.mrb[16].mxu0  ;;  %v739_v50 = vpop.f32.mrb[17].mxu1 }
 0x1e7   : > { %v995_v51 = vadd.f32 %v994_v49, %v737_v48  ;;  %v996_v52 = vpop.f32.mrb[17].mxu0 }
 0x1e8   : > { %v997_v53 = vadd.f32 %v996_v52, %v739_v50 }
 0x1e9   : > { %1348 = vst [vmem:[%s2698_s11 + $0x80] sm:$0xff] %v995_v51  ;;  %v743_v54 = vpop.f32.mrb[18].mxu1 }
 0x1ea   : > { %1349 = vst [vmem:[%s2698_s11 + $0x88] sm:$0xff] %v997_v53  ;;  %v1000_v55 = vpop.f32.mrb[18].mxu0  ;;  %v745_v56 = vpop.f32.mrb[19].mxu1 }
 0x1eb   : > { %v1001_v57 = vadd.f32 %v1000_v55, %v743_v54  ;;  %v1002_v58 = vpop.f32.mrb[19].mxu0 }
 0x1ec   : > { %v1003_v59 = vadd.f32 %v1002_v58, %v745_v56 }
 0x1ed   : > { %1350 = vst [vmem:[%s2698_s11 + $0x90] sm:$0xff] %v1001_v57  ;;  %v749_v60 = vpop.f32.mrb[20].mxu1 }
 0x1ee   : > { %1351 = vst [vmem:[%s2698_s11 + $0x98] sm:$0xff] %v1003_v59  ;;  %v1006_v61 = vpop.f32.mrb[20].mxu0  ;;  %v751_v62 = vpop.f32.mrb[21].mxu1 }
 0x1ef   : > { %v1007_v63 = vadd.f32 %v1006_v61, %v749_v60  ;;  %v1008_v0 = vpop.f32.mrb[21].mxu0 }
 0x1f0   : > { %v1009_v1 = vadd.f32 %v1008_v0, %v751_v62 }
 0x1f1   : > { %1352 = vst [vmem:[%s2698_s11 + $0xa0] sm:$0xff] %v1007_v63  ;;  %v755_v2 = vpop.f32.mrb[22].mxu1 }
 0x1f2   : > { %1353 = vst [vmem:[%s2698_s11 + $0xa8] sm:$0xff] %v1009_v1  ;;  %v1012_v3 = vpop.f32.mrb[22].mxu0  ;;  %v757_v4 = vpop.f32.mrb[23].mxu1 }
 0x1f3   : > { %v1013_v5 = vadd.f32 %v1012_v3, %v755_v2  ;;  %v1014_v6 = vpop.f32.mrb[23].mxu0 }
 0x1f4   : > { %v1015_v7 = vadd.f32 %v1014_v6, %v757_v4 }
 0x1f5   : > { %1354 = vst [vmem:[%s2698_s11 + $0xb0] sm:$0xff] %v1013_v5  ;;  %v761_v8 = vpop.f32.mrb[24].mxu1 }
 0x1f6   : > { %1355 = vst [vmem:[%s2698_s11 + $0xb8] sm:$0xff] %v1015_v7  ;;  %v1018_v9 = vpop.f32.mrb[24].mxu0  ;;  %v763_v10 = vpop.f32.mrb[25].mxu1 }
 0x1f7   : > { %v1019_v11 = vadd.f32 %v1018_v9, %v761_v8  ;;  %v1020_v12 = vpop.f32.mrb[25].mxu0 }
 0x1f8   : > { %v1021_v13 = vadd.f32 %v1020_v12, %v763_v10 }
 0x1f9   : > { %1356 = vst [vmem:[%s2698_s11 + $0xc0] sm:$0xff] %v1019_v11  ;;  %v767_v14 = vpop.f32.mrb[26].mxu1 }
 0x1fa   : > { %1357 = vst [vmem:[%s2698_s11 + $0xc8] sm:$0xff] %v1021_v13  ;;  %v1024_v15 = vpop.f32.mrb[26].mxu0  ;;  %v769_v16 = vpop.f32.mrb[27].mxu1 }
 0x1fb   : > { %v1025_v17 = vadd.f32 %v1024_v15, %v767_v14  ;;  %v1026_v18 = vpop.f32.mrb[27].mxu0 }
 0x1fc   : > { %v1027_v19 = vadd.f32 %v1026_v18, %v769_v16 }
 0x1fd   : > { %1358 = vst [vmem:[%s2698_s11 + $0xd0] sm:$0xff] %v1025_v17  ;;  %v773_v20 = vpop.f32.mrb[28].mxu1 }
 0x1fe   : > { %1359 = vst [vmem:[%s2698_s11 + $0xd8] sm:$0xff] %v1027_v19  ;;  %v1030_v21 = vpop.f32.mrb[28].mxu0  ;;  %v775_v22 = vpop.f32.mrb[29].mxu1 }
 0x1ff   : > { %v1031_v23 = vadd.f32 %v1030_v21, %v773_v20  ;;  %v1032_v24 = vpop.f32.mrb[29].mxu0 }
 0x200   : > { %v1033_v25 = vadd.f32 %v1032_v24, %v775_v22 }
 0x201   : > { %1360 = vst [vmem:[%s2698_s11 + $0xe0] sm:$0xff] %v1031_v23  ;;  %v779_v26 = vpop.f32.mrb[30].mxu1 }
 0x202   : > { %1361 = vst [vmem:[%s2698_s11 + $0xe8] sm:$0xff] %v1033_v25  ;;  %v1036_v27 = vpop.f32.mrb[30].mxu0  ;;  %v781_v28 = vpop.f32.mrb[31].mxu1 }
 0x203   : > { %v1037_v29 = vadd.f32 %v1036_v27, %v779_v26  ;;  %v1038_v30 = vpop.f32.mrb[31].mxu0 }
 0x204   : > { %v1039_v31 = vadd.f32 %v1038_v30, %v781_v28 }
 0x205   : > { %1362 = vst [vmem:[%s2698_s11 + $0xf0] sm:$0xff] %v1037_v29  ;;  %v785_v32 = vpop.f32.mrb[32].mxu1 }
 0x206   : > { %1363 = vst [vmem:[%s2698_s11 + $0xf8] sm:$0xff] %v1039_v31  ;;  %v1042_v33 = vpop.f32.mrb[32].mxu0  ;;  %v787_v34 = vpop.f32.mrb[33].mxu1 }
 0x207   : > { %v1043_v35 = vadd.f32 %v1042_v33, %v785_v32  ;;  %v1044_v36 = vpop.f32.mrb[33].mxu0 }
 0x208   : > { %v1045_v37 = vadd.f32 %v1044_v36, %v787_v34 }
 0x209   : > { %1364 = vst [vmem:[%s2698_s11 + $0x100] sm:$0xff] %v1043_v35  ;;  %v791_v38 = vpop.f32.mrb[34].mxu1 }
 0x20a   : > { %1365 = vst [vmem:[%s2698_s11 + $0x108] sm:$0xff] %v1045_v37  ;;  %v1048_v39 = vpop.f32.mrb[34].mxu0  ;;  %v793_v40 = vpop.f32.mrb[35].mxu1 }
 0x20b   : > { %v1049_v41 = vadd.f32 %v1048_v39, %v791_v38  ;;  %v1050_v42 = vpop.f32.mrb[35].mxu0 }
 0x20c   : > { %v1051_v43 = vadd.f32 %v1050_v42, %v793_v40 }
 0x20d   : > { %1366 = vst [vmem:[%s2698_s11 + $0x110] sm:$0xff] %v1049_v41  ;;  %v797_v44 = vpop.f32.mrb[36].mxu1 }
 0x20e   : > { %1367 = vst [vmem:[%s2698_s11 + $0x118] sm:$0xff] %v1051_v43  ;;  %v1054_v45 = vpop.f32.mrb[36].mxu0  ;;  %v799_v46 = vpop.f32.mrb[37].mxu1 }
 0x20f   : > { %v1055_v47 = vadd.f32 %v1054_v45, %v797_v44  ;;  %v1056_v48 = vpop.f32.mrb[37].mxu0 }
 0x210   : > { %v1057_v49 = vadd.f32 %v1056_v48, %v799_v46 }
 0x211   : > { %1368 = vst [vmem:[%s2698_s11 + $0x120] sm:$0xff] %v1055_v47  ;;  %v803_v50 = vpop.f32.mrb[38].mxu1 }
 0x212   : > { %1369 = vst [vmem:[%s2698_s11 + $0x128] sm:$0xff] %v1057_v49  ;;  %v1060_v51 = vpop.f32.mrb[38].mxu0  ;;  %v805_v52 = vpop.f32.mrb[39].mxu1 }
 0x213   : > { %v1061_v53 = vadd.f32 %v1060_v51, %v803_v50  ;;  %v1062_v54 = vpop.f32.mrb[39].mxu0 }
 0x214   : > { %v1063_v55 = vadd.f32 %v1062_v54, %v805_v52 }
 0x215   : > { %1370 = vst [vmem:[%s2698_s11 + $0x130] sm:$0xff] %v1061_v53  ;;  %v809_v56 = vpop.f32.mrb[40].mxu1 }
 0x216   : > { %1371 = vst [vmem:[%s2698_s11 + $0x138] sm:$0xff] %v1063_v55  ;;  %v1066_v57 = vpop.f32.mrb[40].mxu0  ;;  %v811_v58 = vpop.f32.mrb[41].mxu1 }
 0x217   : > { %v1067_v59 = vadd.f32 %v1066_v57, %v809_v56  ;;  %v1068_v60 = vpop.f32.mrb[41].mxu0 }
 0x218   : > { %v1069_v61 = vadd.f32 %v1068_v60, %v811_v58 }
 0x219   : > { %1372 = vst [vmem:[%s2698_s11 + $0x140] sm:$0xff] %v1067_v59  ;;  %v815_v62 = vpop.f32.mrb[42].mxu1 }
 0x21a   : > { %1373 = vst [vmem:[%s2698_s11 + $0x148] sm:$0xff] %v1069_v61  ;;  %v1072_v63 = vpop.f32.mrb[42].mxu0  ;;  %v817_v0 = vpop.f32.mrb[43].mxu1 }
 0x21b   : > { %v1073_v1 = vadd.f32 %v1072_v63, %v815_v62  ;;  %v1074_v2 = vpop.f32.mrb[43].mxu0 }
 0x21c   : > { %v1075_v3 = vadd.f32 %v1074_v2, %v817_v0  ;;  %v1421_v0 = vld [vmem:[%s2698_s11] sm:$0xff] (%p2979_p7)  ;;  %v1425_v2 = vld [vmem:[%s2698_s11 + $0x10] sm:$0xff] (%p2979_p7) }
 0x21d   : > { %1374 = vst [vmem:[%s2698_s11 + $0x150] sm:$0xff] %v1073_v1  ;;  %v821_v4 = vpop.f32.mrb[44].mxu1  ;;  %v1423_v1 = vld [vmem:[%s2698_s11 + $0x8] sm:$0xff] (%p2979_p7)  ;;  %1422 = vst [vmem:[%s2783_s28] sm:$0xff] (%p2979_p7), %v1421_v0 }
 0x21e   : > { %1375 = vst [vmem:[%s2698_s11 + $0x158] sm:$0xff] %v1075_v3  ;;  %v1078_v5 = vpop.f32.mrb[44].mxu0  ;;  %v823_v6 = vpop.f32.mrb[45].mxu1  ;;  %v1427_v3 = vld [vmem:[%s2698_s11 + $0x18] sm:$0xff] (%p2979_p7)  ;;  %1424 = vst [vmem:[%s2783_s28 + $0x8] sm:$0xff] (%p2979_p7), %v1423_v1 }
 0x21f   : > { %v1079_v7 = vadd.f32 %v1078_v5, %v821_v4  ;;  %v1080_v8 = vpop.f32.mrb[45].mxu0  ;;  %v1429_v4 = vld [vmem:[%s2698_s11 + $0x20] sm:$0xff] (%p2979_p7)  ;;  %v1431_v5 = vld [vmem:[%s2698_s11 + $0x28] sm:$0xff] (%p2979_p7)  ;;  %1426 = vst [vmem:[%s2783_s28 + $0x60] sm:$0xff] (%p2979_p7), %v1425_v2  ;;  %1428 = vst [vmem:[%s2783_s28 + $0x68] sm:$0xff] (%p2979_p7), %v1427_v3 }
 0x220   : > { %v1081_v9 = vadd.f32 %v1080_v8, %v823_v6  ;;  %v1433_v6 = vld [vmem:[%s2698_s11 + $0x30] sm:$0xff] (%p2979_p7)  ;;  %v1437_v8 = vld [vmem:[%s2698_s11 + $0x40] sm:$0xff] (%p2979_p7)  ;;  %1430 = vst [vmem:[%s2783_s28 + $0xc0] sm:$0xff] (%p2979_p7), %v1429_v4  ;;  %1432 = vst [vmem:[%s2783_s28 + $0xc8] sm:$0xff] (%p2979_p7), %v1431_v5 }
 0x221   : > { %1376 = vst [vmem:[%s2698_s11 + $0x160] sm:$0xff] %v1079_v7  ;;  %v827_v10 = vpop.f32.mrb[46].mxu1  ;;  %v1435_v7 = vld [vmem:[%s2698_s11 + $0x38] sm:$0xff] (%p2979_p7)  ;;  %1434 = vst [vmem:[%s2783_s28 + $0x120] sm:$0xff] (%p2979_p7), %v1433_v6 }
 0x222   : > { %1377 = vst [vmem:[%s2698_s11 + $0x168] sm:$0xff] %v1081_v9  ;;  %v1084_v11 = vpop.f32.mrb[46].mxu0  ;;  %v829_v12 = vpop.f32.mrb[47].mxu1  ;;  %v1439_v9 = vld [vmem:[%s2698_s11 + $0x48] sm:$0xff] (%p2979_p7)  ;;  %1436 = vst [vmem:[%s2783_s28 + $0x128] sm:$0xff] (%p2979_p7), %v1435_v7 }
 0x223   : > { %v1085_v13 = vadd.f32 %v1084_v11, %v827_v10  ;;  %v1086_v14 = vpop.f32.mrb[47].mxu0  ;;  %v1441_v10 = vld [vmem:[%s2698_s11 + $0x50] sm:$0xff] (%p2979_p7)  ;;  %v1443_v11 = vld [vmem:[%s2698_s11 + $0x58] sm:$0xff] (%p2979_p7)  ;;  %1438 = vst [vmem:[%s2783_s28 + $0x180] sm:$0xff] (%p2979_p7), %v1437_v8  ;;  %1440 = vst [vmem:[%s2783_s28 + $0x188] sm:$0xff] (%p2979_p7), %v1439_v9 }
 0x224   : > { %v1087_v15 = vadd.f32 %v1086_v14, %v829_v12  ;;  %v1445_v12 = vld [vmem:[%s2698_s11 + $0x60] sm:$0xff] (%p2979_p7)  ;;  %v1449_v14 = vld [vmem:[%s2698_s11 + $0x70] sm:$0xff] (%p2979_p7)  ;;  %1442 = vst [vmem:[%s2783_s28 + $0x1e0] sm:$0xff] (%p2979_p7), %v1441_v10  ;;  %1444 = vst [vmem:[%s2783_s28 + $0x1e8] sm:$0xff] (%p2979_p7), %v1443_v11 }
 0x225   : > { %1378 = vst [vmem:[%s2698_s11 + $0x170] sm:$0xff] %v1085_v13  ;;  %v833_v16 = vpop.f32.mrb[48].mxu1  ;;  %v1447_v13 = vld [vmem:[%s2698_s11 + $0x68] sm:$0xff] (%p2979_p7)  ;;  %1446 = vst [vmem:[%s2783_s28 + $0x240] sm:$0xff] (%p2979_p7), %v1445_v12 }
 0x226   : > { %1379 = vst [vmem:[%s2698_s11 + $0x178] sm:$0xff] %v1087_v15  ;;  %v1090_v17 = vpop.f32.mrb[48].mxu0  ;;  %v835_v18 = vpop.f32.mrb[49].mxu1  ;;  %1448 = vst [vmem:[%s2783_s28 + $0x248] sm:$0xff] (%p2979_p7), %v1447_v13  ;;  %v1451_v15 = vld [vmem:[%s2698_s11 + $0x78] sm:$0xff] (%p2979_p7) }
 0x227   : > { %v1091_v19 = vadd.f32 %v1090_v17, %v833_v16  ;;  %v1092_v20 = vpop.f32.mrb[49].mxu0  ;;  %1450 = vst [vmem:[%s2783_s28 + $0x2a0] sm:$0xff] (%p2979_p7), %v1449_v14  ;;  %v1453_v16 = vld [vmem:[%s2698_s11 + $0x80] sm:$0xff] (%p2979_p7)  ;;  %v1455_v17 = vld [vmem:[%s2698_s11 + $0x88] sm:$0xff] (%p2979_p7)  ;;  %1452 = vst [vmem:[%s2783_s28 + $0x2a8] sm:$0xff] (%p2979_p7), %v1451_v15 }
 0x228   : > { %v1093_v21 = vadd.f32 %v1092_v20, %v835_v18  ;;  %1454 = vst [vmem:[%s2783_s28 + $0x300] sm:$0xff] (%p2979_p7), %v1453_v16  ;;  %1456 = vst [vmem:[%s2783_s28 + $0x308] sm:$0xff] (%p2979_p7), %v1455_v17  ;;  %v1457_v18 = vld [vmem:[%s2698_s11 + $0x90] sm:$0xff] (%p2979_p7)  ;;  %v1461_v20 = vld [vmem:[%s2698_s11 + $0xa0] sm:$0xff] (%p2979_p7) }
 0x229   : > { %1380 = vst [vmem:[%s2698_s11 + $0x180] sm:$0xff] %v1091_v19  ;;  %v839_v22 = vpop.f32.mrb[50].mxu1  ;;  %v1459_v19 = vld [vmem:[%s2698_s11 + $0x98] sm:$0xff] (%p2979_p7)  ;;  %1458 = vst [vmem:[%s2783_s28 + $0x360] sm:$0xff] (%p2979_p7), %v1457_v18 }
 0x22a   : > { %1381 = vst [vmem:[%s2698_s11 + $0x188] sm:$0xff] %v1093_v21  ;;  %v1096_v23 = vpop.f32.mrb[50].mxu0  ;;  %v841_v24 = vpop.f32.mrb[51].mxu1  ;;  %1460 = vst [vmem:[%s2783_s28 + $0x368] sm:$0xff] (%p2979_p7), %v1459_v19  ;;  %v1463_v21 = vld [vmem:[%s2698_s11 + $0xa8] sm:$0xff] (%p2979_p7) }
 0x22b   : > { %v1097_v25 = vadd.f32 %v1096_v23, %v839_v22  ;;  %v1098_v26 = vpop.f32.mrb[51].mxu0  ;;  %1462 = vst [vmem:[%s2783_s28 + $0x3c0] sm:$0xff] (%p2979_p7), %v1461_v20  ;;  %v1465_v22 = vld [vmem:[%s2698_s11 + $0xb0] sm:$0xff] (%p2979_p7)  ;;  %v1467_v23 = vld [vmem:[%s2698_s11 + $0xb8] sm:$0xff] (%p2979_p7)  ;;  %1464 = vst [vmem:[%s2783_s28 + $0x3c8] sm:$0xff] (%p2979_p7), %v1463_v21 }
 0x22c   : > { %v1099_v27 = vadd.f32 %v1098_v26, %v841_v24  ;;  %1466 = vst [vmem:[%s2783_s28 + $0x420] sm:$0xff] (%p2979_p7), %v1465_v22  ;;  %1468 = vst [vmem:[%s2783_s28 + $0x428] sm:$0xff] (%p2979_p7), %v1467_v23  ;;  %v1469_v24 = vld [vmem:[%s2698_s11 + $0xc0] sm:$0xff] (%p2979_p7)  ;;  %v1473_v26 = vld [vmem:[%s2698_s11 + $0xd0] sm:$0xff] (%p2979_p7) }
 0x22d   : > { %1382 = vst [vmem:[%s2698_s11 + $0x190] sm:$0xff] %v1097_v25  ;;  %v845_v28 = vpop.f32.mrb[52].mxu1  ;;  %v1471_v25 = vld [vmem:[%s2698_s11 + $0xc8] sm:$0xff] (%p2979_p7)  ;;  %1470 = vst [vmem:[%s2783_s28 + $0x480] sm:$0xff] (%p2979_p7), %v1469_v24 }
 0x22e   : > { %1383 = vst [vmem:[%s2698_s11 + $0x198] sm:$0xff] %v1099_v27  ;;  %v1102_v29 = vpop.f32.mrb[52].mxu0  ;;  %v847_v30 = vpop.f32.mrb[53].mxu1  ;;  %1472 = vst [vmem:[%s2783_s28 + $0x488] sm:$0xff] (%p2979_p7), %v1471_v25  ;;  %v1475_v27 = vld [vmem:[%s2698_s11 + $0xd8] sm:$0xff] (%p2979_p7) }
 0x22f   : > { %v1103_v31 = vadd.f32 %v1102_v29, %v845_v28  ;;  %v1104_v32 = vpop.f32.mrb[53].mxu0  ;;  %1474 = vst [vmem:[%s2783_s28 + $0x4e0] sm:$0xff] (%p2979_p7), %v1473_v26  ;;  %v1477_v28 = vld [vmem:[%s2698_s11 + $0xe0] sm:$0xff] (%p2979_p7)  ;;  %v1479_v29 = vld [vmem:[%s2698_s11 + $0xe8] sm:$0xff] (%p2979_p7)  ;;  %1476 = vst [vmem:[%s2783_s28 + $0x4e8] sm:$0xff] (%p2979_p7), %v1475_v27 }
 0x230   : > { %v1105_v33 = vadd.f32 %v1104_v32, %v847_v30  ;;  %1478 = vst [vmem:[%s2783_s28 + $0x540] sm:$0xff] (%p2979_p7), %v1477_v28  ;;  %1480 = vst [vmem:[%s2783_s28 + $0x548] sm:$0xff] (%p2979_p7), %v1479_v29  ;;  %v1481_v30 = vld [vmem:[%s2698_s11 + $0xf0] sm:$0xff] (%p2979_p7)  ;;  %v1485_v32 = vld [vmem:[%s2698_s11 + $0x100] sm:$0xff] (%p2979_p7) }
 0x231   : > { %1384 = vst [vmem:[%s2698_s11 + $0x1a0] sm:$0xff] %v1103_v31  ;;  %v851_v34 = vpop.f32.mrb[54].mxu1  ;;  %v1483_v31 = vld [vmem:[%s2698_s11 + $0xf8] sm:$0xff] (%p2979_p7)  ;;  %1482 = vst [vmem:[%s2783_s28 + $0x5a0] sm:$0xff] (%p2979_p7), %v1481_v30 }
 0x232   : > { %1385 = vst [vmem:[%s2698_s11 + $0x1a8] sm:$0xff] %v1105_v33  ;;  %v1108_v35 = vpop.f32.mrb[54].mxu0  ;;  %v853_v36 = vpop.f32.mrb[55].mxu1  ;;  %1484 = vst [vmem:[%s2783_s28 + $0x5a8] sm:$0xff] (%p2979_p7), %v1483_v31  ;;  %v1487_v33 = vld [vmem:[%s2698_s11 + $0x108] sm:$0xff] (%p2979_p7) }
 0x233   : > { %v1109_v37 = vadd.f32 %v1108_v35, %v851_v34  ;;  %v1110_v38 = vpop.f32.mrb[55].mxu0  ;;  %1486 = vst [vmem:[%s2783_s28 + $0x600] sm:$0xff] (%p2979_p7), %v1485_v32  ;;  %v1489_v34 = vld [vmem:[%s2698_s11 + $0x110] sm:$0xff] (%p2979_p7)  ;;  %v1491_v35 = vld [vmem:[%s2698_s11 + $0x118] sm:$0xff] (%p2979_p7)  ;;  %1488 = vst [vmem:[%s2783_s28 + $0x608] sm:$0xff] (%p2979_p7), %v1487_v33 }
 0x234   : > { %v1111_v39 = vadd.f32 %v1110_v38, %v853_v36  ;;  %1490 = vst [vmem:[%s2783_s28 + $0x660] sm:$0xff] (%p2979_p7), %v1489_v34  ;;  %1492 = vst [vmem:[%s2783_s28 + $0x668] sm:$0xff] (%p2979_p7), %v1491_v35  ;;  %v1493_v36 = vld [vmem:[%s2698_s11 + $0x120] sm:$0xff] (%p2979_p7)  ;;  %v1497_v38 = vld [vmem:[%s2698_s11 + $0x130] sm:$0xff] (%p2979_p7) }
 0x235   : > { %1386 = vst [vmem:[%s2698_s11 + $0x1b0] sm:$0xff] %v1109_v37  ;;  %v857_v40 = vpop.f32.mrb[56].mxu1  ;;  %v1495_v37 = vld [vmem:[%s2698_s11 + $0x128] sm:$0xff] (%p2979_p7)  ;;  %1494 = vst [vmem:[%s2783_s28 + $0x6c0] sm:$0xff] (%p2979_p7), %v1493_v36 }
 0x236   : > { %1387 = vst [vmem:[%s2698_s11 + $0x1b8] sm:$0xff] %v1111_v39  ;;  %v1114_v41 = vpop.f32.mrb[56].mxu0  ;;  %v859_v42 = vpop.f32.mrb[57].mxu1  ;;  %1496 = vst [vmem:[%s2783_s28 + $0x6c8] sm:$0xff] (%p2979_p7), %v1495_v37  ;;  %v1499_v39 = vld [vmem:[%s2698_s11 + $0x138] sm:$0xff] (%p2979_p7) }
 0x237   : > { %v1115_v43 = vadd.f32 %v1114_v41, %v857_v40  ;;  %v1116_v44 = vpop.f32.mrb[57].mxu0  ;;  %1498 = vst [vmem:[%s2783_s28 + $0x720] sm:$0xff] (%p2979_p7), %v1497_v38  ;;  %v1501_v40 = vld [vmem:[%s2698_s11 + $0x140] sm:$0xff] (%p2979_p7)  ;;  %v1503_v41 = vld [vmem:[%s2698_s11 + $0x148] sm:$0xff] (%p2979_p7)  ;;  %1500 = vst [vmem:[%s2783_s28 + $0x728] sm:$0xff] (%p2979_p7), %v1499_v39 }
 0x238   : > { %v1117_v45 = vadd.f32 %v1116_v44, %v859_v42  ;;  %1502 = vst [vmem:[%s2783_s28 + $0x780] sm:$0xff] (%p2979_p7), %v1501_v40  ;;  %1504 = vst [vmem:[%s2783_s28 + $0x788] sm:$0xff] (%p2979_p7), %v1503_v41  ;;  %v1505_v42 = vld [vmem:[%s2698_s11 + $0x150] sm:$0xff] (%p2979_p7)  ;;  %v1509_v44 = vld [vmem:[%s2698_s11 + $0x160] sm:$0xff] (%p2979_p7) }
 0x239   : > { %1388 = vst [vmem:[%s2698_s11 + $0x1c0] sm:$0xff] %v1115_v43  ;;  %v863_v46 = vpop.f32.mrb[58].mxu1  ;;  %v1507_v43 = vld [vmem:[%s2698_s11 + $0x158] sm:$0xff] (%p2979_p7)  ;;  %1506 = vst [vmem:[%s2783_s28 + $0x7e0] sm:$0xff] (%p2979_p7), %v1505_v42 }
 0x23a   : > { %1389 = vst [vmem:[%s2698_s11 + $0x1c8] sm:$0xff] %v1117_v45  ;;  %v1120_v47 = vpop.f32.mrb[58].mxu0  ;;  %v865_v48 = vpop.f32.mrb[59].mxu1  ;;  %1508 = vst [vmem:[%s2783_s28 + $0x7e8] sm:$0xff] (%p2979_p7), %v1507_v43  ;;  %v1511_v45 = vld [vmem:[%s2698_s11 + $0x168] sm:$0xff] (%p2979_p7) }
 0x23b   : > { %v1121_v49 = vadd.f32 %v1120_v47, %v863_v46  ;;  %v1122_v50 = vpop.f32.mrb[59].mxu0  ;;  %1510 = vst [vmem:[%s2783_s28 + $0x840] sm:$0xff] (%p2979_p7), %v1509_v44  ;;  %v1513_v46 = vld [vmem:[%s2698_s11 + $0x170] sm:$0xff] (%p2979_p7)  ;;  %v1515_v47 = vld [vmem:[%s2698_s11 + $0x178] sm:$0xff] (%p2979_p7)  ;;  %1512 = vst [vmem:[%s2783_s28 + $0x848] sm:$0xff] (%p2979_p7), %v1511_v45 }
 0x23c   : > { %v1123_v51 = vadd.f32 %v1122_v50, %v865_v48  ;;  %1514 = vst [vmem:[%s2783_s28 + $0x8a0] sm:$0xff] (%p2979_p7), %v1513_v46  ;;  %1516 = vst [vmem:[%s2783_s28 + $0x8a8] sm:$0xff] (%p2979_p7), %v1515_v47  ;;  %v1517_v48 = vld [vmem:[%s2698_s11 + $0x180] sm:$0xff] (%p2979_p7)  ;;  %v1521_v50 = vld [vmem:[%s2698_s11 + $0x190] sm:$0xff] (%p2979_p7) }
 0x23d   : > { %1390 = vst [vmem:[%s2698_s11 + $0x1d0] sm:$0xff] %v1121_v49  ;;  %v869_v52 = vpop.f32.mrb[60].mxu1  ;;  %v1519_v49 = vld [vmem:[%s2698_s11 + $0x188] sm:$0xff] (%p2979_p7)  ;;  %1518 = vst [vmem:[%s2783_s28 + $0x900] sm:$0xff] (%p2979_p7), %v1517_v48 }
 0x23e   : > { %1391 = vst [vmem:[%s2698_s11 + $0x1d8] sm:$0xff] %v1123_v51  ;;  %v1126_v53 = vpop.f32.mrb[60].mxu0  ;;  %v871_v54 = vpop.f32.mrb[61].mxu1  ;;  %1520 = vst [vmem:[%s2783_s28 + $0x908] sm:$0xff] (%p2979_p7), %v1519_v49  ;;  %v1523_v51 = vld [vmem:[%s2698_s11 + $0x198] sm:$0xff] (%p2979_p7) }
 0x23f   : > { %v1127_v55 = vadd.f32 %v1126_v53, %v869_v52  ;;  %v1128_v56 = vpop.f32.mrb[61].mxu0  ;;  %1522 = vst [vmem:[%s2783_s28 + $0x960] sm:$0xff] (%p2979_p7), %v1521_v50  ;;  %v1525_v52 = vld [vmem:[%s2698_s11 + $0x1a0] sm:$0xff] (%p2979_p7)  ;;  %v1527_v53 = vld [vmem:[%s2698_s11 + $0x1a8] sm:$0xff] (%p2979_p7)  ;;  %1524 = vst [vmem:[%s2783_s28 + $0x968] sm:$0xff] (%p2979_p7), %v1523_v51 }
 0x240   : > { %v1129_v57 = vadd.f32 %v1128_v56, %v871_v54  ;;  %1402 = sbr.rel (!%p2979_p7) target bundleno = 591 (0x24f), region = 48  ;;  %1526 = vst [vmem:[%s2783_s28 + $0x9c0] sm:$0xff] (%p2979_p7), %v1525_v52  ;;  %1528 = vst [vmem:[%s2783_s28 + $0x9c8] sm:$0xff] (%p2979_p7), %v1527_v53  ;;  %v1529_v54 = vld [vmem:[%s2698_s11 + $0x1b0] sm:$0xff] (%p2979_p7)  ;;  %v1533_v56 = vld [vmem:[%s2698_s11 + $0x1c0] sm:$0xff] (%p2979_p7) }
 0x241   : > { %1392 = vst [vmem:[%s2698_s11 + $0x1e0] sm:$0xff] %v1127_v55  ;;  %v875_v58 = vpop.f32.mrb[62].mxu1  ;;  %v1531_v55 = vld [vmem:[%s2698_s11 + $0x1b8] sm:$0xff] (%p2979_p7)  ;;  %1530 = vst [vmem:[%s2783_s28 + $0xa20] sm:$0xff] (%p2979_p7), %v1529_v54 }
 0x242   : > { %1393 = vst [vmem:[%s2698_s11 + $0x1e8] sm:$0xff] %v1129_v57  ;;  %v1132_v59 = vpop.f32.mrb[62].mxu0  ;;  %v877_v60 = vpop.f32.mrb[63].mxu1  ;;  %1532 = vst [vmem:[%s2783_s28 + $0xa28] sm:$0xff] (%p2979_p7), %v1531_v55  ;;  %v1535_v57 = vld [vmem:[%s2698_s11 + $0x1c8] sm:$0xff] (%p2979_p7) }
 0x243   : > { %v1133_v61 = vadd.f32 %v1132_v59, %v875_v58  ;;  %v1134_v62 = vpop.f32.mrb[63].mxu0  ;;  %1534 = vst [vmem:[%s2783_s28 + $0xa80] sm:$0xff] (%p2979_p7), %v1533_v56  ;;  %1536 = vst [vmem:[%s2783_s28 + $0xa88] sm:$0xff] (%p2979_p7), %v1535_v57 }
 0x244   : > { %v1135_v63 = vadd.f32 %v1134_v62, %v877_v60  ;;  %v1537_v58 = vld [vmem:[%s2698_s11 + $0x1d0] sm:$0xff] (%p2979_p7) }
 0x245   : > { %1394 = vst [vmem:[%s2698_s11 + $0x1f0] sm:$0xff] %v1133_v61  ;;  %v1539_v59 = vld [vmem:[%s2698_s11 + $0x1d8] sm:$0xff] (%p2979_p7)  ;;  %1538 = vst [vmem:[%s2783_s28 + $0xae0] sm:$0xff] (%p2979_p7), %v1537_v58 }
 0x246   : > { %1395 = vst [vmem:[%s2698_s11 + $0x1f8] sm:$0xff] %v1135_v63  ;;  %1540 = vst [vmem:[%s2783_s28 + $0xae8] sm:$0xff] (%p2979_p7), %v1539_v59 }
 0x248   : > { %v1541_v60 = vld [vmem:[%s2698_s11 + $0x1e0] sm:$0xff] }
 0x249   : > { %v1543_v61 = vld [vmem:[%s2698_s11 + $0x1e8] sm:$0xff]  ;;  %1542 = vst [vmem:[%s2783_s28 + $0xb40] sm:$0xff] %v1541_v60 }
 0x24a   : > { %1544 = vst [vmem:[%s2783_s28 + $0xb48] sm:$0xff] %v1543_v61 }
 0x24c   : > { %v1545_v62 = vld [vmem:[%s2698_s11 + $0x1f0] sm:$0xff] }
 0x24d   : > { %1546 = vst [vmem:[%s2783_s28 + $0xba0] sm:$0xff] %v1545_v62  ;;  %v1547_v63 = vld [vmem:[%s2698_s11 + $0x1f8] sm:$0xff] }
 0x24e   : > { %1548 = vst [vmem:[%s2783_s28 + $0xba8] sm:$0xff] %v1547_v63 }
 0x24f PF: > { %s18_s21 = sadd.s32 1, %s2168_s21   ;;  %s2982_s14 = sld [smem:[#allocation12_spill]] }
 0x250   : > { %p2902_p10 = scmp.ge.s32.totalorder %s18_s21, 14   ;;  %s2983_s30 = sld [smem:[#allocation10_spill]] }
 0x251   : > { %s2984_s4 = sld [smem:[#allocation11_spill]]  ;;  %s2985_s9 = smov %s2124_s10 }
 0x252   : > { %s2986_s10 = smov %s2375_s3  ;;  %s2987_s11 = smov %s2132_s12 }
 0x253   : > { %s2988_s12 = smov %s2136_s13  ;;  %s2993_s17 = smov %s2160_s19 }
 0x254   : > { %s2994_s18 = smov %s2164_s20  ;;  %17 = sbr.rel (!%p2902_p10) target bundleno = 13 (0xd), region = 112 }
 0x255   : > { %s2989_s13 = smov %s2982_s14  ;;  %s2990_s14 = smov %s2144_s15 }
 0x256   : > { %s2991_s15 = smov %s2148_s16  ;;  %s2992_s16 = smov %s2372_s22 }
 0x257   : > { %s2995_s19 = smov %s2983_s30  ;;  %s2996_s20 = smov %s2984_s4 }
 0x25b   :  { %1564 = vsyncpa [#allocation4], 1 }
 0x25c   :  { %1566 = vsyncpa [#allocation4 + $0x1], 1 }
 0x25d   :  { %1567 = vsyncpa [#allocation6], 1 }
 0x25e   :  { %1569 = vsyncpa [#allocation6 + $0x1], 1 }

</bundles_post_ra>
